<compile_context>
chip_gen: v5e
topology: v5e:2x2
jax: 0.10.0
libtpu: 0.0.40
codegen_flags: <defaults>
</compile_context>

<pallas_src>
import functools

import jax
import jax.numpy as jnp
from jax.experimental import pallas as pl
from jax.experimental.pallas import tpu as pltpu


def _round_up(x, m):
    return ((x + m - 1) // m) * m


# ---------------------------------------------------------------------------
# Fused Pallas kernel: whole generator for one batch tile.
# ---------------------------------------------------------------------------
def _generator_kernel(x_ref, wd1_ref, bf1_ref, wd2_ref, bf2_ref, wd3_ref, bf3_ref,
                      o_ref):
    """Refs (per grid step = one tile of TILE_N batch elements):
      x_ref:   (TILE_N, K0)      flattened (Cin*H*W) noise
      wdI_ref: (K_{i-1}, K_i)    dense ConvTranspose2d matrix for layer i (VMEM-resident)
      bfI_ref: (1, K_i)          channel bias repeated over spatial positions
      o_ref:   (TILE_N, K3)      flattened (Cout*Ho*Wo) output
    Three sublane/lane-dense MXU matmuls; bias + activation fused once per layer."""
    h = jnp.dot(x_ref[...], wd1_ref[...], preferred_element_type=jnp.float32)
    h = jnp.maximum(h + bf1_ref[...], 0.0)                              # ReLU, (T, K1)
    h = jnp.dot(h, wd2_ref[...], preferred_element_type=jnp.float32)
    h = jnp.maximum(h + bf2_ref[...], 0.0)                              # ReLU, (T, K2)
    h = jnp.dot(h, wd3_ref[...], preferred_element_type=jnp.float32)
    o_ref[...] = jax.nn.sigmoid(h + bf3_ref[...]).astype(o_ref.dtype)   # (T, K3)


def _fused_generator(x_flat, wd1, bf1, wd2, bf2, wd3, bf3, tile_n):
    """x_flat: (Npad, K0) float32, Npad % tile_n == 0.  Returns (Npad, K3) float32."""
    n_pad, k0 = x_flat.shape
    k1, k2, k3 = wd1.shape[1], wd2.shape[1], wd3.shape[1]
    flops = 2 * n_pad * (k0 * k1 + k1 * k2 + k2 * k3)
    bytes_accessed = 4 * (x_flat.size + wd1.size + wd2.size + wd3.size
                          + bf1.size + bf2.size + bf3.size + n_pad * k3)
    return pl.pallas_call(
        _generator_kernel,
        out_shape=jax.ShapeDtypeStruct((n_pad, k3), x_flat.dtype),
        grid=(n_pad // tile_n,),
        in_specs=[
            pl.BlockSpec((tile_n, k0), lambda n: (n, 0)),
            pl.BlockSpec(wd1.shape, lambda n: (0, 0)),   # constant index maps ->
            pl.BlockSpec(bf1.shape, lambda n: (0, 0)),   # weights stay VMEM-resident
            pl.BlockSpec(wd2.shape, lambda n: (0, 0)),
            pl.BlockSpec(bf2.shape, lambda n: (0, 0)),
            pl.BlockSpec(wd3.shape, lambda n: (0, 0)),
            pl.BlockSpec(bf3.shape, lambda n: (0, 0)),
        ],
        out_specs=pl.BlockSpec((tile_n, k3), lambda n: (n, 0)),
        compiler_params=pltpu.CompilerParams(
            dimension_semantics=("parallel",),          # shard batch tiles across TCs
            vmem_limit_bytes=32 * 1024 * 1024),
        cost_estimate=pl.CostEstimate(flops=flops, transcendentals=n_pad * k3,
                                      bytes_accessed=bytes_accessed),
    )(x_flat, wd1, bf1, wd2, bf2, wd3, bf3)


# ---------------------------------------------------------------------------
# One-time lowering of ConvTranspose2d -> dense matrix (init-time, plain JAX)
# ---------------------------------------------------------------------------
def _shift_onehot(k, n_in, stride, n_out):
    """P[t, i, o] = 1.0 iff o == i*stride + t."""
    o = jnp.arange(n_out)[None, None, :]
    i = jnp.arange(n_in)[None, :, None]
    t = jnp.arange(k)[:, None, None]
    return (o == i * stride + t).astype(jnp.float32)


def _dense_convt_matrix(w, hi, wi, stride):
    """Dense M s.t. x_flat(Cin*Hi*Wi) @ M == ConvTranspose2d(x)_flat(Cout*Ho*Wo)."""
    cin, cout, k, _ = w.shape
    ho = (hi - 1) * stride + k
    wo = (wi - 1) * stride + k
    py = _shift_onehot(k, hi, stride, ho)   # (k, Hi, Ho)
    px = _shift_onehot(k, wi, stride, wo)   # (k, Wi, Wo)
    m = jnp.einsum("cdab,aio,bjp->cijdop", w, py, px,
                   precision=jax.lax.Precision.HIGHEST)
    return m.reshape(cin * hi * wi, cout * ho * wo)


# ---------------------------------------------------------------------------
# Parameter setup (deterministic) + one-shot SpectralNorm (as in __init__)
# ---------------------------------------------------------------------------
def l2normalize(v, eps=1e-12):
    return v / (jnp.linalg.norm(v) + eps)


def spectral_norm(w, key):
    """One-time weight scaling, mirroring the reference SpectralNorm()."""
    height = w.shape[0]
    w2d = w.reshape(height, -1)
    u = l2normalize(jax.random.normal(key, (height,), dtype=w.dtype))
    v = l2normalize(w2d.T @ u)
    u = l2normalize(w2d @ v)
    sigma = jnp.dot(u, w2d @ v)
    return w / sigma


def init_generator_params(key, channels=1, d=4, k=3, h_in=4, w_in=4):
    keys = jax.random.split(key, 6)

    def init_w(kk, cin, cout):
        bound = 1.0 / jnp.sqrt(float(cout * k * k))
        return jax.random.uniform(kk, (cin, cout, k, k), jnp.float32, -bound, bound)

    w1 = init_w(keys[0], channels, d * 2)
    w2 = init_w(keys[1], d * 2, d)
    w3 = init_w(keys[2], d, channels)
    b1 = jax.random.uniform(keys[3], (d * 2,), jnp.float32, -0.1, 0.1)
    b2 = jax.random.uniform(keys[4], (d,), jnp.float32, -0.1, 0.1)
    b3 = jax.random.uniform(keys[5], (channels,), jnp.float32, -0.1, 0.1)

    sk = jax.random.split(jax.random.PRNGKey(42), 3)
    w1 = spectral_norm(w1, sk[0])
    w2 = spectral_norm(w2, sk[1])
    w3 = spectral_norm(w3, sk[2])

    # Layer output spatial sizes (ConvTranspose2d, padding=0).
    h1, w1s = (h_in - 1) * 3 + k, (w_in - 1) * 3 + k
    h2, w2s = (h1 - 1) * 1 + k, (w1s - 1) * 1 + k
    h3, w3s = (h2 - 1) * 1 + k, (w2s - 1) * 1 + k

    params = dict(w1=w1, b1=b1, w2=w2, b2=b2, w3=w3, b3=b3)

    # One-time dense lowering (specialized to the input size).
    wd1 = _dense_convt_matrix(w1, h_in, w_in, 3)    # (K0, K1)
    wd2 = _dense_convt_matrix(w2, h1, w1s, 1)       # (K1, K2)
    wd3 = _dense_convt_matrix(w3, h2, w2s, 1)       # (K2, K3)
    bf1 = jnp.repeat(b1, h1 * w1s)[None, :]
    bf2 = jnp.repeat(b2, h2 * w2s)[None, :]
    bf3 = jnp.repeat(b3, h3 * w3s)[None, :]

    # Zero-pad the inner widths K1, K2 to multiples of 256 so every intermediate slab
    # is lane/MXU aligned on v5e/v6e/v7x. Padded bias lanes are 0 and the matching rows
    # of the next dense matrix are 0, so padded lanes stay exactly 0 through bias+ReLU
    # and contribute nothing to the following matmul (numerically exact).
    k1, k2 = wd1.shape[1], wd2.shape[1]
    k1p, k2p = _round_up(k1, 256), _round_up(k2, 256)
    params["wd1"] = jnp.pad(wd1, ((0, 0), (0, k1p - k1)))
    params["bf1"] = jnp.pad(bf1, ((0, 0), (0, k1p - k1)))
    params["wd2"] = jnp.pad(wd2, ((0, k1p - k1), (0, k2p - k2)))
    params["bf2"] = jnp.pad(bf2, ((0, 0), (0, k2p - k2)))
    params["wd3"] = jnp.pad(wd3, ((0, k2p - k2), (0, 0)))
    params["bf3"] = bf3                              # K3 = channels*h3*w3s, already 256

    out_chw = (channels, h3, w3s)
    return params, out_chw


# ---------------------------------------------------------------------------
# Batch tiling policy + Generator forward (matches the PyTorch nn.Sequential)
# ---------------------------------------------------------------------------
def _batch_tiling(n):
    """Return (n_padded, tile_n).
    256-row tiles for big batches (v6e/v7x MXU geometry), 128 when that keeps >= 2
    grid steps (both v7x TensorCores busy), one 8-sublane-aligned full tile for
    small batches."""
    if n >= 512:
        tile = 256
    elif n > 128:
        tile = 128
    else:
        tile = max(8, _round_up(n, 8))
    return _round_up(n, tile), tile


@functools.partial(jax.jit, static_argnames=("out_chw",))
def generator_forward(noise_nchw, params, out_chw):
    n = noise_nchw.shape[0]
    x_flat = noise_nchw.reshape(n, -1).astype(jnp.float32)   # (N, Cin*H*W), NCHW-flat
    n_pad, tile_n = _batch_tiling(n)
    if n_pad != n:
        x_flat = jnp.pad(x_flat, ((0, n_pad - n), (0, 0)))
    out_flat = _fused_generator(x_flat,
                                params["wd1"], params["bf1"],
                                params["wd2"], params["bf2"],
                                params["wd3"], params["bf3"],
                                tile_n)
    c, h, w = out_chw
    return out_flat[:n].reshape(n, c, h, w)                  # back to NCHW


# ---------------------------------------------------------------------------
# Pure-JAX reference (definition of ConvTranspose2d) for correctness check
# ---------------------------------------------------------------------------
def _ref_convt(x_nhwc, w, b, stride):
    N, H, W, Cin = x_nhwc.shape
    Cout, k = w.shape[1], w.shape[2]
    Ho = (H - 1) * stride + k
    Wo = (W - 1) * stride + k
    out = jnp.broadcast_to(b, (N, Ho, Wo, Cout)).astype(jnp.float32)
    for ki in range(k):
        for kj in range(k):
            contrib = jnp.einsum("nhwc,cd->nhwd", x_nhwc, w[:, :, ki, kj],
                                 precision=jax.lax.Precision.HIGHEST)
            out = out.at[:, ki:(H - 1) * stride + ki + 1:stride,
                         kj:(W - 1) * stride + kj + 1:stride, :].add(contrib)
    return out


def _ref_forward(noise_nchw, p):
    x = jnp.transpose(noise_nchw, (0, 2, 3, 1))
    x = jax.nn.relu(_ref_convt(x, p["w1"], p["b1"], 3))
    x = jax.nn.relu(_ref_convt(x, p["w2"], p["b2"], 1))
    x = jax.nn.sigmoid(_ref_convt(x, p["w3"], p["b3"], 1))
    return jnp.transpose(x, (0, 3, 1, 2))


if __name__ == "__main__":
    key = jax.random.PRNGKey(0)
    pkey, nkey1, nkey2 = jax.random.split(key, 3)
    params, out_chw = init_generator_params(pkey, channels=1, d=4, h_in=4, w_in=4)

    # Small NCHW noise, as the PyTorch module would consume: (N=2, C=1, 4, 4)
    noise = jax.random.normal(nkey1, (2, 1, 4, 4), jnp.float32)
    out = generator_forward(noise, params, out_chw=out_chw)
    out = jax.block_until_ready(out)
    assert out.shape == (2, 1, 16, 16), out.shape
    ref = _ref_forward(noise, params)
    max_err = float(jnp.max(jnp.abs(out - ref)))
    assert jnp.allclose(out, ref, atol=1e-4, rtol=1e-4), f"mismatch vs reference: {max_err}"

    # A second (still small) batch exercises the padding-free multi-sublane tile path.
    noise16 = jax.random.normal(nkey2, (16, 1, 4, 4), jnp.float32)
    out16 = jax.block_until_ready(generator_forward(noise16, params, out_chw=out_chw))
    ref16 = _ref_forward(noise16, params)
    assert jnp.allclose(out16, ref16, atol=1e-4, rtol=1e-4), "mismatch vs reference (N=16)"

    print("KERNEL_OK")
</pallas_src>

<mosaic_0001>
module attributes {stable_mosaic.version = 11 : i64} {
  func.func @_generator_kernel(%arg0: i32, %arg1: memref<8x16xf32, #tpu.memory_space<vmem>>, %arg2: memref<16x1280xf32, #tpu.memory_space<vmem>>, %arg3: memref<1x1280xf32, #tpu.memory_space<vmem>>, %arg4: memref<1280x1024xf32, #tpu.memory_space<vmem>>, %arg5: memref<1x1024xf32, #tpu.memory_space<vmem>>, %arg6: memref<1024x256xf32, #tpu.memory_space<vmem>>, %arg7: memref<1x256xf32, #tpu.memory_space<vmem>>, %arg8: memref<8x256xf32, #tpu.memory_space<vmem>>) attributes {dimension_semantics = [#tpu.dimension_semantics<parallel>], iteration_bounds = array<i64: 1>, scalar_prefetch = 0 : i64, scratch_operands = 0 : i64, tpu.core_type = #tpu.core_type<tc>, window_params = [{transform_indices = @transform_0, window_bounds = array<i64: 8, 16>}, {pipeline_mode = #tpu.pipeline_mode<synchronous>, transform_indices = @transform_1, window_bounds = array<i64: 16, 1280>}, {pipeline_mode = #tpu.pipeline_mode<synchronous>, transform_indices = @transform_2, window_bounds = array<i64: 1, 1280>}, {pipeline_mode = #tpu.pipeline_mode<synchronous>, transform_indices = @transform_3, window_bounds = array<i64: 1280, 1024>}, {pipeline_mode = #tpu.pipeline_mode<synchronous>, transform_indices = @transform_4, window_bounds = array<i64: 1, 1024>}, {pipeline_mode = #tpu.pipeline_mode<synchronous>, transform_indices = @transform_5, window_bounds = array<i64: 1024, 256>}, {pipeline_mode = #tpu.pipeline_mode<synchronous>, transform_indices = @transform_6, window_bounds = array<i64: 1, 256>}, {transform_indices = @transform_7, window_bounds = array<i64: 8, 256>}]} {
    %c0 = arith.constant 0 : index
    %c0_0 = arith.constant 0 : index
    %0 = vector.load %arg1[%c0, %c0_0] : memref<8x16xf32, #tpu.memory_space<vmem>>, vector<8x16xf32>
    %c0_1 = arith.constant 0 : index
    %c0_2 = arith.constant 0 : index
    %1 = vector.load %arg2[%c0_1, %c0_2] : memref<16x1280xf32, #tpu.memory_space<vmem>>, vector<16x1280xf32>
    %cst = arith.constant dense<0.000000e+00> : vector<8x1280xf32>
    %2 = tpu.matmul %0, %1, %cst {dimension_numbers = #tpu.dot_dimension_numbers<[1], [0], [0], [1], [0, 0, 1, 1], [], []>} : vector<8x16xf32>, vector<16x1280xf32>, vector<8x1280xf32> -> vector<8x1280xf32>
    %c0_3 = arith.constant 0 : index
    %c0_4 = arith.constant 0 : index
    %3 = vector.load %arg3[%c0_3, %c0_4] : memref<1x1280xf32, #tpu.memory_space<vmem>>, vector<1x1280xf32>
    %4 = vector.broadcast %3 : vector<1x1280xf32> to vector<8x1280xf32>
    %5 = arith.addf %2, %4 : vector<8x1280xf32>
    %cst_5 = arith.constant 0.000000e+00 : f32
    %6 = vector.broadcast %cst_5 : f32 to vector<8x1280xf32>
    %7 = arith.maximumf %5, %6 : vector<8x1280xf32>
    %c0_6 = arith.constant 0 : index
    %c0_7 = arith.constant 0 : index
    %8 = vector.load %arg4[%c0_6, %c0_7] : memref<1280x1024xf32, #tpu.memory_space<vmem>>, vector<1280x1024xf32>
    %cst_8 = arith.constant dense<0.000000e+00> : vector<8x1024xf32>
    %9 = tpu.matmul %7, %8, %cst_8 {dimension_numbers = #tpu.dot_dimension_numbers<[1], [0], [0], [1], [0, 0, 1, 1], [], []>} : vector<8x1280xf32>, vector<1280x1024xf32>, vector<8x1024xf32> -> vector<8x1024xf32>
    %c0_9 = arith.constant 0 : index
    %c0_10 = arith.constant 0 : index
    %10 = vector.load %arg5[%c0_9, %c0_10] : memref<1x1024xf32, #tpu.memory_space<vmem>>, vector<1x1024xf32>
    %11 = vector.broadcast %10 : vector<1x1024xf32> to vector<8x1024xf32>
    %12 = arith.addf %9, %11 : vector<8x1024xf32>
    %cst_11 = arith.constant 0.000000e+00 : f32
    %13 = vector.broadcast %cst_11 : f32 to vector<8x1024xf32>
    %14 = arith.maximumf %12, %13 : vector<8x1024xf32>
    %c0_12 = arith.constant 0 : index
    %c0_13 = arith.constant 0 : index
    %15 = vector.load %arg6[%c0_12, %c0_13] : memref<1024x256xf32, #tpu.memory_space<vmem>>, vector<1024x256xf32>
    %cst_14 = arith.constant dense<0.000000e+00> : vector<8x256xf32>
    %16 = tpu.matmul %14, %15, %cst_14 {dimension_numbers = #tpu.dot_dimension_numbers<[1], [0], [0], [1], [0, 0, 1, 1], [], []>} : vector<8x1024xf32>, vector<1024x256xf32>, vector<8x256xf32> -> vector<8x256xf32>
    %c0_15 = arith.constant 0 : index
    %c0_16 = arith.constant 0 : index
    %17 = vector.load %arg7[%c0_15, %c0_16] : memref<1x256xf32, #tpu.memory_space<vmem>>, vector<1x256xf32>
    %18 = vector.broadcast %17 : vector<1x256xf32> to vector<8x256xf32>
    %19 = arith.addf %16, %18 : vector<8x256xf32>
    %20 = arith.negf %19 : vector<8x256xf32>
    %21 = math.exp %20 : vector<8x256xf32>
    %cst_17 = arith.constant 1.000000e+00 : f32
    %22 = vector.broadcast %cst_17 : f32 to vector<8x256xf32>
    %23 = arith.addf %22, %21 : vector<8x256xf32>
    %24 = arith.divf %22, %23 : vector<8x256xf32>
    %c0_18 = arith.constant 0 : index
    %c0_19 = arith.constant 0 : index
    %25 = vector.load %arg8[%c0_18, %c0_19] : memref<8x256xf32, #tpu.memory_space<vmem>>, vector<8x256xf32>
    tpu.vector_store %arg8[%c0_18, %c0_19], %24 {strides = array<i32>} : memref<8x256xf32, #tpu.memory_space<vmem>>, vector<8x256xf32>,
    return
  }
  func.func @transform_0(%arg0: i32) -> (i32, i32) {
    %c0_i32 = arith.constant 0 : i32
    %c0_i32_0 = arith.constant 0 : i32
    return %arg0, %c0_i32 : i32, i32
  }
  func.func @transform_1(%arg0: i32) -> (i32, i32) {
    %c0_i32 = arith.constant 0 : i32
    %c0_i32_0 = arith.constant 0 : i32
    %c0_i32_1 = arith.constant 0 : i32
    return %c0_i32, %c0_i32_0 : i32, i32
  }
  func.func @transform_2(%arg0: i32) -> (i32, i32) {
    %c0_i32 = arith.constant 0 : i32
    %c0_i32_0 = arith.constant 0 : i32
    %c0_i32_1 = arith.constant 0 : i32
    return %c0_i32, %c0_i32_0 : i32, i32
  }
  func.func @transform_3(%arg0: i32) -> (i32, i32) {
    %c0_i32 = arith.constant 0 : i32
    %c0_i32_0 = arith.constant 0 : i32
    %c0_i32_1 = arith.constant 0 : i32
    return %c0_i32, %c0_i32_0 : i32, i32
  }
  func.func @transform_4(%arg0: i32) -> (i32, i32) {
    %c0_i32 = arith.constant 0 : i32
    %c0_i32_0 = arith.constant 0 : i32
    %c0_i32_1 = arith.constant 0 : i32
    return %c0_i32, %c0_i32_0 : i32, i32
  }
  func.func @transform_5(%arg0: i32) -> (i32, i32) {
    %c0_i32 = arith.constant 0 : i32
    %c0_i32_0 = arith.constant 0 : i32
    %c0_i32_1 = arith.constant 0 : i32
    return %c0_i32, %c0_i32_0 : i32, i32
  }
  func.func @transform_6(%arg0: i32) -> (i32, i32) {
    %c0_i32 = arith.constant 0 : i32
    %c0_i32_0 = arith.constant 0 : i32
    %c0_i32_1 = arith.constant 0 : i32
    return %c0_i32, %c0_i32_0 : i32, i32
  }
  func.func @transform_7(%arg0: i32) -> (i32, i32) {
    %c0_i32 = arith.constant 0 : i32
    %c0_i32_0 = arith.constant 0 : i32
    return %arg0, %c0_i32 : i32, i32
  }
}

</mosaic_0001>

<bundles_post_ra>
// kernel: generator_forward.1
= control target key start
LH: loop header
LB: loop body
LE: loop exit
PB: predicated region body
PF: predicated region fallthrough
CT: control target
= control target key end

     0   :  { %12 = vsyncpa [#allocation3], 0  ;;  %s4513_s0 = inlined_call_operand.vmem [shape: f32[8,16], index: 0, kind: input, shape index: {}]   ;;  %s4514_s1 = inlined_call_operand.hbm [shape: f32[16,1280], index: 1, kind: input, shape index: {}]   ;;  %s4515_s2 = inlined_call_operand.hbm [shape: f32[1,1280], index: 2, kind: input, shape index: {}]   ;;  %s4516_s3 = inlined_call_operand.hbm [shape: f32[1280,1024], index: 3, kind: input, shape index: {}]   ;;  %s4517_s4 = inlined_call_operand.hbm [shape: f32[1,1024], index: 4, kind: input, shape index: {}]   ;;  %s4518_s5 = inlined_call_operand.hbm [shape: f32[1024,256], index: 5, kind: input, shape index: {}]   ;;  %s4519_s6 = inlined_call_operand.hbm [shape: f32[1,256], index: 6, kind: input, shape index: {}]   ;;  %s4520_s7 = inlined_call_operand.vmem [shape: f32[8,256], index: 7, kind: output, shape index: {}]  }
   0x1   :  { %13 = vsyncpa [#allocation5], 0 }
   0x2   :  { %14 = vsyncpa [#allocation8], 0  ;;  %s36_s26 = sshll.u32 %s4515_s2, 4  ;;  %s37_s26 = int_to_ptr.hbm [resolvable:$true] %s36_s26 }
   0x3   :  { %15 = vsyncpa [#allocation11], 0  ;;  %s4095_s27 = smov [#allocation4]   ;;  %s60_s8 = sshll.u32 %s4517_s4, 4  ;;  %s61_s8 = int_to_ptr.hbm [resolvable:$true] %s60_s8 }
   0x4   :  { %s38_s28 = sshll.u32 %s4095_s27, 4  ;;  %s4096_s9 = smov [#allocation7]   ;;  %s39_s28 = int_to_ptr.vmem [resolvable:$true] %s38_s28 }
   0x5   :  { %41 = dma.hbm_to_vmem [thread:$0]  %s37_s26, 160, %s39_s28, [#allocation5]  }
   0x6   :  { %s62_s10 = sshll.u32 %s4096_s9, 4  ;;  %s22_s13 = sshll.u32 %s4514_s1, 4  ;;  %s63_s10 = int_to_ptr.vmem [resolvable:$true] %s62_s10  ;;  %s23_s13 = int_to_ptr.hbm [resolvable:$true] %s22_s13 }
   0x7   :  { %65 = dma.hbm_to_vmem [thread:$0]  %s61_s8, 128, %s63_s10, [#allocation8]  }
   0x8   :  { %s4097_s2 = smov [#allocation2]   ;;  %s46_s17 = sshll.u32 %s4516_s3, 4  ;;  %s47_s17 = int_to_ptr.hbm [resolvable:$true] %s46_s17 }
   0x9   :  { %s24_s14 = sshll.u32 %s4097_s2, 4  ;;  %s4098_s18 = smov 1280   ;;  %s25_s14 = int_to_ptr.vmem [resolvable:$true] %s24_s14 }
   0xa   :  { %s4099_s4 = smov 80   ;;  %s4100_s19 = smov [#allocation6]  }
   0xb   :  { %30 = dma.hbm_to_vmem [thread:$0]  %s23_s13, 2560, %s25_s14, [#allocation3], %s4098_s18, %s4098_s18, %s4099_s4  }
   0xc   :  { %s48_s20 = sshll.u32 %s4100_s19, 4  ;;  %s4101_s21 = smov 1024   ;;  %s49_s20 = int_to_ptr.vmem [resolvable:$true] %s48_s20 }
   0xd   :  { %s4102_s22 = smov 64   ;;  %s70_s24 = sshll.u32 %s4518_s5, 4  ;;  %s71_s24 = int_to_ptr.hbm [resolvable:$true] %s70_s24 }
   0xe   :  { %54 = dma.hbm_to_vmem [thread:$0]  %s47_s17, 163840, %s49_s20, [#allocation5], %s4101_s21, %s4101_s21, %s4102_s22  }
   0xf   :  { %s4103_s25 = smov [#allocation9]   ;;  %s84_s28 = sshll.u32 %s4519_s6, 4  ;;  %s85_s28 = int_to_ptr.hbm [resolvable:$true] %s84_s28 }
  0x10   :  { %s72_s26 = sshll.u32 %s4103_s25, 4  ;;  %s4104_s29 = smov 256   ;;  %s73_s26 = int_to_ptr.vmem [resolvable:$true] %s72_s26 }
  0x11   :  { %s4105_s30 = smov 16   ;;  %s4106_s8 = smov [#allocation10]  }
  0x12   :  { %78 = dma.hbm_to_vmem [thread:$0]  %s71_s24, 32768, %s73_s26, [#allocation8], %s4104_s29, %s4104_s29, %s4105_s30  }
  0x13   :  { %s86_s9 = sshll.u32 %s4106_s8, 4  ;;  %s87_s9 = int_to_ptr.vmem [resolvable:$true] %s86_s9 }
  0x14   :  { %89 = dma.hbm_to_vmem [thread:$0]  %s85_s28, 32, %s87_s9, [#allocation11]  }
  0x15   :  { %4087 = dma.done.wait [#allocation3], 2560  }
  0x16   :  { %4088 = vsyncadd [#allocation3], 4294964736 }
  0x17   :  { %4089 = dma.done.wait [#allocation5], 164000  }
  0x18   :  { %4090 = vsyncadd [#allocation5], 4294803296 }
  0x19   :  { %4091 = dma.done.wait [#allocation8], 32896  }
  0x1a   :  { %4092 = vsyncadd [#allocation8], 4294934400 }
  0x1b   :  { %4093 = dma.done.wait [#allocation11], 32  }
  0x1c   :  { %4094 = vsyncadd [#allocation11], 4294967264  ;;  %v125_v0 = vld [vmem:[#allocation2 + $0x50] sm:$0xff]  ;;  %v126_v1 = vld [vmem:[#allocation2 + $0x58] sm:$0xff]  ;;  %vm159_vm0 = vcmask 130048  }
  0x1d   :  { %v127_v2 = vld [vmem:[#allocation2 + $0x60] sm:$0xff]  ;;  %177 = vmatpush.msra.mxu0 %v125_v0  ;;  %197 = vmatpush.msra.mxu1 %v126_v1  ;;  %v128_v3 = vld [vmem:[#allocation2 + $0x68] sm:$0xff]  ;;  %v117_v6 = vld [vmem:[#allocation2 + $0x10] sm:$0xff] }
  0x1e   :  { %v115_v4 = vld [vmem:[#allocation2] sm:$0xff]  ;;  %v116_v5 = vld [vmem:[#allocation2 + $0x8] sm:$0xff]  ;;  %217 = vmatpush.msra.mxu2 %v127_v2  ;;  %237 = vmatpush.msra.mxu3 %v128_v3  ;;  %v118_v7 = vld [vmem:[#allocation2 + $0x18] sm:$0xff] }
  0x1f   :  { %v4168_v8 = vld [vmem:[%s4513_s0] sm:$0xff]  ;;  %178 = vmatpush.msra.mxu0 %v115_v4  ;;  %198 = vmatpush.msra.mxu1 %v116_v5  ;;  %v129_v9 = vld [vmem:[#allocation2 + $0x70] sm:$0xff]  ;;  %v130_v10 = vld [vmem:[#allocation2 + $0x78] sm:$0xff] }
  0x20   :  { %218 = vmatpush.msra.mxu2 %v117_v6  ;;  %238 = vmatpush.msra.mxu3 %v118_v7  ;;  %v131_v11 = vld [vmem:[#allocation2 + $0x80] sm:$0xff]  ;;  %v132_v12 = vld [vmem:[#allocation2 + $0x88] sm:$0xff]  ;;  %v121_v15 = vld [vmem:[#allocation2 + $0x30] sm:$0xff] }
  0x21   :  { %3909 = vmatmul.msk.f32.vlgmr.msra.gmra.mxu0 %vm159_vm0, %v4168_v8  ;;  %3910 = vmatmul.msk.f32.vlgmr.msra.gmra.mxu1 %vm159_vm0, %v4168_v8  ;;  %v119_v13 = vld [vmem:[#allocation2 + $0x20] sm:$0xff]  ;;  %v120_v14 = vld [vmem:[#allocation2 + $0x28] sm:$0xff]  ;;  %v122_v16 = vld [vmem:[#allocation2 + $0x38] sm:$0xff] }
  0x22   :  { %3911 = vmatmul.msk.f32.vlgmr.msra.gmra.mxu2 %vm159_vm0, %v4168_v8  ;;  %3912 = vmatmul.msk.f32.vlgmr.msra.gmra.mxu3 %vm159_vm0, %v4168_v8  ;;  %v133_v17 = vld [vmem:[#allocation2 + $0x90] sm:$0xff]  ;;  %v134_v18 = vld [vmem:[#allocation2 + $0x98] sm:$0xff]  ;;  %v123_v21 = vld [vmem:[#allocation2 + $0x40] sm:$0xff] }
  0x23   :  { %257 = vmatpush.msrb.mxu0 %v129_v9  ;;  %277 = vmatpush.msrb.mxu1 %v130_v10  ;;  %v493_v19 = vld [vmem:[#allocation6 + $0x3c0] sm:$0xff] }
  0x24   :  { %297 = vmatpush.msrb.mxu2 %v131_v11  ;;  %317 = vmatpush.msrb.mxu3 %v132_v12  ;;  %v621_v20 = vld [vmem:[#allocation6 + $0x7c0] sm:$0xff] }
  0x25   :  { %258 = vmatpush.msrb.mxu0 %v119_v13  ;;  %278 = vmatpush.msrb.mxu1 %v120_v14  ;;  %v124_v22 = vld [vmem:[#allocation2 + $0x48] sm:$0xff] }
  0x26   :  { %298 = vmatpush.msrb.mxu2 %v121_v15  ;;  %318 = vmatpush.msrb.mxu3 %v122_v16  ;;  %v485_v23 = vld [vmem:[#allocation6 + $0x380] sm:$0xff] }
  0x27   :  { %337 = vmatpush.msra.mxu0 %v133_v17  ;;  %357 = vmatpush.msra.mxu1 %v134_v18  ;;  %v613_v24 = vld [vmem:[#allocation6 + $0x780] sm:$0xff] }
  0x28   :  { %1671 = vmatpush.msra.mxu2 %v493_v19  ;;  %1691 = vmatpush.msra.mxu3 %v621_v20  ;;  %v749_v25 = vld [vmem:[#allocation6 + $0xbc0] sm:$0xff] }
  0x29   :  { %3913 = vmatmul.msk.f32.vlgmr.msrb.gmra.mxu0 %vm159_vm0, %v4168_v8  ;;  %3914 = vmatmul.msk.f32.vlgmr.msrb.gmra.mxu1 %vm159_vm0, %v4168_v8  ;;  %v877_v26 = vld [vmem:[#allocation6 + $0xfc0] sm:$0xff] }
  0x2a   :  { %3915 = vmatmul.msk.f32.vlgmr.msrb.gmra.mxu2 %vm159_vm0, %v4168_v8  ;;  %3916 = vmatmul.msk.f32.vlgmr.msrb.gmra.mxu3 %vm159_vm0, %v4168_v8  ;;  %v477_v27 = vld [vmem:[#allocation6 + $0x340] sm:$0xff] }
  0x2b   :  { %338 = vmatpush.msra.mxu0 %v123_v21  ;;  %358 = vmatpush.msra.mxu1 %v124_v22  ;;  %v605_v28 = vld [vmem:[#allocation6 + $0x740] sm:$0xff] }
  0x2c   :  { %1672 = vmatpush.msra.mxu2 %v485_v23  ;;  %1692 = vmatpush.msra.mxu3 %v613_v24  ;;  %v741_v29 = vld [vmem:[#allocation6 + $0xb80] sm:$0xff] }
  0x2d   :  { %v869_v30 = vld [vmem:[#allocation6 + $0xf80] sm:$0xff]  ;;  %1711 = vmatpush.msrb.mxu0 %v749_v25  ;;  %1731 = vmatpush.msrb.mxu1 %v877_v26 }
  0x2e   :  { %v469_v31 = vld [vmem:[#allocation6 + $0x300] sm:$0xff]  ;;  %1673 = vmatpush.msra.mxu2 %v477_v27  ;;  %1693 = vmatpush.msra.mxu3 %v605_v28 }
  0x2f   :  { %v597_v32 = vld [vmem:[#allocation6 + $0x700] sm:$0xff]  ;;  %1712 = vmatpush.msrb.mxu0 %v741_v29  ;;  %1732 = vmatpush.msrb.mxu1 %v869_v30 }
  0x30   :  { %v461_v33 = vld [vmem:[#allocation6 + $0x2c0] sm:$0xff]  ;;  %1674 = vmatpush.msra.mxu2 %v469_v31  ;;  %1694 = vmatpush.msra.mxu3 %v597_v32 }
  0x31   :  { %v589_v34 = vld [vmem:[#allocation6 + $0x6c0] sm:$0xff]  ;;  %3917 = vmatmul.msk.f32.vlgmr.msra.gmra.mxu0 %vm159_vm0, %v4168_v8  ;;  %3918 = vmatmul.msk.f32.vlgmr.msra.gmra.mxu1 %vm159_vm0, %v4168_v8 }
  0x32   :  { %v733_v35 = vld [vmem:[#allocation6 + $0xb40] sm:$0xff]  ;;  %1675 = vmatpush.msra.mxu2 %v461_v33  ;;  %1695 = vmatpush.msra.mxu3 %v589_v34 }
  0x33   :  { %v861_v36 = vld [vmem:[#allocation6 + $0xf40] sm:$0xff]  ;;  %1713 = vmatpush.msrb.mxu0 %v733_v35 }
  0x34   :  { %v453_v37 = vld [vmem:[#allocation6 + $0x280] sm:$0xff]  ;;  %1733 = vmatpush.msrb.mxu1 %v861_v36 }
  0x35   :  { %v581_v38 = vld [vmem:[#allocation6 + $0x680] sm:$0xff]  ;;  %1676 = vmatpush.msra.mxu2 %v453_v37 }
  0x36   :  { %v725_v39 = vld [vmem:[#allocation6 + $0xb00] sm:$0xff]  ;;  %1696 = vmatpush.msra.mxu3 %v581_v38 }
  0x37   :  { %v853_v40 = vld [vmem:[#allocation6 + $0xf00] sm:$0xff]  ;;  %1714 = vmatpush.msrb.mxu0 %v725_v39 }
  0x38   :  { %v445_v41 = vld [vmem:[#allocation6 + $0x240] sm:$0xff]  ;;  %1734 = vmatpush.msrb.mxu1 %v853_v40 }
  0x39   :  { %v573_v42 = vld [vmem:[#allocation6 + $0x640] sm:$0xff]  ;;  %1677 = vmatpush.msra.mxu2 %v445_v41 }
  0x3a   :  { %v717_v43 = vld [vmem:[#allocation6 + $0xac0] sm:$0xff]  ;;  %1697 = vmatpush.msra.mxu3 %v573_v42 }
  0x3b   :  { %v845_v44 = vld [vmem:[#allocation6 + $0xec0] sm:$0xff]  ;;  %1715 = vmatpush.msrb.mxu0 %v717_v43 }
  0x3c   :  { %v437_v45 = vld [vmem:[#allocation6 + $0x200] sm:$0xff]  ;;  %1735 = vmatpush.msrb.mxu1 %v845_v44 }
  0x3d   :  { %v565_v46 = vld [vmem:[#allocation6 + $0x600] sm:$0xff]  ;;  %1678 = vmatpush.msra.mxu2 %v437_v45 }
  0x3e   :  { %v709_v47 = vld [vmem:[#allocation6 + $0xa80] sm:$0xff]  ;;  %1698 = vmatpush.msra.mxu3 %v565_v46 }
  0x3f   :  { %v837_v48 = vld [vmem:[#allocation6 + $0xe80] sm:$0xff]  ;;  %1716 = vmatpush.msrb.mxu0 %v709_v47 }
  0x40   :  { %v429_v49 = vld [vmem:[#allocation6 + $0x1c0] sm:$0xff]  ;;  %1736 = vmatpush.msrb.mxu1 %v837_v48 }
  0x41   :  { %v557_v50 = vld [vmem:[#allocation6 + $0x5c0] sm:$0xff]  ;;  %1679 = vmatpush.msra.mxu2 %v429_v49 }
  0x42   :  { %v701_v51 = vld [vmem:[#allocation6 + $0xa40] sm:$0xff]  ;;  %1699 = vmatpush.msra.mxu3 %v557_v50 }
  0x43   :  { %v829_v52 = vld [vmem:[#allocation6 + $0xe40] sm:$0xff]  ;;  %1717 = vmatpush.msrb.mxu0 %v701_v51 }
  0x44   :  { %v421_v53 = vld [vmem:[#allocation6 + $0x180] sm:$0xff]  ;;  %1737 = vmatpush.msrb.mxu1 %v829_v52 }
  0x45   :  { %v549_v54 = vld [vmem:[#allocation6 + $0x580] sm:$0xff]  ;;  %1680 = vmatpush.msra.mxu2 %v421_v53 }
  0x46   :  { %v693_v55 = vld [vmem:[#allocation6 + $0xa00] sm:$0xff]  ;;  %1700 = vmatpush.msra.mxu3 %v549_v54 }
  0x47   :  { %v821_v56 = vld [vmem:[#allocation6 + $0xe00] sm:$0xff]  ;;  %1718 = vmatpush.msrb.mxu0 %v693_v55 }
  0x48   :  { %v413_v57 = vld [vmem:[#allocation6 + $0x140] sm:$0xff]  ;;  %1738 = vmatpush.msrb.mxu1 %v821_v56 }
  0x49   :  { %v541_v58 = vld [vmem:[#allocation6 + $0x540] sm:$0xff]  ;;  %1681 = vmatpush.msra.mxu2 %v413_v57 }
  0x4a   :  { %v685_v59 = vld [vmem:[#allocation6 + $0x9c0] sm:$0xff]  ;;  %1701 = vmatpush.msra.mxu3 %v541_v58 }
  0x4b   :  { %v813_v60 = vld [vmem:[#allocation6 + $0xdc0] sm:$0xff]  ;;  %1719 = vmatpush.msrb.mxu0 %v685_v59 }
  0x4c   :  { %v405_v61 = vld [vmem:[#allocation6 + $0x100] sm:$0xff]  ;;  %1739 = vmatpush.msrb.mxu1 %v813_v60 }
  0x4d   :  { %v533_v62 = vld [vmem:[#allocation6 + $0x500] sm:$0xff]  ;;  %1682 = vmatpush.msra.mxu2 %v405_v61 }
  0x4e   :  { %v677_v63 = vld [vmem:[#allocation6 + $0x980] sm:$0xff]  ;;  %1702 = vmatpush.msra.mxu3 %v533_v62 }
  0x4f   :  { %v805_v0 = vld [vmem:[#allocation6 + $0xd80] sm:$0xff]  ;;  %1720 = vmatpush.msrb.mxu0 %v677_v63 }
  0x50   :  { %v397_v1 = vld [vmem:[#allocation6 + $0xc0] sm:$0xff]  ;;  %1740 = vmatpush.msrb.mxu1 %v805_v0 }
  0x51   :  { %v525_v2 = vld [vmem:[#allocation6 + $0x4c0] sm:$0xff]  ;;  %1683 = vmatpush.msra.mxu2 %v397_v1 }
  0x52   :  { %v669_v3 = vld [vmem:[#allocation6 + $0x940] sm:$0xff]  ;;  %1703 = vmatpush.msra.mxu3 %v525_v2 }
  0x53   :  { %v797_v4 = vld [vmem:[#allocation6 + $0xd40] sm:$0xff]  ;;  %1721 = vmatpush.msrb.mxu0 %v669_v3 }
  0x54   :  { %v389_v5 = vld [vmem:[#allocation6 + $0x80] sm:$0xff]  ;;  %1741 = vmatpush.msrb.mxu1 %v797_v4 }
  0x55   :  { %v517_v6 = vld [vmem:[#allocation6 + $0x480] sm:$0xff]  ;;  %1684 = vmatpush.msra.mxu2 %v389_v5 }
  0x56   :  { %v661_v7 = vld [vmem:[#allocation6 + $0x900] sm:$0xff]  ;;  %1704 = vmatpush.msra.mxu3 %v517_v6 }
  0x57   :  { %v789_v8 = vld [vmem:[#allocation6 + $0xd00] sm:$0xff]  ;;  %1722 = vmatpush.msrb.mxu0 %v661_v7 }
  0x58   :  { %v381_v9 = vld [vmem:[#allocation6 + $0x40] sm:$0xff]  ;;  %1742 = vmatpush.msrb.mxu1 %v789_v8 }
  0x59   :  { %v509_v10 = vld [vmem:[#allocation6 + $0x440] sm:$0xff]  ;;  %1685 = vmatpush.msra.mxu2 %v381_v9 }
  0x5a   :  { %v653_v11 = vld [vmem:[#allocation6 + $0x8c0] sm:$0xff]  ;;  %1705 = vmatpush.msra.mxu3 %v509_v10 }
  0x5b   :  { %v781_v12 = vld [vmem:[#allocation6 + $0xcc0] sm:$0xff]  ;;  %1723 = vmatpush.msrb.mxu0 %v653_v11 }
  0x5c   :  { %v373_v13 = vld [vmem:[#allocation6] sm:$0xff]  ;;  %1743 = vmatpush.msrb.mxu1 %v781_v12 }
  0x5d   :  { %v501_v14 = vld [vmem:[#allocation6 + $0x400] sm:$0xff]  ;;  %1686 = vmatpush.msra.mxu2 %v373_v13 }
  0x5e   :  { %v1005_v15 = vld [vmem:[#allocation6 + $0x13c0] sm:$0xff]  ;;  %1706 = vmatpush.msra.mxu3 %v501_v14 }
  0x5f   :  { %v1133_v16 = vld [vmem:[#allocation6 + $0x17c0] sm:$0xff]  ;;  %1751 = vmatpush.msrb.mxu2 %v1005_v15 }
  0x60   :  { %v645_v17 = vld [vmem:[#allocation6 + $0x880] sm:$0xff]  ;;  %1771 = vmatpush.msrb.mxu3 %v1133_v16 }
  0x61   :  { %v773_v18 = vld [vmem:[#allocation6 + $0xc80] sm:$0xff]  ;;  %1724 = vmatpush.msrb.mxu0 %v645_v17 }
  0x62   :  { %v997_v19 = vld [vmem:[#allocation6 + $0x1380] sm:$0xff]  ;;  %1744 = vmatpush.msrb.mxu1 %v773_v18 }
  0x63   :  { %v1125_v20 = vld [vmem:[#allocation6 + $0x1780] sm:$0xff]  ;;  %1752 = vmatpush.msrb.mxu2 %v997_v19 }
  0x64   :  { %v637_v21 = vld [vmem:[#allocation6 + $0x840] sm:$0xff]  ;;  %1772 = vmatpush.msrb.mxu3 %v1125_v20 }
  0x65   :  { %v765_v22 = vld [vmem:[#allocation6 + $0xc40] sm:$0xff]  ;;  %1725 = vmatpush.msrb.mxu0 %v637_v21  ;;  %v4190_v21 = vld [vmem:[#allocation4] sm:$0xff] }
  0x66   :  { %v989_v23 = vld [vmem:[#allocation6 + $0x1340] sm:$0xff]  ;;  %1745 = vmatpush.msrb.mxu1 %v765_v22  ;;  %v139_v22 = vperm.slane %v4190_v21, 0 }
  0x67   :  { %v1117_v24 = vld [vmem:[#allocation6 + $0x1740] sm:$0xff]  ;;  %1753 = vmatpush.msrb.mxu2 %v989_v23  ;;  %v140_v23 = vperm.slane %v4190_v21, 1 }
  0x68   :  { %v629_v25 = vld [vmem:[#allocation6 + $0x800] sm:$0xff]  ;;  %1773 = vmatpush.msrb.mxu3 %v1117_v24 }
  0x69   :  { %v757_v26 = vld [vmem:[#allocation6 + $0xc00] sm:$0xff]  ;;  %1726 = vmatpush.msrb.mxu0 %v629_v25 }
  0x6a   :  { %v981_v27 = vld [vmem:[#allocation6 + $0x1300] sm:$0xff]  ;;  %1746 = vmatpush.msrb.mxu1 %v757_v26 }
  0x6b   :  { %v1109_v28 = vld [vmem:[#allocation6 + $0x1700] sm:$0xff]  ;;  %1754 = vmatpush.msrb.mxu2 %v981_v27 }
  0x6c   :  { %v1261_v29 = vld [vmem:[#allocation6 + $0x1bc0] sm:$0xff]  ;;  %1774 = vmatpush.msrb.mxu3 %v1109_v28 }
  0x6d   :  { %v1389_v30 = vld [vmem:[#allocation6 + $0x1fc0] sm:$0xff]  ;;  %1791 = vmatpush.msra.mxu0 %v1261_v29 }
  0x6e   :  { %v973_v31 = vld [vmem:[#allocation6 + $0x12c0] sm:$0xff]  ;;  %1811 = vmatpush.msra.mxu1 %v1389_v30 }
  0x6f   :  { %v1101_v32 = vld [vmem:[#allocation6 + $0x16c0] sm:$0xff]  ;;  %1755 = vmatpush.msrb.mxu2 %v973_v31 }
  0x70   :  { %v1253_v33 = vld [vmem:[#allocation6 + $0x1b80] sm:$0xff]  ;;  %1775 = vmatpush.msrb.mxu3 %v1101_v32  ;;  %v141_v32 = vperm.slane %v4190_v21, 2 }
  0x71   :  { %v1381_v34 = vld [vmem:[#allocation6 + $0x1f80] sm:$0xff]  ;;  %1792 = vmatpush.msra.mxu0 %v1253_v33  ;;  %v142_v33 = vperm.slane %v4190_v21, 3 }
  0x72   :  { %v965_v35 = vld [vmem:[#allocation6 + $0x1280] sm:$0xff]  ;;  %1812 = vmatpush.msra.mxu1 %v1381_v34 }
  0x73   :  { %v1093_v36 = vld [vmem:[#allocation6 + $0x1680] sm:$0xff]  ;;  %1756 = vmatpush.msrb.mxu2 %v965_v35 }
  0x74   :  { %v1245_v37 = vld [vmem:[#allocation6 + $0x1b40] sm:$0xff]  ;;  %1776 = vmatpush.msrb.mxu3 %v1093_v36  ;;  %v143_v36 = vperm.slane %v4190_v21, 4 }
  0x75   :  { %v1373_v38 = vld [vmem:[#allocation6 + $0x1f40] sm:$0xff]  ;;  %1793 = vmatpush.msra.mxu0 %v1245_v37  ;;  %v144_v37 = vperm.slane %v4190_v21, 5 }
  0x76   :  { %v957_v39 = vld [vmem:[#allocation6 + $0x1240] sm:$0xff]  ;;  %1813 = vmatpush.msra.mxu1 %v1373_v38 }
  0x77   :  { %v1085_v40 = vld [vmem:[#allocation6 + $0x1640] sm:$0xff]  ;;  %1757 = vmatpush.msrb.mxu2 %v957_v39 }
  0x78   :  { %v1237_v41 = vld [vmem:[#allocation6 + $0x1b00] sm:$0xff]  ;;  %1777 = vmatpush.msrb.mxu3 %v1085_v40 }
  0x79   :  { %v1365_v42 = vld [vmem:[#allocation6 + $0x1f00] sm:$0xff]  ;;  %1794 = vmatpush.msra.mxu0 %v1237_v41 }
  0x7a   :  { %v949_v43 = vld [vmem:[#allocation6 + $0x1200] sm:$0xff]  ;;  %1814 = vmatpush.msra.mxu1 %v1365_v42 }
  0x7b   :  { %v1077_v44 = vld [vmem:[#allocation6 + $0x1600] sm:$0xff]  ;;  %1758 = vmatpush.msrb.mxu2 %v949_v43 }
  0x7c   :  { %v1229_v45 = vld [vmem:[#allocation6 + $0x1ac0] sm:$0xff]  ;;  %1778 = vmatpush.msrb.mxu3 %v1077_v44 }
  0x7d   :  { %v1357_v46 = vld [vmem:[#allocation6 + $0x1ec0] sm:$0xff]  ;;  %1795 = vmatpush.msra.mxu0 %v1229_v45 }
  0x7e   :  { %v941_v47 = vld [vmem:[#allocation6 + $0x11c0] sm:$0xff]  ;;  %1815 = vmatpush.msra.mxu1 %v1357_v46 }
  0x7f   :  { %v1069_v48 = vld [vmem:[#allocation6 + $0x15c0] sm:$0xff]  ;;  %1759 = vmatpush.msrb.mxu2 %v941_v47 }
  0x80   :  { %v1221_v49 = vld [vmem:[#allocation6 + $0x1a80] sm:$0xff]  ;;  %1779 = vmatpush.msrb.mxu3 %v1069_v48 }
  0x81   :  { %v1349_v50 = vld [vmem:[#allocation6 + $0x1e80] sm:$0xff]  ;;  %1796 = vmatpush.msra.mxu0 %v1221_v49 }
  0x82   :  { %v933_v51 = vld [vmem:[#allocation6 + $0x1180] sm:$0xff]  ;;  %1816 = vmatpush.msra.mxu1 %v1349_v50 }
  0x83   :  { %v1061_v52 = vld [vmem:[#allocation6 + $0x1580] sm:$0xff]  ;;  %1760 = vmatpush.msrb.mxu2 %v933_v51 }
  0x84   :  { %v1213_v53 = vld [vmem:[#allocation6 + $0x1a40] sm:$0xff]  ;;  %1780 = vmatpush.msrb.mxu3 %v1061_v52 }
  0x85   :  { %v1341_v54 = vld [vmem:[#allocation6 + $0x1e40] sm:$0xff]  ;;  %1797 = vmatpush.msra.mxu0 %v1213_v53  ;;  %v494_v53 = vld [vmem:[#allocation6 + $0x3c8] sm:$0xff] }
  0x86   :  { %v925_v55 = vld [vmem:[#allocation6 + $0x1140] sm:$0xff]  ;;  %1817 = vmatpush.msra.mxu1 %v1341_v54  ;;  %v622_v54 = vld [vmem:[#allocation6 + $0x7c8] sm:$0xff] }
  0x87   :  { %v1053_v56 = vld [vmem:[#allocation6 + $0x1540] sm:$0xff]  ;;  %1761 = vmatpush.msrb.mxu2 %v925_v55 }
  0x88   :  { %v1205_v57 = vld [vmem:[#allocation6 + $0x1a00] sm:$0xff]  ;;  %1781 = vmatpush.msrb.mxu3 %v1053_v56 }
  0x89   :  { %v1333_v58 = vld [vmem:[#allocation6 + $0x1e00] sm:$0xff]  ;;  %1798 = vmatpush.msra.mxu0 %v1205_v57 }
  0x8a   :  { %v917_v59 = vld [vmem:[#allocation6 + $0x1100] sm:$0xff]  ;;  %1818 = vmatpush.msra.mxu1 %v1333_v58  ;;  %v486_v58 = vld [vmem:[#allocation6 + $0x388] sm:$0xff] }
  0x8b   :  { %v1045_v60 = vld [vmem:[#allocation6 + $0x1500] sm:$0xff]  ;;  %1762 = vmatpush.msrb.mxu2 %v917_v59  ;;  %v614_v59 = vld [vmem:[#allocation6 + $0x788] sm:$0xff] }
  0x8c   :  { %v1197_v61 = vld [vmem:[#allocation6 + $0x19c0] sm:$0xff]  ;;  %1782 = vmatpush.msrb.mxu3 %v1045_v60  ;;  %v145_v60 = vperm.slane %v4190_v21, 6 }
  0x8d   :  { %v1325_v62 = vld [vmem:[#allocation6 + $0x1dc0] sm:$0xff]  ;;  %1799 = vmatpush.msra.mxu0 %v1197_v61 }
  0x8e   :  { %v909_v63 = vld [vmem:[#allocation6 + $0x10c0] sm:$0xff]  ;;  %1819 = vmatpush.msra.mxu1 %v1325_v62 }
  0x8f   :  { %v1037_v0 = vld [vmem:[#allocation6 + $0x14c0] sm:$0xff]  ;;  %1763 = vmatpush.msrb.mxu2 %v909_v63 }
  0x90   :  { %v1189_v1 = vld [vmem:[#allocation6 + $0x1980] sm:$0xff]  ;;  %1783 = vmatpush.msrb.mxu3 %v1037_v0  ;;  %v478_v0 = vld [vmem:[#allocation6 + $0x348] sm:$0xff] }
  0x91   :  { %v1317_v2 = vld [vmem:[#allocation6 + $0x1d80] sm:$0xff]  ;;  %1800 = vmatpush.msra.mxu0 %v1189_v1  ;;  %v606_v1 = vld [vmem:[#allocation6 + $0x748] sm:$0xff] }
  0x92   :  { %1820 = vmatpush.msra.mxu1 %v1317_v2  ;;  %v901_v3 = vld [vmem:[#allocation6 + $0x1080] sm:$0xff] }
  0x93   :  { %v1029_v4 = vld [vmem:[#allocation6 + $0x1480] sm:$0xff]  ;;  %1764 = vmatpush.msrb.mxu2 %v901_v3 }
  0x94   :  { %v1181_v5 = vld [vmem:[#allocation6 + $0x1940] sm:$0xff]  ;;  %1784 = vmatpush.msrb.mxu3 %v1029_v4  ;;  %v146_v4 = vperm.slane %v4190_v21, 7  ;;  %v446_v21 = vld [vmem:[#allocation6 + $0x248] sm:$0xff] }
  0x95   :  { %v1309_v6 = vld [vmem:[#allocation6 + $0x1d40] sm:$0xff]  ;;  %1801 = vmatpush.msra.mxu0 %v1181_v5  ;;  %v470_v5 = vld [vmem:[#allocation6 + $0x308] sm:$0xff] }
  0x96   :  { %1821 = vmatpush.msra.mxu1 %v1309_v6  ;;  %v893_v7 = vld [vmem:[#allocation6 + $0x1040] sm:$0xff]  ;;  %v598_v6 = vld [vmem:[#allocation6 + $0x708] sm:$0xff] }
  0x97   :  { %v1021_v8 = vld [vmem:[#allocation6 + $0x1440] sm:$0xff]  ;;  %1765 = vmatpush.msrb.mxu2 %v893_v7 }
  0x98   :  { %v1173_v9 = vld [vmem:[#allocation6 + $0x1900] sm:$0xff]  ;;  %1785 = vmatpush.msrb.mxu3 %v1021_v8 }
  0x99   :  { %v1301_v10 = vld [vmem:[#allocation6 + $0x1d00] sm:$0xff]  ;;  %1802 = vmatpush.msra.mxu0 %v1173_v9 }
  0x9a   :  { %v885_v11 = vld [vmem:[#allocation6 + $0x1000] sm:$0xff]  ;;  %1822 = vmatpush.msra.mxu1 %v1301_v10 }
  0x9b   :  { %v1013_v12 = vld [vmem:[#allocation6 + $0x1400] sm:$0xff]  ;;  %1766 = vmatpush.msrb.mxu2 %v885_v11  ;;  %v462_v11 = vld [vmem:[#allocation6 + $0x2c8] sm:$0xff] }
  0x9c   :  { %v1165_v13 = vld [vmem:[#allocation6 + $0x18c0] sm:$0xff]  ;;  %1786 = vmatpush.msrb.mxu3 %v1013_v12  ;;  %v590_v12 = vld [vmem:[#allocation6 + $0x6c8] sm:$0xff] }
  0x9d   :  { %v1293_v14 = vld [vmem:[#allocation6 + $0x1cc0] sm:$0xff]  ;;  %1803 = vmatpush.msra.mxu0 %v1165_v13 }
  0x9e   :  { %1823 = vmatpush.msra.mxu1 %v1293_v14  ;;  %v1157_v15 = vld [vmem:[#allocation6 + $0x1880] sm:$0xff]  ;;  %v180_v24 = vpop.f32.mrf.mxu0  ;;  %v200_v25 = vpop.f32.mrf.mxu1 }
  0x9f   :  { %v1285_v16 = vld [vmem:[#allocation6 + $0x1c80] sm:$0xff]  ;;  %1804 = vmatpush.msra.mxu0 %v1157_v15  ;;  %v181_v26 = vadd.f32 %v180_v24, %v139_v22  ;;  %v201_v27 = vadd.f32 %v200_v25, %v140_v23  ;;  %v574_v23 = vld [vmem:[#allocation6 + $0x648] sm:$0xff] }
  0xa0   :  { %1824 = vmatpush.msra.mxu1 %v1285_v16  ;;  %v1149_v17 = vld [vmem:[#allocation6 + $0x1840] sm:$0xff] }
  0xa1   :  { %v1277_v18 = vld [vmem:[#allocation6 + $0x1c40] sm:$0xff]  ;;  %1805 = vmatpush.msra.mxu0 %v1149_v17  ;;  %v4194_v28 = vmax.f32 %v181_v26, 0.0  ;;  %v4196_v29 = vmax.f32 %v201_v27, 0.0  ;;  %v454_v17 = vld [vmem:[#allocation6 + $0x288] sm:$0xff]  ;;  %v136_v26 = vld [vmem:[#allocation4 + $0x8] sm:$0x3] }
  0xa2   :  { %1825 = vmatpush.msra.mxu1 %v1277_v18  ;;  %v1141_v19 = vld [vmem:[#allocation6 + $0x1800] sm:$0xff]  ;;  %v582_v18 = vld [vmem:[#allocation6 + $0x688] sm:$0xff] }
  0xa3   :  { %v1269_v20 = vld [vmem:[#allocation6 + $0x1c00] sm:$0xff]  ;;  %1806 = vmatpush.msra.mxu0 %v1141_v19  ;;  %1687 = vmatmul.f32.vlgmr.msra.gmra.mxu2 %v4194_v28  ;;  %v438_v27 = vld [vmem:[#allocation6 + $0x208] sm:$0xff] }
  0xa4   :  { %1826 = vmatpush.msra.mxu1 %v1269_v20  ;;  %v1517_v30 = vld [vmem:[#allocation6 + $0x23c0] sm:$0xff]  ;;  %1707 = vmatmul.f32.vlgmr.msra.gmra.mxu3 %v4196_v29 }
  0xa5   :  { %v1645_v31 = vld [vmem:[#allocation6 + $0x27c0] sm:$0xff]  ;;  %1831 = vmatpush.msra.mxu2 %v1517_v30  ;;  %v220_v38 = vpop.f32.mrf.mxu2  ;;  %v240_v39 = vpop.f32.mrf.mxu3  ;;  %v566_v30 = vld [vmem:[#allocation6 + $0x608] sm:$0xff] }
  0xa6   :  { %v1509_v34 = vld [vmem:[#allocation6 + $0x2380] sm:$0xff]  ;;  %1851 = vmatpush.msra.mxu3 %v1645_v31  ;;  %v221_v42 = vadd.f32 %v220_v38, %v141_v32  ;;  %v241_v43 = vadd.f32 %v240_v39, %v142_v33  ;;  %v260_v44 = vpop.f32.mrf.mxu0  ;;  %v280_v45 = vpop.f32.mrf.mxu1  ;;  %v430_v33 = vld [vmem:[#allocation6 + $0x1c8] sm:$0xff] }
  0xa7   :  { %v1637_v35 = vld [vmem:[#allocation6 + $0x2780] sm:$0xff]  ;;  %1832 = vmatpush.msra.mxu2 %v1509_v34  ;;  %v261_v46 = vadd.f32 %v260_v44, %v143_v36  ;;  %v281_v47 = vadd.f32 %v280_v45, %v144_v37  ;;  %v558_v34 = vld [vmem:[#allocation6 + $0x5c8] sm:$0xff] }
  0xa8   :  { %v1501_v40 = vld [vmem:[#allocation6 + $0x2340] sm:$0xff]  ;;  %1852 = vmatpush.msra.mxu3 %v1637_v35  ;;  %v4204_v48 = vmax.f32 %v221_v42, 0.0  ;;  %v4206_v49 = vmax.f32 %v241_v43, 0.0  ;;  %v147_v35 = vperm.slane %v136_v26, 0  ;;  %v422_v39 = vld [vmem:[#allocation6 + $0x188] sm:$0xff] }
  0xa9   :  { %v1629_v41 = vld [vmem:[#allocation6 + $0x2740] sm:$0xff]  ;;  %1833 = vmatpush.msra.mxu2 %v1501_v40  ;;  %v4208_v52 = vmax.f32 %v261_v46, 0.0  ;;  %v4212_v56 = vmax.f32 %v281_v47, 0.0  ;;  %v550_v40 = vld [vmem:[#allocation6 + $0x588] sm:$0xff] }
  0xaa   :  { %1853 = vmatpush.msra.mxu3 %v1629_v41  ;;  %v1493_v50 = vld [vmem:[#allocation6 + $0x2300] sm:$0xff]  ;;  %1727 = vmatmul.f32.vlgmr.msrb.gmra.mxu0 %v4204_v48  ;;  %v148_v41 = vperm.slane %v136_v26, 1  ;;  %v414_v46 = vld [vmem:[#allocation6 + $0x148] sm:$0xff] }
  0xab   :  { %v1621_v51 = vld [vmem:[#allocation6 + $0x2700] sm:$0xff]  ;;  %1747 = vmatmul.f32.vlgmr.msrb.gmra.mxu1 %v4206_v49  ;;  %1834 = vmatpush.msra.mxu2 %v1493_v50  ;;  %v542_v47 = vld [vmem:[#allocation6 + $0x548] sm:$0xff] }
  0xac   :  { %v1613_v55 = vld [vmem:[#allocation6 + $0x26c0] sm:$0xff]  ;;  %1854 = vmatpush.msra.mxu3 %v1621_v51  ;;  %1871 = vmatpush.msrb.mxu0 %v494_v53  ;;  %v830_v26 = vld [vmem:[#allocation6 + $0xe48] sm:$0xff] }
  0xad   :  { %v1485_v57 = vld [vmem:[#allocation6 + $0x22c0] sm:$0xff]  ;;  %1891 = vmatpush.msrb.mxu1 %v622_v54  ;;  %1767 = vmatmul.f32.vlgmr.msrb.gmra.mxu2 %v4208_v52  ;;  %v300_v63 = vpop.f32.mrf.mxu2  ;;  %v320_v8 = vpop.f32.mrf.mxu3  ;;  %v406_v54 = vld [vmem:[#allocation6 + $0x108] sm:$0xff] }
  0xae   :  { %1855 = vmatpush.msra.mxu3 %v1613_v55  ;;  %v1477_v61 = vld [vmem:[#allocation6 + $0x2280] sm:$0xff]  ;;  %1835 = vmatpush.msra.mxu2 %v1485_v57  ;;  %v301_v7 = vadd.f32 %v300_v63, %v145_v60  ;;  %v321_v13 = vadd.f32 %v320_v8, %v146_v4  ;;  %v340_v38 = vpop.f32.mrf.mxu0  ;;  %v360_v44 = vpop.f32.mrf.mxu1  ;;  %v534_v55 = vld [vmem:[#allocation6 + $0x508] sm:$0xff] }
  0xaf   :  { %v1605_v62 = vld [vmem:[#allocation6 + $0x2680] sm:$0xff]  ;;  %1872 = vmatpush.msrb.mxu0 %v486_v58  ;;  %1892 = vmatpush.msrb.mxu1 %v614_v59  ;;  %v341_v45 = vadd.f32 %v340_v38, %v147_v35  ;;  %v361_v53 = vadd.f32 %v360_v44, %v148_v41  ;;  %v398_v60 = vld [vmem:[#allocation6 + $0xc8] sm:$0xff] }
  0xb0   :  { %1787 = vmatmul.f32.vlgmr.msrb.gmra.mxu3 %v4212_v56  ;;  %v1469_v2 = vld [vmem:[#allocation6 + $0x2240] sm:$0xff]  ;;  %1836 = vmatpush.msra.mxu2 %v1477_v61  ;;  %v4218_v16 = vmax.f32 %v301_v7, 0.0  ;;  %v4220_v22 = vmax.f32 %v321_v13, 0.0  ;;  %v526_v61 = vld [vmem:[#allocation6 + $0x4c8] sm:$0xff] }
  0xb1   :  { %v1597_v3 = vld [vmem:[#allocation6 + $0x2640] sm:$0xff]  ;;  %1856 = vmatpush.msra.mxu3 %v1605_v62  ;;  %1873 = vmatpush.msrb.mxu0 %v478_v0  ;;  %v4224_v59 = vmax.f32 %v341_v45, 0.0  ;;  %v878_v62 = vld [vmem:[#allocation6 + $0xfc8] sm:$0xff]  ;;  %v4226_v63 = vmax.f32 %v361_v53, 0.0 }
  0xb2   :  { %1893 = vmatpush.msrb.mxu1 %v606_v1  ;;  %v1461_v9 = vld [vmem:[#allocation6 + $0x2200] sm:$0xff]  ;;  %1837 = vmatpush.msra.mxu2 %v1469_v2  ;;  %v750_v0 = vld [vmem:[#allocation6 + $0xbc8] sm:$0xff] }
  0xb3   :  { %v1589_v10 = vld [vmem:[#allocation6 + $0x2600] sm:$0xff]  ;;  %1857 = vmatpush.msra.mxu3 %v1597_v3  ;;  %1874 = vmatpush.msrb.mxu0 %v470_v5  ;;  %v390_v1 = vld [vmem:[#allocation6 + $0x88] sm:$0xff] }
  0xb4   :  { %1894 = vmatpush.msrb.mxu1 %v598_v6  ;;  %v1453_v14 = vld [vmem:[#allocation6 + $0x21c0] sm:$0xff]  ;;  %1838 = vmatpush.msra.mxu2 %v1461_v9  ;;  %v518_v2 = vld [vmem:[#allocation6 + $0x488] sm:$0xff] }
  0xb5   :  { %v1581_v15 = vld [vmem:[#allocation6 + $0x25c0] sm:$0xff]  ;;  %1858 = vmatpush.msra.mxu3 %v1589_v10  ;;  %1875 = vmatpush.msrb.mxu0 %v462_v11  ;;  %v742_v3 = vld [vmem:[#allocation6 + $0xb88] sm:$0xff] }
  0xb6   :  { %1895 = vmatpush.msrb.mxu1 %v590_v12  ;;  %v1445_v19 = vld [vmem:[#allocation6 + $0x2180] sm:$0xff]  ;;  %1839 = vmatpush.msra.mxu2 %v1453_v14  ;;  %v870_v4 = vld [vmem:[#allocation6 + $0xf88] sm:$0xff] }
  0xb7   :  { %1859 = vmatpush.msra.mxu3 %v1581_v15  ;;  %v1573_v20 = vld [vmem:[#allocation6 + $0x2580] sm:$0xff]  ;;  %1876 = vmatpush.msrb.mxu0 %v454_v17  ;;  %v382_v5 = vld [vmem:[#allocation6 + $0x48] sm:$0xff] }
  0xb8   :  { %1896 = vmatpush.msrb.mxu1 %v582_v18  ;;  %v1437_v24 = vld [vmem:[#allocation6 + $0x2140] sm:$0xff]  ;;  %1807 = vmatmul.f32.vlgmr.msra.gmra.mxu0 %v4218_v16  ;;  %v510_v6 = vld [vmem:[#allocation6 + $0x448] sm:$0xff] }
  0xb9   :  { %1840 = vmatpush.msra.mxu2 %v1445_v19  ;;  %v1565_v25 = vld [vmem:[#allocation6 + $0x2540] sm:$0xff]  ;;  %1860 = vmatpush.msra.mxu3 %v1573_v20  ;;  %v734_v7 = vld [vmem:[#allocation6 + $0xb48] sm:$0xff] }
  0xba   :  { %1877 = vmatpush.msrb.mxu0 %v446_v21  ;;  %1897 = vmatpush.msrb.mxu1 %v574_v23  ;;  %v1429_v31 = vld [vmem:[#allocation6 + $0x2100] sm:$0xff]  ;;  %v862_v8 = vld [vmem:[#allocation6 + $0xf48] sm:$0xff] }
  0xbb   :  { %1841 = vmatpush.msra.mxu2 %v1437_v24  ;;  %v1557_v32 = vld [vmem:[#allocation6 + $0x2500] sm:$0xff]  ;;  %1827 = vmatmul.f32.vlgmr.msra.gmra.mxu1 %v4220_v22  ;;  %v374_v9 = vld [vmem:[#allocation6 + $0x8] sm:$0xff] }
  0xbc   :  { %1861 = vmatpush.msra.mxu3 %v1565_v25  ;;  %1878 = vmatpush.msrb.mxu0 %v438_v27  ;;  %v1421_v36 = vld [vmem:[#allocation6 + $0x20c0] sm:$0xff]  ;;  %v502_v10 = vld [vmem:[#allocation6 + $0x408] sm:$0xff] }
  0xbd   :  { %1898 = vmatpush.msrb.mxu1 %v566_v30  ;;  %v1549_v37 = vld [vmem:[#allocation6 + $0x24c0] sm:$0xff]  ;;  %1842 = vmatpush.msra.mxu2 %v1429_v31  ;;  %v726_v11 = vld [vmem:[#allocation6 + $0xb08] sm:$0xff] }
  0xbe   :  { %1862 = vmatpush.msra.mxu3 %v1557_v32  ;;  %1879 = vmatpush.msrb.mxu0 %v430_v33  ;;  %v1413_v42 = vld [vmem:[#allocation6 + $0x2080] sm:$0xff]  ;;  %v854_v12 = vld [vmem:[#allocation6 + $0xf08] sm:$0xff] }
  0xbf   :  { %1899 = vmatpush.msrb.mxu1 %v558_v34  ;;  %v1541_v43 = vld [vmem:[#allocation6 + $0x2480] sm:$0xff]  ;;  %1843 = vmatpush.msra.mxu2 %v1421_v36  ;;  %v1006_v13 = vld [vmem:[#allocation6 + $0x13c8] sm:$0xff] }
  0xc0   :  { %1863 = vmatpush.msra.mxu3 %v1549_v37  ;;  %1880 = vmatpush.msrb.mxu0 %v422_v39  ;;  %v1405_v50 = vld [vmem:[#allocation6 + $0x2040] sm:$0xff]  ;;  %v1134_v14 = vld [vmem:[#allocation6 + $0x17c8] sm:$0xff] }
  0xc1   :  { %1900 = vmatpush.msrb.mxu1 %v550_v40  ;;  %v1533_v51 = vld [vmem:[#allocation6 + $0x2440] sm:$0xff]  ;;  %1844 = vmatpush.msra.mxu2 %v1413_v42  ;;  %v718_v15 = vld [vmem:[#allocation6 + $0xac8] sm:$0xff] }
  0xc2   :  { %1864 = vmatpush.msra.mxu3 %v1541_v43  ;;  %1881 = vmatpush.msrb.mxu0 %v414_v46  ;;  %v1397_v57 = vld [vmem:[#allocation6 + $0x2000] sm:$0xff]  ;;  %v846_v17 = vld [vmem:[#allocation6 + $0xec8] sm:$0xff] }
  0xc3   :  { %1901 = vmatpush.msrb.mxu1 %v542_v47  ;;  %v1525_v58 = vld [vmem:[#allocation6 + $0x2400] sm:$0xff]  ;;  %1845 = vmatpush.msra.mxu2 %v1405_v50  ;;  %v998_v18 = vld [vmem:[#allocation6 + $0x1388] sm:$0xff] }
  0xc4   :  { %1865 = vmatpush.msra.mxu3 %v1533_v51  ;;  %1882 = vmatpush.msrb.mxu0 %v406_v54  ;;  %v1126_v19 = vld [vmem:[#allocation6 + $0x1788] sm:$0xff] }
  0xc5   :  { %1902 = vmatpush.msrb.mxu1 %v534_v55  ;;  %1846 = vmatpush.msra.mxu2 %v1397_v57  ;;  %v710_v20 = vld [vmem:[#allocation6 + $0xa88] sm:$0xff] }
  0xc6   :  { %1866 = vmatpush.msra.mxu3 %v1525_v58  ;;  %1883 = vmatpush.msrb.mxu0 %v398_v60  ;;  %v838_v21 = vld [vmem:[#allocation6 + $0xe88] sm:$0xff] }
  0xc7   :  { %1903 = vmatpush.msrb.mxu1 %v526_v61  ;;  %1847 = vmatmul.f32.vlgmr.msra.gmra.mxu2 %v4224_v59  ;;  %v990_v23 = vld [vmem:[#allocation6 + $0x1348] sm:$0xff] }
  0xc8   :  { %1931 = vmatpush.msrb.mxu3 %v878_v62  ;;  %1911 = vmatpush.msrb.mxu2 %v750_v0  ;;  %v1118_v24 = vld [vmem:[#allocation6 + $0x1748] sm:$0xff] }
  0xc9   :  { %1884 = vmatpush.msrb.mxu0 %v390_v1  ;;  %1904 = vmatpush.msrb.mxu1 %v518_v2  ;;  %v702_v25 = vld [vmem:[#allocation6 + $0xa48] sm:$0xff] }
  0xca   :  { %1867 = vmatmul.f32.vlgmr.msra.gmra.mxu3 %v4226_v63  ;;  %1912 = vmatpush.msrb.mxu2 %v742_v3  ;;  %v982_v27 = vld [vmem:[#allocation6 + $0x1308] sm:$0xff] }
  0xcb   :  { %1932 = vmatpush.msrb.mxu3 %v870_v4  ;;  %1885 = vmatpush.msrb.mxu0 %v382_v5  ;;  %v1110_v30 = vld [vmem:[#allocation6 + $0x1708] sm:$0xff] }
  0xcc   :  { %1905 = vmatpush.msrb.mxu1 %v510_v6  ;;  %1913 = vmatpush.msrb.mxu2 %v734_v7  ;;  %v694_v31 = vld [vmem:[#allocation6 + $0xa08] sm:$0xff] }
  0xcd   :  { %1933 = vmatpush.msrb.mxu3 %v862_v8  ;;  %1886 = vmatpush.msrb.mxu0 %v374_v9  ;;  %v822_v32 = vld [vmem:[#allocation6 + $0xe08] sm:$0xff] }
  0xce   :  { %1906 = vmatpush.msrb.mxu1 %v502_v10  ;;  %1887 = vmatmul.f32.vlgmr.msrb.gmra.mxu0 %v4194_v28  ;;  %v974_v33 = vld [vmem:[#allocation6 + $0x12c8] sm:$0xff] }
  0xcf   :  { %1907 = vmatmul.f32.vlgmr.msrb.gmra.mxu1 %v4196_v29  ;;  %1914 = vmatpush.msrb.mxu2 %v726_v11  ;;  %v1102_v34 = vld [vmem:[#allocation6 + $0x16c8] sm:$0xff] }
  0xd0   :  { %1934 = vmatpush.msrb.mxu3 %v854_v12  ;;  %1951 = vmatpush.msra.mxu0 %v1006_v13  ;;  %v686_v35 = vld [vmem:[#allocation6 + $0x9c8] sm:$0xff] }
  0xd1   :  { %1971 = vmatpush.msra.mxu1 %v1134_v14  ;;  %1915 = vmatpush.msrb.mxu2 %v718_v15  ;;  %v814_v36 = vld [vmem:[#allocation6 + $0xdc8] sm:$0xff] }
  0xd2   :  { %1935 = vmatpush.msrb.mxu3 %v846_v17  ;;  %1952 = vmatpush.msra.mxu0 %v998_v18  ;;  %v966_v37 = vld [vmem:[#allocation6 + $0x1288] sm:$0xff] }
  0xd3   :  { %1972 = vmatpush.msra.mxu1 %v1126_v19  ;;  %1916 = vmatpush.msrb.mxu2 %v710_v20  ;;  %v1094_v38 = vld [vmem:[#allocation6 + $0x1688] sm:$0xff] }
  0xd4   :  { %1936 = vmatpush.msrb.mxu3 %v838_v21  ;;  %1953 = vmatpush.msra.mxu0 %v990_v23  ;;  %v678_v39 = vld [vmem:[#allocation6 + $0x988] sm:$0xff] }
  0xd5   :  { %1973 = vmatpush.msra.mxu1 %v1118_v24  ;;  %1917 = vmatpush.msrb.mxu2 %v702_v25  ;;  %v806_v40 = vld [vmem:[#allocation6 + $0xd88] sm:$0xff] }
  0xd6   :  { %1937 = vmatpush.msrb.mxu3 %v830_v26  ;;  %1954 = vmatpush.msra.mxu0 %v982_v27  ;;  %v958_v41 = vld [vmem:[#allocation6 + $0x1248] sm:$0xff] }
  0xd7   :  { %1974 = vmatpush.msra.mxu1 %v1110_v30  ;;  %1918 = vmatpush.msrb.mxu2 %v694_v31  ;;  %v1086_v42 = vld [vmem:[#allocation6 + $0x1648] sm:$0xff] }
  0xd8   :  { %1938 = vmatpush.msrb.mxu3 %v822_v32  ;;  %1955 = vmatpush.msra.mxu0 %v974_v33  ;;  %v670_v43 = vld [vmem:[#allocation6 + $0x948] sm:$0xff] }
  0xd9   :  { %1975 = vmatpush.msra.mxu1 %v1102_v34  ;;  %1919 = vmatpush.msrb.mxu2 %v686_v35  ;;  %v798_v44 = vld [vmem:[#allocation6 + $0xd48] sm:$0xff] }
  0xda   :  { %1939 = vmatpush.msrb.mxu3 %v814_v36  ;;  %1956 = vmatpush.msra.mxu0 %v966_v37  ;;  %v950_v45 = vld [vmem:[#allocation6 + $0x1208] sm:$0xff] }
  0xdb   :  { %1976 = vmatpush.msra.mxu1 %v1094_v38  ;;  %1920 = vmatpush.msrb.mxu2 %v678_v39  ;;  %v1078_v46 = vld [vmem:[#allocation6 + $0x1608] sm:$0xff] }
  0xdc   :  { %1940 = vmatpush.msrb.mxu3 %v806_v40  ;;  %1957 = vmatpush.msra.mxu0 %v958_v41  ;;  %v662_v47 = vld [vmem:[#allocation6 + $0x908] sm:$0xff] }
  0xdd   :  { %1977 = vmatpush.msra.mxu1 %v1086_v42  ;;  %v790_v50 = vld [vmem:[#allocation6 + $0xd08] sm:$0xff]  ;;  %1921 = vmatpush.msrb.mxu2 %v670_v43 }
  0xde   :  { %1941 = vmatpush.msrb.mxu3 %v798_v44  ;;  %v942_v51 = vld [vmem:[#allocation6 + $0x11c8] sm:$0xff]  ;;  %1958 = vmatpush.msra.mxu0 %v950_v45 }
  0xdf   :  { %v1070_v53 = vld [vmem:[#allocation6 + $0x15c8] sm:$0xff]  ;;  %1978 = vmatpush.msra.mxu1 %v1078_v46  ;;  %1922 = vmatpush.msrb.mxu2 %v662_v47 }
  0xe0   :  { %v654_v54 = vld [vmem:[#allocation6 + $0x8c8] sm:$0xff]  ;;  %1942 = vmatpush.msrb.mxu3 %v790_v50  ;;  %1959 = vmatpush.msra.mxu0 %v942_v51 }
  0xe1   :  { %v782_v55 = vld [vmem:[#allocation6 + $0xcc8] sm:$0xff]  ;;  %1979 = vmatpush.msra.mxu1 %v1070_v53  ;;  %1923 = vmatpush.msrb.mxu2 %v654_v54 }
  0xe2   :  { %v934_v57 = vld [vmem:[#allocation6 + $0x1188] sm:$0xff]  ;;  %1943 = vmatpush.msrb.mxu3 %v782_v55 }
  0xe3   :  { %v1062_v58 = vld [vmem:[#allocation6 + $0x1588] sm:$0xff]  ;;  %1960 = vmatpush.msra.mxu0 %v934_v57 }
  0xe4   :  { %v646_v60 = vld [vmem:[#allocation6 + $0x888] sm:$0xff]  ;;  %1980 = vmatpush.msra.mxu1 %v1062_v58 }
  0xe5   :  { %v774_v61 = vld [vmem:[#allocation6 + $0xc88] sm:$0xff]  ;;  %1924 = vmatpush.msrb.mxu2 %v646_v60 }
  0xe6   :  { %v926_v62 = vld [vmem:[#allocation6 + $0x1148] sm:$0xff]  ;;  %1944 = vmatpush.msrb.mxu3 %v774_v61 }
  0xe7   :  { %v1054_v0 = vld [vmem:[#allocation6 + $0x1548] sm:$0xff]  ;;  %1961 = vmatpush.msra.mxu0 %v926_v62 }
  0xe8   :  { %v638_v1 = vld [vmem:[#allocation6 + $0x848] sm:$0xff]  ;;  %1981 = vmatpush.msra.mxu1 %v1054_v0 }
  0xe9   :  { %v766_v2 = vld [vmem:[#allocation6 + $0xc48] sm:$0xff]  ;;  %1925 = vmatpush.msrb.mxu2 %v638_v1 }
  0xea   :  { %v918_v3 = vld [vmem:[#allocation6 + $0x1108] sm:$0xff]  ;;  %1945 = vmatpush.msrb.mxu3 %v766_v2 }
  0xeb   :  { %v1046_v4 = vld [vmem:[#allocation6 + $0x1508] sm:$0xff]  ;;  %1962 = vmatpush.msra.mxu0 %v918_v3 }
  0xec   :  { %v630_v5 = vld [vmem:[#allocation6 + $0x808] sm:$0xff]  ;;  %1982 = vmatpush.msra.mxu1 %v1046_v4 }
  0xed   :  { %v758_v6 = vld [vmem:[#allocation6 + $0xc08] sm:$0xff]  ;;  %1926 = vmatpush.msrb.mxu2 %v630_v5 }
  0xee   :  { %v910_v7 = vld [vmem:[#allocation6 + $0x10c8] sm:$0xff]  ;;  %1946 = vmatpush.msrb.mxu3 %v758_v6  ;;  %1927 = vmatmul.f32.vlgmr.msrb.gmra.mxu2 %v4204_v48 }
  0xef   :  { %v1038_v8 = vld [vmem:[#allocation6 + $0x14c8] sm:$0xff]  ;;  %1963 = vmatpush.msra.mxu0 %v910_v7  ;;  %1947 = vmatmul.f32.vlgmr.msrb.gmra.mxu3 %v4206_v49 }
  0xf0   :  { %v1262_v9 = vld [vmem:[#allocation6 + $0x1bc8] sm:$0xff]  ;;  %1983 = vmatpush.msra.mxu1 %v1038_v8 }
  0xf1   :  { %v1390_v10 = vld [vmem:[#allocation6 + $0x1fc8] sm:$0xff]  ;;  %1991 = vmatpush.msra.mxu2 %v1262_v9 }
  0xf2   :  { %v902_v11 = vld [vmem:[#allocation6 + $0x1088] sm:$0xff]  ;;  %2011 = vmatpush.msra.mxu3 %v1390_v10 }
  0xf3   :  { %v1030_v12 = vld [vmem:[#allocation6 + $0x1488] sm:$0xff]  ;;  %1964 = vmatpush.msra.mxu0 %v902_v11 }
  0xf4   :  { %v1254_v13 = vld [vmem:[#allocation6 + $0x1b88] sm:$0xff]  ;;  %1984 = vmatpush.msra.mxu1 %v1030_v12 }
  0xf5   :  { %v1382_v14 = vld [vmem:[#allocation6 + $0x1f88] sm:$0xff]  ;;  %1992 = vmatpush.msra.mxu2 %v1254_v13 }
  0xf6   :  { %v894_v15 = vld [vmem:[#allocation6 + $0x1048] sm:$0xff]  ;;  %2012 = vmatpush.msra.mxu3 %v1382_v14 }
  0xf7   :  { %v1022_v17 = vld [vmem:[#allocation6 + $0x1448] sm:$0xff]  ;;  %1965 = vmatpush.msra.mxu0 %v894_v15 }
  0xf8   :  { %v1246_v18 = vld [vmem:[#allocation6 + $0x1b48] sm:$0xff]  ;;  %1985 = vmatpush.msra.mxu1 %v1022_v17 }
  0xf9   :  { %v1374_v19 = vld [vmem:[#allocation6 + $0x1f48] sm:$0xff]  ;;  %1993 = vmatpush.msra.mxu2 %v1246_v18 }
  0xfa   :  { %v886_v20 = vld [vmem:[#allocation6 + $0x1008] sm:$0xff]  ;;  %2013 = vmatpush.msra.mxu3 %v1374_v19 }
  0xfb   :  { %v1014_v21 = vld [vmem:[#allocation6 + $0x1408] sm:$0xff]  ;;  %1966 = vmatpush.msra.mxu0 %v886_v20  ;;  %v495_v20 = vld [vmem:[#allocation6 + $0x3d0] sm:$0xff] }
  0xfc   :  { %v1238_v23 = vld [vmem:[#allocation6 + $0x1b08] sm:$0xff]  ;;  %1986 = vmatpush.msra.mxu1 %v1014_v21  ;;  %1967 = vmatmul.f32.vlgmr.msra.gmra.mxu0 %v4208_v52  ;;  %v623_v21 = vld [vmem:[#allocation6 + $0x7d0] sm:$0xff] }
  0xfd   :  { %v1366_v24 = vld [vmem:[#allocation6 + $0x1f08] sm:$0xff]  ;;  %1987 = vmatmul.f32.vlgmr.msra.gmra.mxu1 %v4212_v56  ;;  %1994 = vmatpush.msra.mxu2 %v1238_v23 }
  0xfe   :  { %v1518_v25 = vld [vmem:[#allocation6 + $0x23c8] sm:$0xff]  ;;  %2014 = vmatpush.msra.mxu3 %v1366_v24 }
  0xff   :  { %v1646_v26 = vld [vmem:[#allocation6 + $0x27c8] sm:$0xff]  ;;  %2031 = vmatpush.msrb.mxu0 %v1518_v25  ;;  %v487_v25 = vld [vmem:[#allocation6 + $0x390] sm:$0xff] }
 0x100   :  { %v1230_v27 = vld [vmem:[#allocation6 + $0x1ac8] sm:$0xff]  ;;  %2051 = vmatpush.msrb.mxu1 %v1646_v26  ;;  %v615_v26 = vld [vmem:[#allocation6 + $0x790] sm:$0xff] }
 0x101   :  { %v1358_v30 = vld [vmem:[#allocation6 + $0x1ec8] sm:$0xff]  ;;  %1995 = vmatpush.msra.mxu2 %v1230_v27 }
 0x102   :  { %v1510_v31 = vld [vmem:[#allocation6 + $0x2388] sm:$0xff]  ;;  %2015 = vmatpush.msra.mxu3 %v1358_v30 }
 0x103   :  { %v1638_v32 = vld [vmem:[#allocation6 + $0x2788] sm:$0xff]  ;;  %2032 = vmatpush.msrb.mxu0 %v1510_v31  ;;  %v479_v31 = vld [vmem:[#allocation6 + $0x350] sm:$0xff] }
 0x104   :  { %v1222_v33 = vld [vmem:[#allocation6 + $0x1a88] sm:$0xff]  ;;  %2052 = vmatpush.msrb.mxu1 %v1638_v32  ;;  %v607_v32 = vld [vmem:[#allocation6 + $0x750] sm:$0xff] }
 0x105   :  { %v1350_v34 = vld [vmem:[#allocation6 + $0x1e88] sm:$0xff]  ;;  %1996 = vmatpush.msra.mxu2 %v1222_v33 }
 0x106   :  { %v1502_v35 = vld [vmem:[#allocation6 + $0x2348] sm:$0xff]  ;;  %2016 = vmatpush.msra.mxu3 %v1350_v34 }
 0x107   :  { %v1630_v36 = vld [vmem:[#allocation6 + $0x2748] sm:$0xff]  ;;  %2033 = vmatpush.msrb.mxu0 %v1502_v35  ;;  %v471_v35 = vld [vmem:[#allocation6 + $0x310] sm:$0xff] }
 0x108   :  { %v1214_v37 = vld [vmem:[#allocation6 + $0x1a48] sm:$0xff]  ;;  %2053 = vmatpush.msrb.mxu1 %v1630_v36  ;;  %v599_v36 = vld [vmem:[#allocation6 + $0x710] sm:$0xff] }
 0x109   :  { %v1342_v38 = vld [vmem:[#allocation6 + $0x1e48] sm:$0xff]  ;;  %1997 = vmatpush.msra.mxu2 %v1214_v37  ;;  %v751_v37 = vld [vmem:[#allocation6 + $0xbd0] sm:$0xff] }
 0x10a   :  { %v1494_v39 = vld [vmem:[#allocation6 + $0x2308] sm:$0xff]  ;;  %2017 = vmatpush.msra.mxu3 %v1342_v38  ;;  %v879_v38 = vld [vmem:[#allocation6 + $0xfd0] sm:$0xff] }
 0x10b   :  { %v1622_v40 = vld [vmem:[#allocation6 + $0x2708] sm:$0xff]  ;;  %2034 = vmatpush.msrb.mxu0 %v1494_v39  ;;  %v463_v39 = vld [vmem:[#allocation6 + $0x2d0] sm:$0xff] }
 0x10c   :  { %v1206_v41 = vld [vmem:[#allocation6 + $0x1a08] sm:$0xff]  ;;  %2054 = vmatpush.msrb.mxu1 %v1622_v40  ;;  %v591_v40 = vld [vmem:[#allocation6 + $0x6d0] sm:$0xff] }
 0x10d   :  { %v1334_v42 = vld [vmem:[#allocation6 + $0x1e08] sm:$0xff]  ;;  %1998 = vmatpush.msra.mxu2 %v1206_v41  ;;  %v743_v41 = vld [vmem:[#allocation6 + $0xb90] sm:$0xff] }
 0x10e   :  { %v1486_v43 = vld [vmem:[#allocation6 + $0x22c8] sm:$0xff]  ;;  %2018 = vmatpush.msra.mxu3 %v1334_v42  ;;  %v871_v42 = vld [vmem:[#allocation6 + $0xf90] sm:$0xff] }
 0x10f   :  { %v1614_v44 = vld [vmem:[#allocation6 + $0x26c8] sm:$0xff]  ;;  %2035 = vmatpush.msrb.mxu0 %v1486_v43  ;;  %v455_v43 = vld [vmem:[#allocation6 + $0x290] sm:$0xff] }
 0x110   :  { %v1198_v45 = vld [vmem:[#allocation6 + $0x19c8] sm:$0xff]  ;;  %2055 = vmatpush.msrb.mxu1 %v1614_v44  ;;  %v583_v44 = vld [vmem:[#allocation6 + $0x690] sm:$0xff] }
 0x111   :  { %v1326_v46 = vld [vmem:[#allocation6 + $0x1dc8] sm:$0xff]  ;;  %1999 = vmatpush.msra.mxu2 %v1198_v45  ;;  %v735_v45 = vld [vmem:[#allocation6 + $0xb50] sm:$0xff] }
 0x112   :  { %v1478_v47 = vld [vmem:[#allocation6 + $0x2288] sm:$0xff]  ;;  %2019 = vmatpush.msra.mxu3 %v1326_v46  ;;  %v863_v46 = vld [vmem:[#allocation6 + $0xf50] sm:$0xff] }
 0x113   :  { %v1606_v50 = vld [vmem:[#allocation6 + $0x2688] sm:$0xff]  ;;  %2036 = vmatpush.msrb.mxu0 %v1478_v47  ;;  %v447_v47 = vld [vmem:[#allocation6 + $0x250] sm:$0xff] }
 0x114   :  { %v1190_v51 = vld [vmem:[#allocation6 + $0x1988] sm:$0xff]  ;;  %2056 = vmatpush.msrb.mxu1 %v1606_v50  ;;  %v575_v50 = vld [vmem:[#allocation6 + $0x650] sm:$0xff] }
 0x115   :  { %v1318_v53 = vld [vmem:[#allocation6 + $0x1d88] sm:$0xff]  ;;  %2000 = vmatpush.msra.mxu2 %v1190_v51  ;;  %v727_v51 = vld [vmem:[#allocation6 + $0xb10] sm:$0xff] }
 0x116   :  { %v1470_v54 = vld [vmem:[#allocation6 + $0x2248] sm:$0xff]  ;;  %2020 = vmatpush.msra.mxu3 %v1318_v53  ;;  %v855_v53 = vld [vmem:[#allocation6 + $0xf10] sm:$0xff] }
 0x117   :  { %v1598_v55 = vld [vmem:[#allocation6 + $0x2648] sm:$0xff]  ;;  %2037 = vmatpush.msrb.mxu0 %v1470_v54  ;;  %v439_v54 = vld [vmem:[#allocation6 + $0x210] sm:$0xff] }
 0x118   :  { %v1182_v57 = vld [vmem:[#allocation6 + $0x1948] sm:$0xff]  ;;  %2057 = vmatpush.msrb.mxu1 %v1598_v55  ;;  %v567_v55 = vld [vmem:[#allocation6 + $0x610] sm:$0xff] }
 0x119   :  { %v1310_v58 = vld [vmem:[#allocation6 + $0x1d48] sm:$0xff]  ;;  %2001 = vmatpush.msra.mxu2 %v1182_v57  ;;  %v719_v57 = vld [vmem:[#allocation6 + $0xad0] sm:$0xff] }
 0x11a   :  { %v1462_v60 = vld [vmem:[#allocation6 + $0x2208] sm:$0xff]  ;;  %2021 = vmatpush.msra.mxu3 %v1310_v58  ;;  %v847_v58 = vld [vmem:[#allocation6 + $0xed0] sm:$0xff] }
 0x11b   :  { %v1590_v61 = vld [vmem:[#allocation6 + $0x2608] sm:$0xff]  ;;  %2038 = vmatpush.msrb.mxu0 %v1462_v60  ;;  %v431_v60 = vld [vmem:[#allocation6 + $0x1d0] sm:$0xff] }
 0x11c   :  { %v1174_v62 = vld [vmem:[#allocation6 + $0x1908] sm:$0xff]  ;;  %2058 = vmatpush.msrb.mxu1 %v1590_v61  ;;  %v559_v61 = vld [vmem:[#allocation6 + $0x5d0] sm:$0xff] }
 0x11d   :  { %v1302_v0 = vld [vmem:[#allocation6 + $0x1d08] sm:$0xff]  ;;  %2002 = vmatpush.msra.mxu2 %v1174_v62  ;;  %v711_v62 = vld [vmem:[#allocation6 + $0xa90] sm:$0xff] }
 0x11e   :  { %v1454_v1 = vld [vmem:[#allocation6 + $0x21c8] sm:$0xff]  ;;  %2022 = vmatpush.msra.mxu3 %v1302_v0  ;;  %v839_v0 = vld [vmem:[#allocation6 + $0xe90] sm:$0xff] }
 0x11f   :  { %v1582_v2 = vld [vmem:[#allocation6 + $0x25c8] sm:$0xff]  ;;  %2039 = vmatpush.msrb.mxu0 %v1454_v1  ;;  %v423_v1 = vld [vmem:[#allocation6 + $0x190] sm:$0xff] }
 0x120   :  { %v1166_v3 = vld [vmem:[#allocation6 + $0x18c8] sm:$0xff]  ;;  %2059 = vmatpush.msrb.mxu1 %v1582_v2  ;;  %v551_v2 = vld [vmem:[#allocation6 + $0x590] sm:$0xff] }
 0x121   :  { %v1294_v4 = vld [vmem:[#allocation6 + $0x1cc8] sm:$0xff]  ;;  %2003 = vmatpush.msra.mxu2 %v1166_v3  ;;  %v703_v3 = vld [vmem:[#allocation6 + $0xa50] sm:$0xff] }
 0x122   :  { %v1446_v5 = vld [vmem:[#allocation6 + $0x2188] sm:$0xff]  ;;  %2023 = vmatpush.msra.mxu3 %v1294_v4  ;;  %v831_v4 = vld [vmem:[#allocation6 + $0xe50] sm:$0xff] }
 0x123   :  { %v1574_v6 = vld [vmem:[#allocation6 + $0x2588] sm:$0xff]  ;;  %2040 = vmatpush.msrb.mxu0 %v1446_v5  ;;  %v415_v5 = vld [vmem:[#allocation6 + $0x150] sm:$0xff] }
 0x124   :  { %v1158_v7 = vld [vmem:[#allocation6 + $0x1888] sm:$0xff]  ;;  %2060 = vmatpush.msrb.mxu1 %v1574_v6  ;;  %v543_v6 = vld [vmem:[#allocation6 + $0x550] sm:$0xff] }
 0x125   :  { %v1286_v8 = vld [vmem:[#allocation6 + $0x1c88] sm:$0xff]  ;;  %2004 = vmatpush.msra.mxu2 %v1158_v7  ;;  %v695_v7 = vld [vmem:[#allocation6 + $0xa10] sm:$0xff] }
 0x126   :  { %v1438_v9 = vld [vmem:[#allocation6 + $0x2148] sm:$0xff]  ;;  %2024 = vmatpush.msra.mxu3 %v1286_v8  ;;  %v823_v8 = vld [vmem:[#allocation6 + $0xe10] sm:$0xff] }
 0x127   :  { %v1566_v10 = vld [vmem:[#allocation6 + $0x2548] sm:$0xff]  ;;  %2041 = vmatpush.msrb.mxu0 %v1438_v9  ;;  %v407_v9 = vld [vmem:[#allocation6 + $0x110] sm:$0xff] }
 0x128   :  { %v1150_v11 = vld [vmem:[#allocation6 + $0x1848] sm:$0xff]  ;;  %2061 = vmatpush.msrb.mxu1 %v1566_v10  ;;  %v535_v10 = vld [vmem:[#allocation6 + $0x510] sm:$0xff] }
 0x129   :  { %v1278_v12 = vld [vmem:[#allocation6 + $0x1c48] sm:$0xff]  ;;  %2005 = vmatpush.msra.mxu2 %v1150_v11  ;;  %v1653_v11 = vld [vmem:[#allocation7] sm:$0xff] }
 0x12a   :  { %v1430_v13 = vld [vmem:[#allocation6 + $0x2108] sm:$0xff]  ;;  %2025 = vmatpush.msra.mxu3 %v1278_v12  ;;  %v687_v12 = vld [vmem:[#allocation6 + $0x9d0] sm:$0xff] }
 0x12b   :  { %v1558_v14 = vld [vmem:[#allocation6 + $0x2508] sm:$0xff]  ;;  %2042 = vmatpush.msrb.mxu0 %v1430_v13  ;;  %v815_v13 = vld [vmem:[#allocation6 + $0xdd0] sm:$0xff] }
 0x12c   :  { %v1142_v15 = vld [vmem:[#allocation6 + $0x1808] sm:$0xff]  ;;  %2062 = vmatpush.msrb.mxu1 %v1558_v14  ;;  %v399_v14 = vld [vmem:[#allocation6 + $0xd0] sm:$0xff] }
 0x12d   :  { %v1270_v17 = vld [vmem:[#allocation6 + $0x1c08] sm:$0xff]  ;;  %2006 = vmatpush.msra.mxu2 %v1142_v15  ;;  %v527_v15 = vld [vmem:[#allocation6 + $0x4d0] sm:$0xff] }
 0x12e   :  { %v1422_v18 = vld [vmem:[#allocation6 + $0x20c8] sm:$0xff]  ;;  %2026 = vmatpush.msra.mxu3 %v1270_v17  ;;  %2007 = vmatmul.f32.vlgmr.msra.gmra.mxu2 %v4218_v16  ;;  %v679_v17 = vld [vmem:[#allocation6 + $0x990] sm:$0xff] }
 0x12f   :  { %v1550_v19 = vld [vmem:[#allocation6 + $0x24c8] sm:$0xff]  ;;  %2043 = vmatpush.msrb.mxu0 %v1422_v18  ;;  %2027 = vmatmul.f32.vlgmr.msra.gmra.mxu3 %v4220_v22  ;;  %v807_v18 = vld [vmem:[#allocation6 + $0xd90] sm:$0xff] }
 0x130   :  { %2063 = vmatpush.msrb.mxu1 %v1550_v19  ;;  %v1414_v23 = vld [vmem:[#allocation6 + $0x2088] sm:$0xff]  ;;  %2071 = vmatpush.msrb.mxu2 %v495_v20  ;;  %v1655_v19 = vperm.slane %v1653_v11, 0  ;;  %v391_v20 = vld [vmem:[#allocation6 + $0x90] sm:$0xff] }
 0x131   :  { %v1542_v24 = vld [vmem:[#allocation6 + $0x2488] sm:$0xff]  ;;  %2091 = vmatpush.msrb.mxu3 %v623_v21  ;;  %2044 = vmatpush.msrb.mxu0 %v1414_v23  ;;  %v519_v21 = vld [vmem:[#allocation6 + $0x490] sm:$0xff] }
 0x132   :  { %v1406_v27 = vld [vmem:[#allocation6 + $0x2048] sm:$0xff]  ;;  %2064 = vmatpush.msrb.mxu1 %v1542_v24  ;;  %2072 = vmatpush.msrb.mxu2 %v487_v25  ;;  %v671_v23 = vld [vmem:[#allocation6 + $0x950] sm:$0xff] }
 0x133   :  { %v1534_v30 = vld [vmem:[#allocation6 + $0x2448] sm:$0xff]  ;;  %2092 = vmatpush.msrb.mxu3 %v615_v26  ;;  %2045 = vmatpush.msrb.mxu0 %v1406_v27  ;;  %v799_v24 = vld [vmem:[#allocation6 + $0xd50] sm:$0xff]  ;;  %v1688_v27 = vpop.f32.mrf.mxu2 }
 0x134   :  { %v1398_v33 = vld [vmem:[#allocation6 + $0x2008] sm:$0xff]  ;;  %2065 = vmatpush.msrb.mxu1 %v1534_v30  ;;  %2073 = vmatpush.msrb.mxu2 %v479_v31  ;;  %v383_v25 = vld [vmem:[#allocation6 + $0x50] sm:$0xff]  ;;  %v1708_v30 = vpop.f32.mrf.mxu3 }
 0x135   :  { %v1526_v34 = vld [vmem:[#allocation6 + $0x2408] sm:$0xff]  ;;  %2093 = vmatpush.msrb.mxu3 %v607_v32  ;;  %2046 = vmatpush.msrb.mxu0 %v1398_v33  ;;  %v511_v26 = vld [vmem:[#allocation6 + $0x450] sm:$0xff]  ;;  %v1689_v33 = vadd.f32 %v1688_v27, %v1655_v19 }
 0x136   :  { %2066 = vmatpush.msrb.mxu1 %v1526_v34  ;;  %2047 = vmatmul.f32.vlgmr.msrb.gmra.mxu0 %v4224_v59  ;;  %v663_v31 = vld [vmem:[#allocation6 + $0x910] sm:$0xff] }
 0x137   :  { %2067 = vmatmul.f32.vlgmr.msrb.gmra.mxu1 %v4226_v63  ;;  %2074 = vmatpush.msrb.mxu2 %v471_v35  ;;  %v791_v32 = vld [vmem:[#allocation6 + $0xd10] sm:$0xff] }
 0x138   :  { %2094 = vmatpush.msrb.mxu3 %v599_v36  ;;  %2111 = vmatpush.msra.mxu0 %v751_v37  ;;  %v375_v34 = vld [vmem:[#allocation6 + $0x10] sm:$0xff]  ;;  %v1728_v36 = vpop.f32.mrf.mxu0 }
 0x139   :  { %2131 = vmatpush.msra.mxu1 %v879_v38  ;;  %2075 = vmatpush.msrb.mxu2 %v463_v39  ;;  %v503_v35 = vld [vmem:[#allocation6 + $0x410] sm:$0xff]  ;;  %v1709_v39 = vadd.f32 %v1708_v30, %v1689_v33 }
 0x13a   :  { %2095 = vmatpush.msrb.mxu3 %v591_v40  ;;  %2112 = vmatpush.msra.mxu0 %v743_v41  ;;  %v655_v37 = vld [vmem:[#allocation6 + $0x8d0] sm:$0xff]  ;;  %v1748_v40 = vpop.f32.mrf.mxu1 }
 0x13b   :  { %2132 = vmatpush.msra.mxu1 %v871_v42  ;;  %2076 = vmatpush.msrb.mxu2 %v455_v43  ;;  %v783_v38 = vld [vmem:[#allocation6 + $0xcd0] sm:$0xff]  ;;  %v1729_v43 = vadd.f32 %v1728_v36, %v1709_v39 }
 0x13c   :  { %2096 = vmatpush.msrb.mxu3 %v583_v44  ;;  %2113 = vmatpush.msra.mxu0 %v735_v45  ;;  %v1007_v41 = vld [vmem:[#allocation6 + $0x13d0] sm:$0xff] }
 0x13d   :  { %2133 = vmatpush.msra.mxu1 %v863_v46  ;;  %2077 = vmatpush.msrb.mxu2 %v447_v47  ;;  %v1135_v42 = vld [vmem:[#allocation6 + $0x17d0] sm:$0xff] }
 0x13e   :  { %2097 = vmatpush.msrb.mxu3 %v575_v50  ;;  %2114 = vmatpush.msra.mxu0 %v727_v51  ;;  %v647_v44 = vld [vmem:[#allocation6 + $0x890] sm:$0xff]  ;;  %v1749_v50 = vadd.f32 %v1748_v40, %v1729_v43 }
 0x13f   :  { %2134 = vmatpush.msra.mxu1 %v855_v53  ;;  %2078 = vmatpush.msrb.mxu2 %v439_v54  ;;  %v775_v45 = vld [vmem:[#allocation6 + $0xc90] sm:$0xff] }
 0x140   :  { %2098 = vmatpush.msrb.mxu3 %v567_v55  ;;  %2115 = vmatpush.msra.mxu0 %v719_v57  ;;  %v999_v46 = vld [vmem:[#allocation6 + $0x1390] sm:$0xff] }
 0x141   :  { %2135 = vmatpush.msra.mxu1 %v847_v58  ;;  %2079 = vmatpush.msrb.mxu2 %v431_v60  ;;  %v1127_v47 = vld [vmem:[#allocation6 + $0x1790] sm:$0xff]  ;;  %v1768_v60 = vpop.f32.mrf.mxu2 }
 0x142   :  { %2099 = vmatpush.msrb.mxu3 %v559_v61  ;;  %2116 = vmatpush.msra.mxu0 %v711_v62  ;;  %v639_v51 = vld [vmem:[#allocation6 + $0x850] sm:$0xff]  ;;  %v1769_v61 = vadd.f32 %v1768_v60, %v1749_v50 }
 0x143   :  { %2136 = vmatpush.msra.mxu1 %v839_v0  ;;  %2080 = vmatpush.msrb.mxu2 %v423_v1  ;;  %v767_v53 = vld [vmem:[#allocation6 + $0xc50] sm:$0xff]  ;;  %v1788_v1 = vpop.f32.mrf.mxu3 }
 0x144   :  { %2100 = vmatpush.msrb.mxu3 %v551_v2  ;;  %2117 = vmatpush.msra.mxu0 %v703_v3  ;;  %v991_v54 = vld [vmem:[#allocation6 + $0x1350] sm:$0xff] }
 0x145   :  { %2137 = vmatpush.msra.mxu1 %v831_v4  ;;  %2081 = vmatpush.msrb.mxu2 %v415_v5  ;;  %v1119_v55 = vld [vmem:[#allocation6 + $0x1750] sm:$0xff]  ;;  %v1789_v4 = vadd.f32 %v1788_v1, %v1769_v61 }
 0x146   :  { %2101 = vmatpush.msrb.mxu3 %v543_v6  ;;  %2118 = vmatpush.msra.mxu0 %v695_v7  ;;  %v631_v57 = vld [vmem:[#allocation6 + $0x810] sm:$0xff] }
 0x147   :  { %2138 = vmatpush.msra.mxu1 %v823_v8  ;;  %2082 = vmatpush.msrb.mxu2 %v407_v9  ;;  %v759_v58 = vld [vmem:[#allocation6 + $0xc10] sm:$0xff]  ;;  %v1808_v9 = vpop.f32.mrf.mxu0 }
 0x148   :  { %2102 = vmatpush.msrb.mxu3 %v535_v10  ;;  %2119 = vmatpush.msra.mxu0 %v687_v12  ;;  %v983_v62 = vld [vmem:[#allocation6 + $0x1310] sm:$0xff]  ;;  %v1809_v12 = vadd.f32 %v1808_v9, %v1789_v4 }
 0x149   :  { %2139 = vmatpush.msra.mxu1 %v815_v13  ;;  %2083 = vmatpush.msrb.mxu2 %v399_v14  ;;  %v1111_v0 = vld [vmem:[#allocation6 + $0x1710] sm:$0xff] }
 0x14a   :  { %2103 = vmatpush.msrb.mxu3 %v527_v15  ;;  %2120 = vmatpush.msra.mxu0 %v679_v17  ;;  %v1263_v2 = vld [vmem:[#allocation6 + $0x1bd0] sm:$0xff]  ;;  %v1848_v1 = vpop.f32.mrf.mxu2 }
 0x14b   :  { %2140 = vmatpush.msra.mxu1 %v807_v18  ;;  %2084 = vmatpush.msrb.mxu2 %v391_v20  ;;  %v1391_v3 = vld [vmem:[#allocation6 + $0x1fd0] sm:$0xff]  ;;  %v1828_v18 = vpop.f32.mrf.mxu1 }
 0x14c   :  { %2104 = vmatpush.msrb.mxu3 %v519_v21  ;;  %2121 = vmatpush.msra.mxu0 %v671_v23  ;;  %v975_v5 = vld [vmem:[#allocation6 + $0x12d0] sm:$0xff]  ;;  %v4244_v21 = vadd.f32 %v1828_v18, %v1809_v12 }
 0x14d   :  { %2141 = vmatpush.msra.mxu1 %v799_v24  ;;  %2085 = vmatpush.msrb.mxu2 %v383_v25  ;;  %v1103_v6 = vld [vmem:[#allocation6 + $0x16d0] sm:$0xff] }
 0x14e   :  { %2105 = vmatpush.msrb.mxu3 %v511_v26  ;;  %2122 = vmatpush.msra.mxu0 %v663_v31  ;;  %v1255_v7 = vld [vmem:[#allocation6 + $0x1b90] sm:$0xff]  ;;  %v1849_v4 = vadd.f32 %v1848_v1, %v4244_v21 }
 0x14f   :  { %2142 = vmatpush.msra.mxu1 %v791_v32  ;;  %2086 = vmatpush.msrb.mxu2 %v375_v34  ;;  %v1383_v8 = vld [vmem:[#allocation6 + $0x1f90] sm:$0xff] }
 0x150   :  { %2106 = vmatpush.msrb.mxu3 %v503_v35  ;;  %2123 = vmatpush.msra.mxu0 %v655_v37  ;;  %v967_v10 = vld [vmem:[#allocation6 + $0x1290] sm:$0xff] }
 0x151   :  { %2143 = vmatpush.msra.mxu1 %v783_v38  ;;  %2087 = vmatmul.f32.vlgmr.msrb.gmra.mxu2 %v4194_v28  ;;  %v1095_v11 = vld [vmem:[#allocation6 + $0x1690] sm:$0xff] }
 0x152   :  { %2107 = vmatmul.f32.vlgmr.msrb.gmra.mxu3 %v4196_v29  ;;  %2151 = vmatpush.msra.mxu2 %v1007_v41  ;;  %v1247_v13 = vld [vmem:[#allocation6 + $0x1b50] sm:$0xff] }
 0x153   :  { %2171 = vmatpush.msra.mxu3 %v1135_v42  ;;  %2124 = vmatpush.msra.mxu0 %v647_v44  ;;  %v1375_v14 = vld [vmem:[#allocation6 + $0x1f50] sm:$0xff] }
 0x154   :  { %2144 = vmatpush.msra.mxu1 %v775_v45  ;;  %2152 = vmatpush.msra.mxu2 %v999_v46  ;;  %v959_v15 = vld [vmem:[#allocation6 + $0x1250] sm:$0xff] }
 0x155   :  { %2172 = vmatpush.msra.mxu3 %v1127_v47  ;;  %2125 = vmatpush.msra.mxu0 %v639_v51  ;;  %v1087_v17 = vld [vmem:[#allocation6 + $0x1650] sm:$0xff] }
 0x156   :  { %2145 = vmatpush.msra.mxu1 %v767_v53  ;;  %2153 = vmatpush.msra.mxu2 %v991_v54  ;;  %v1239_v19 = vld [vmem:[#allocation6 + $0x1b10] sm:$0xff] }
 0x157   :  { %2173 = vmatpush.msra.mxu3 %v1119_v55  ;;  %2126 = vmatpush.msra.mxu0 %v631_v57  ;;  %v1367_v20 = vld [vmem:[#allocation6 + $0x1f10] sm:$0xff] }
 0x158   :  { %2146 = vmatpush.msra.mxu1 %v759_v58  ;;  %2127 = vmatmul.f32.vlgmr.msra.gmra.mxu0 %v4204_v48  ;;  %v951_v23 = vld [vmem:[#allocation6 + $0x1210] sm:$0xff] }
 0x159   :  { %2147 = vmatmul.f32.vlgmr.msra.gmra.mxu1 %v4206_v49  ;;  %2154 = vmatpush.msra.mxu2 %v983_v62  ;;  %v1079_v24 = vld [vmem:[#allocation6 + $0x1610] sm:$0xff] }
 0x15a   :  { %2174 = vmatpush.msra.mxu3 %v1111_v0  ;;  %2191 = vmatpush.msrb.mxu0 %v1263_v2  ;;  %v1231_v25 = vld [vmem:[#allocation6 + $0x1ad0] sm:$0xff] }
 0x15b   :  { %2211 = vmatpush.msrb.mxu1 %v1391_v3  ;;  %2155 = vmatpush.msra.mxu2 %v975_v5  ;;  %v1359_v26 = vld [vmem:[#allocation6 + $0x1ed0] sm:$0xff]  ;;  %v1868_v5 = vpop.f32.mrf.mxu3 }
 0x15c   :  { %2175 = vmatpush.msra.mxu3 %v1103_v6  ;;  %2192 = vmatpush.msrb.mxu0 %v1255_v7  ;;  %v943_v27 = vld [vmem:[#allocation6 + $0x11d0] sm:$0xff] }
 0x15d   :  { %2212 = vmatpush.msrb.mxu1 %v1383_v8  ;;  %2156 = vmatpush.msra.mxu2 %v967_v10  ;;  %v1071_v30 = vld [vmem:[#allocation6 + $0x15d0] sm:$0xff]  ;;  %v4247_v8 = vadd.f32 %v1868_v5, %v1849_v4  ;;  %v552_v4 = vld [vmem:[#allocation6 + $0x598] sm:$0xff] }
 0x15e   :  { %2176 = vmatpush.msra.mxu3 %v1095_v11  ;;  %2193 = vmatpush.msrb.mxu0 %v1247_v13  ;;  %v1223_v31 = vld [vmem:[#allocation6 + $0x1a90] sm:$0xff] }
 0x15f   :  { %2213 = vmatpush.msrb.mxu1 %v1375_v14  ;;  %2157 = vmatpush.msra.mxu2 %v959_v15  ;;  %v1351_v32 = vld [vmem:[#allocation6 + $0x1e90] sm:$0xff] }
 0x160   :  { %2177 = vmatpush.msra.mxu3 %v1087_v17  ;;  %2194 = vmatpush.msrb.mxu0 %v1239_v19  ;;  %v935_v33 = vld [vmem:[#allocation6 + $0x1190] sm:$0xff] }
 0x161   :  { %2214 = vmatpush.msrb.mxu1 %v1367_v20  ;;  %2158 = vmatpush.msra.mxu2 %v951_v23  ;;  %v1063_v34 = vld [vmem:[#allocation6 + $0x1590] sm:$0xff]  ;;  %v496_v23 = vld [vmem:[#allocation6 + $0x3d8] sm:$0xff] }
 0x162   :  { %2178 = vmatpush.msra.mxu3 %v1079_v24  ;;  %2195 = vmatpush.msrb.mxu0 %v1231_v25  ;;  %v1215_v35 = vld [vmem:[#allocation6 + $0x1a50] sm:$0xff]  ;;  %v624_v24 = vld [vmem:[#allocation6 + $0x7d8] sm:$0xff] }
 0x163   :  { %2215 = vmatpush.msrb.mxu1 %v1359_v26  ;;  %2159 = vmatpush.msra.mxu2 %v943_v27  ;;  %v1343_v36 = vld [vmem:[#allocation6 + $0x1e50] sm:$0xff]  ;;  %v488_v27 = vld [vmem:[#allocation6 + $0x398] sm:$0xff] }
 0x164   :  { %2179 = vmatpush.msra.mxu3 %v1071_v30  ;;  %2196 = vmatpush.msrb.mxu0 %v1223_v31  ;;  %v927_v37 = vld [vmem:[#allocation6 + $0x1150] sm:$0xff]  ;;  %v616_v30 = vld [vmem:[#allocation6 + $0x798] sm:$0xff] }
 0x165   :  { %2216 = vmatpush.msrb.mxu1 %v1351_v32  ;;  %v1055_v38 = vld [vmem:[#allocation6 + $0x1550] sm:$0xff]  ;;  %2160 = vmatpush.msra.mxu2 %v935_v33  ;;  %v480_v33 = vld [vmem:[#allocation6 + $0x358] sm:$0xff] }
 0x166   :  { %2180 = vmatpush.msra.mxu3 %v1063_v34  ;;  %v1207_v39 = vld [vmem:[#allocation6 + $0x1a10] sm:$0xff]  ;;  %2197 = vmatpush.msrb.mxu0 %v1215_v35  ;;  %v608_v34 = vld [vmem:[#allocation6 + $0x758] sm:$0xff] }
 0x167   :  { %v1335_v40 = vld [vmem:[#allocation6 + $0x1e10] sm:$0xff]  ;;  %2217 = vmatpush.msrb.mxu1 %v1343_v36  ;;  %2161 = vmatpush.msra.mxu2 %v927_v37  ;;  %v472_v37 = vld [vmem:[#allocation6 + $0x318] sm:$0xff] }
 0x168   :  { %v919_v41 = vld [vmem:[#allocation6 + $0x1110] sm:$0xff]  ;;  %2181 = vmatpush.msra.mxu3 %v1055_v38  ;;  %2198 = vmatpush.msrb.mxu0 %v1207_v39  ;;  %v600_v38 = vld [vmem:[#allocation6 + $0x718] sm:$0xff] }
 0x169   :  { %v1047_v42 = vld [vmem:[#allocation6 + $0x1510] sm:$0xff]  ;;  %2218 = vmatpush.msrb.mxu1 %v1335_v40  ;;  %2162 = vmatpush.msra.mxu2 %v919_v41  ;;  %v464_v41 = vld [vmem:[#allocation6 + $0x2d8] sm:$0xff] }
 0x16a   :  { %v1199_v43 = vld [vmem:[#allocation6 + $0x19d0] sm:$0xff]  ;;  %2182 = vmatpush.msra.mxu3 %v1047_v42  ;;  %v592_v42 = vld [vmem:[#allocation6 + $0x6d8] sm:$0xff] }
 0x16b   :  { %v1327_v44 = vld [vmem:[#allocation6 + $0x1dd0] sm:$0xff]  ;;  %2199 = vmatpush.msrb.mxu0 %v1199_v43 }
 0x16c   :  { %v911_v45 = vld [vmem:[#allocation6 + $0x10d0] sm:$0xff]  ;;  %2219 = vmatpush.msrb.mxu1 %v1327_v44 }
 0x16d   :  { %v1039_v46 = vld [vmem:[#allocation6 + $0x14d0] sm:$0xff]  ;;  %2163 = vmatpush.msra.mxu2 %v911_v45  ;;  %v456_v45 = vld [vmem:[#allocation6 + $0x298] sm:$0xff] }
 0x16e   :  { %v1191_v47 = vld [vmem:[#allocation6 + $0x1990] sm:$0xff]  ;;  %2183 = vmatpush.msra.mxu3 %v1039_v46  ;;  %v584_v46 = vld [vmem:[#allocation6 + $0x698] sm:$0xff] }
 0x16f   :  { %v1319_v50 = vld [vmem:[#allocation6 + $0x1d90] sm:$0xff]  ;;  %2200 = vmatpush.msrb.mxu0 %v1191_v47 }
 0x170   :  { %v903_v51 = vld [vmem:[#allocation6 + $0x1090] sm:$0xff]  ;;  %2220 = vmatpush.msrb.mxu1 %v1319_v50 }
 0x171   :  { %v1031_v53 = vld [vmem:[#allocation6 + $0x1490] sm:$0xff]  ;;  %2164 = vmatpush.msra.mxu2 %v903_v51  ;;  %v448_v51 = vld [vmem:[#allocation6 + $0x258] sm:$0xff] }
 0x172   :  { %v1183_v54 = vld [vmem:[#allocation6 + $0x1950] sm:$0xff]  ;;  %2184 = vmatpush.msra.mxu3 %v1031_v53  ;;  %v576_v53 = vld [vmem:[#allocation6 + $0x658] sm:$0xff] }
 0x173   :  { %v1311_v55 = vld [vmem:[#allocation6 + $0x1d50] sm:$0xff]  ;;  %2201 = vmatpush.msrb.mxu0 %v1183_v54 }
 0x174   :  { %v895_v57 = vld [vmem:[#allocation6 + $0x1050] sm:$0xff]  ;;  %2221 = vmatpush.msrb.mxu1 %v1311_v55 }
 0x175   :  { %v1023_v58 = vld [vmem:[#allocation6 + $0x1450] sm:$0xff]  ;;  %2165 = vmatpush.msra.mxu2 %v895_v57  ;;  %v440_v57 = vld [vmem:[#allocation6 + $0x218] sm:$0xff] }
 0x176   :  { %v1175_v60 = vld [vmem:[#allocation6 + $0x1910] sm:$0xff]  ;;  %2185 = vmatpush.msra.mxu3 %v1023_v58  ;;  %v568_v58 = vld [vmem:[#allocation6 + $0x618] sm:$0xff] }
 0x177   :  { %v1303_v61 = vld [vmem:[#allocation6 + $0x1d10] sm:$0xff]  ;;  %2202 = vmatpush.msrb.mxu0 %v1175_v60 }
 0x178   :  { %v887_v62 = vld [vmem:[#allocation6 + $0x1010] sm:$0xff]  ;;  %2222 = vmatpush.msrb.mxu1 %v1303_v61 }
 0x179   :  { %v1015_v0 = vld [vmem:[#allocation6 + $0x1410] sm:$0xff]  ;;  %2166 = vmatpush.msra.mxu2 %v887_v62  ;;  %v432_v62 = vld [vmem:[#allocation6 + $0x1d8] sm:$0xff] }
 0x17a   :  { %v1167_v2 = vld [vmem:[#allocation6 + $0x18d0] sm:$0xff]  ;;  %2186 = vmatpush.msra.mxu3 %v1015_v0  ;;  %2167 = vmatmul.f32.vlgmr.msra.gmra.mxu2 %v4208_v52  ;;  %v560_v0 = vld [vmem:[#allocation6 + $0x5d8] sm:$0xff] }
 0x17b   :  { %v1295_v3 = vld [vmem:[#allocation6 + $0x1cd0] sm:$0xff]  ;;  %2203 = vmatpush.msrb.mxu0 %v1167_v2  ;;  %2187 = vmatmul.f32.vlgmr.msra.gmra.mxu3 %v4212_v56 }
 0x17c   :  { %v1519_v6 = vld [vmem:[#allocation6 + $0x23d0] sm:$0xff]  ;;  %2223 = vmatpush.msrb.mxu1 %v1295_v3  ;;  %v424_v3 = vld [vmem:[#allocation6 + $0x198] sm:$0xff] }
 0x17d   :  { %v1647_v7 = vld [vmem:[#allocation6 + $0x27d0] sm:$0xff]  ;;  %2231 = vmatpush.msrb.mxu2 %v1519_v6 }
 0x17e   :  { %v1159_v9 = vld [vmem:[#allocation6 + $0x1890] sm:$0xff]  ;;  %2251 = vmatpush.msrb.mxu3 %v1647_v7  ;;  %v416_v7 = vld [vmem:[#allocation6 + $0x158] sm:$0xff] }
 0x17f   :  { %v1287_v10 = vld [vmem:[#allocation6 + $0x1c90] sm:$0xff]  ;;  %2204 = vmatpush.msrb.mxu0 %v1159_v9  ;;  %v544_v9 = vld [vmem:[#allocation6 + $0x558] sm:$0xff] }
 0x180   :  { %v1511_v11 = vld [vmem:[#allocation6 + $0x2390] sm:$0xff]  ;;  %2224 = vmatpush.msrb.mxu1 %v1287_v10 }
 0x181   :  { %v1639_v12 = vld [vmem:[#allocation6 + $0x2790] sm:$0xff]  ;;  %2232 = vmatpush.msrb.mxu2 %v1511_v11 }
 0x182   :  { %v1151_v13 = vld [vmem:[#allocation6 + $0x1850] sm:$0xff]  ;;  %2252 = vmatpush.msrb.mxu3 %v1639_v12  ;;  %v408_v12 = vld [vmem:[#allocation6 + $0x118] sm:$0xff] }
 0x183   :  { %v1279_v14 = vld [vmem:[#allocation6 + $0x1c50] sm:$0xff]  ;;  %2205 = vmatpush.msrb.mxu0 %v1151_v13  ;;  %v536_v13 = vld [vmem:[#allocation6 + $0x518] sm:$0xff] }
 0x184   :  { %v1503_v15 = vld [vmem:[#allocation6 + $0x2350] sm:$0xff]  ;;  %2225 = vmatpush.msrb.mxu1 %v1279_v14 }
 0x185   :  { %v1631_v17 = vld [vmem:[#allocation6 + $0x2750] sm:$0xff]  ;;  %2233 = vmatpush.msrb.mxu2 %v1503_v15 }
 0x186   :  { %v1143_v18 = vld [vmem:[#allocation6 + $0x1810] sm:$0xff]  ;;  %2253 = vmatpush.msrb.mxu3 %v1631_v17  ;;  %v400_v17 = vld [vmem:[#allocation6 + $0xd8] sm:$0xff] }
 0x187   :  { %v1271_v19 = vld [vmem:[#allocation6 + $0x1c10] sm:$0xff]  ;;  %2206 = vmatpush.msrb.mxu0 %v1143_v18  ;;  %v528_v18 = vld [vmem:[#allocation6 + $0x4d8] sm:$0xff] }
 0x188   :  { %v1495_v20 = vld [vmem:[#allocation6 + $0x2310] sm:$0xff]  ;;  %2226 = vmatpush.msrb.mxu1 %v1271_v19  ;;  %2207 = vmatmul.f32.vlgmr.msrb.gmra.mxu0 %v4218_v16  ;;  %v752_v19 = vld [vmem:[#allocation6 + $0xbd8] sm:$0xff] }
 0x189   :  { %v1623_v21 = vld [vmem:[#allocation6 + $0x2710] sm:$0xff]  ;;  %2227 = vmatmul.f32.vlgmr.msrb.gmra.mxu1 %v4220_v22  ;;  %2234 = vmatpush.msrb.mxu2 %v1495_v20  ;;  %v880_v20 = vld [vmem:[#allocation6 + $0xfd8] sm:$0xff] }
 0x18a   :  { %v1487_v25 = vld [vmem:[#allocation6 + $0x22d0] sm:$0xff]  ;;  %2254 = vmatpush.msrb.mxu3 %v1623_v21  ;;  %2271 = vmatpush.msra.mxu0 %v496_v23  ;;  %v392_v21 = vld [vmem:[#allocation6 + $0x98] sm:$0xff] }
 0x18b   :  { %v1615_v26 = vld [vmem:[#allocation6 + $0x26d0] sm:$0xff]  ;;  %2291 = vmatpush.msra.mxu1 %v624_v24  ;;  %2235 = vmatpush.msrb.mxu2 %v1487_v25  ;;  %v520_v23 = vld [vmem:[#allocation6 + $0x498] sm:$0xff] }
 0x18c   :  { %v1479_v31 = vld [vmem:[#allocation6 + $0x2290] sm:$0xff]  ;;  %2255 = vmatpush.msrb.mxu3 %v1615_v26  ;;  %2272 = vmatpush.msra.mxu0 %v488_v27  ;;  %v744_v24 = vld [vmem:[#allocation6 + $0xb98] sm:$0xff] }
 0x18d   :  { %v1607_v32 = vld [vmem:[#allocation6 + $0x2690] sm:$0xff]  ;;  %2292 = vmatpush.msra.mxu1 %v616_v30  ;;  %2236 = vmatpush.msrb.mxu2 %v1479_v31  ;;  %v872_v25 = vld [vmem:[#allocation6 + $0xf98] sm:$0xff] }
 0x18e   :  { %v1471_v35 = vld [vmem:[#allocation6 + $0x2250] sm:$0xff]  ;;  %2256 = vmatpush.msrb.mxu3 %v1607_v32  ;;  %2273 = vmatpush.msra.mxu0 %v480_v33  ;;  %v384_v26 = vld [vmem:[#allocation6 + $0x58] sm:$0xff] }
 0x18f   :  { %v1599_v36 = vld [vmem:[#allocation6 + $0x2650] sm:$0xff]  ;;  %2293 = vmatpush.msra.mxu1 %v608_v34  ;;  %2237 = vmatpush.msrb.mxu2 %v1471_v35  ;;  %v512_v27 = vld [vmem:[#allocation6 + $0x458] sm:$0xff] }
 0x190   :  { %v1463_v39 = vld [vmem:[#allocation6 + $0x2210] sm:$0xff]  ;;  %2257 = vmatpush.msrb.mxu3 %v1599_v36  ;;  %2274 = vmatpush.msra.mxu0 %v472_v37  ;;  %v736_v30 = vld [vmem:[#allocation6 + $0xb58] sm:$0xff] }
 0x191   :  { %v1591_v40 = vld [vmem:[#allocation6 + $0x2610] sm:$0xff]  ;;  %2294 = vmatpush.msra.mxu1 %v600_v38  ;;  %2238 = vmatpush.msrb.mxu2 %v1463_v39  ;;  %v864_v31 = vld [vmem:[#allocation6 + $0xf58] sm:$0xff] }
 0x192   :  { %v1455_v43 = vld [vmem:[#allocation6 + $0x21d0] sm:$0xff]  ;;  %2258 = vmatpush.msrb.mxu3 %v1591_v40  ;;  %2275 = vmatpush.msra.mxu0 %v464_v41  ;;  %v376_v32 = vld [vmem:[#allocation6 + $0x18] sm:$0xff] }
 0x193   :  { %v1583_v44 = vld [vmem:[#allocation6 + $0x25d0] sm:$0xff]  ;;  %2295 = vmatpush.msra.mxu1 %v592_v42  ;;  %2239 = vmatpush.msrb.mxu2 %v1455_v43  ;;  %v504_v33 = vld [vmem:[#allocation6 + $0x418] sm:$0xff] }
 0x194   :  { %v1447_v47 = vld [vmem:[#allocation6 + $0x2190] sm:$0xff]  ;;  %2259 = vmatpush.msrb.mxu3 %v1583_v44  ;;  %2276 = vmatpush.msra.mxu0 %v456_v45  ;;  %v728_v34 = vld [vmem:[#allocation6 + $0xb18] sm:$0xff] }
 0x195   :  { %v1575_v50 = vld [vmem:[#allocation6 + $0x2590] sm:$0xff]  ;;  %2296 = vmatpush.msra.mxu1 %v584_v46  ;;  %2240 = vmatpush.msrb.mxu2 %v1447_v47  ;;  %v856_v35 = vld [vmem:[#allocation6 + $0xf18] sm:$0xff] }
 0x196   :  { %v1439_v54 = vld [vmem:[#allocation6 + $0x2150] sm:$0xff]  ;;  %2260 = vmatpush.msrb.mxu3 %v1575_v50  ;;  %2277 = vmatpush.msra.mxu0 %v448_v51  ;;  %v1008_v36 = vld [vmem:[#allocation6 + $0x13d8] sm:$0xff] }
 0x197   :  { %v1567_v55 = vld [vmem:[#allocation6 + $0x2550] sm:$0xff]  ;;  %2297 = vmatpush.msra.mxu1 %v576_v53  ;;  %2241 = vmatpush.msrb.mxu2 %v1439_v54  ;;  %v1136_v37 = vld [vmem:[#allocation6 + $0x17d8] sm:$0xff] }
 0x198   :  { %v1431_v60 = vld [vmem:[#allocation6 + $0x2110] sm:$0xff]  ;;  %2261 = vmatpush.msrb.mxu3 %v1567_v55  ;;  %2278 = vmatpush.msra.mxu0 %v440_v57  ;;  %v720_v38 = vld [vmem:[#allocation6 + $0xad8] sm:$0xff] }
 0x199   :  { %v1559_v61 = vld [vmem:[#allocation6 + $0x2510] sm:$0xff]  ;;  %2298 = vmatpush.msra.mxu1 %v568_v58  ;;  %2242 = vmatpush.msrb.mxu2 %v1431_v60  ;;  %v848_v39 = vld [vmem:[#allocation6 + $0xed8] sm:$0xff] }
 0x19a   :  { %v1423_v1 = vld [vmem:[#allocation6 + $0x20d0] sm:$0xff]  ;;  %2262 = vmatpush.msrb.mxu3 %v1559_v61  ;;  %2279 = vmatpush.msra.mxu0 %v432_v62  ;;  %v1000_v40 = vld [vmem:[#allocation6 + $0x1398] sm:$0xff] }
 0x19b   :  { %v1551_v2 = vld [vmem:[#allocation6 + $0x24d0] sm:$0xff]  ;;  %2299 = vmatpush.msra.mxu1 %v560_v0  ;;  %2243 = vmatpush.msrb.mxu2 %v1423_v1  ;;  %v1128_v41 = vld [vmem:[#allocation6 + $0x1798] sm:$0xff] }
 0x19c   :  { %v1415_v5 = vld [vmem:[#allocation6 + $0x2090] sm:$0xff]  ;;  %2263 = vmatpush.msrb.mxu3 %v1551_v2  ;;  %2280 = vmatpush.msra.mxu0 %v424_v3  ;;  %v712_v42 = vld [vmem:[#allocation6 + $0xa98] sm:$0xff] }
 0x19d   :  { %v1543_v6 = vld [vmem:[#allocation6 + $0x2490] sm:$0xff]  ;;  %2300 = vmatpush.msra.mxu1 %v552_v4  ;;  %2244 = vmatpush.msrb.mxu2 %v1415_v5  ;;  %v840_v43 = vld [vmem:[#allocation6 + $0xe98] sm:$0xff] }
 0x19e   :  { %v1407_v10 = vld [vmem:[#allocation6 + $0x2050] sm:$0xff]  ;;  %2264 = vmatpush.msrb.mxu3 %v1543_v6  ;;  %2281 = vmatpush.msra.mxu0 %v416_v7  ;;  %v992_v44 = vld [vmem:[#allocation6 + $0x1358] sm:$0xff] }
 0x19f   :  { %v1535_v11 = vld [vmem:[#allocation6 + $0x2450] sm:$0xff]  ;;  %2301 = vmatpush.msra.mxu1 %v544_v9  ;;  %2245 = vmatpush.msrb.mxu2 %v1407_v10  ;;  %v1120_v45 = vld [vmem:[#allocation6 + $0x1758] sm:$0xff] }
 0x1a0   :  { %v1399_v14 = vld [vmem:[#allocation6 + $0x2010] sm:$0xff]  ;;  %2265 = vmatpush.msrb.mxu3 %v1535_v11  ;;  %2282 = vmatpush.msra.mxu0 %v408_v12  ;;  %v704_v46 = vld [vmem:[#allocation6 + $0xa58] sm:$0xff] }
 0x1a1   :  { %v1527_v15 = vld [vmem:[#allocation6 + $0x2410] sm:$0xff]  ;;  %2302 = vmatpush.msra.mxu1 %v536_v13  ;;  %2246 = vmatpush.msrb.mxu2 %v1399_v14  ;;  %v832_v47 = vld [vmem:[#allocation6 + $0xe58] sm:$0xff] }
 0x1a2   :  { %2266 = vmatpush.msrb.mxu3 %v1527_v15  ;;  %2283 = vmatpush.msra.mxu0 %v400_v17  ;;  %v984_v50 = vld [vmem:[#allocation6 + $0x1318] sm:$0xff] }
 0x1a3   :  { %2303 = vmatpush.msra.mxu1 %v528_v18  ;;  %2247 = vmatmul.f32.vlgmr.msrb.gmra.mxu2 %v4224_v59  ;;  %v1112_v51 = vld [vmem:[#allocation6 + $0x1718] sm:$0xff] }
 0x1a4   :  { %2267 = vmatmul.f32.vlgmr.msrb.gmra.mxu3 %v4226_v63  ;;  %2311 = vmatpush.msra.mxu2 %v752_v19  ;;  %v696_v53 = vld [vmem:[#allocation6 + $0xa18] sm:$0xff] }
 0x1a5   :  { %2331 = vmatpush.msra.mxu3 %v880_v20  ;;  %2284 = vmatpush.msra.mxu0 %v392_v21  ;;  %v824_v54 = vld [vmem:[#allocation6 + $0xe18] sm:$0xff] }
 0x1a6   :  { %2304 = vmatpush.msra.mxu1 %v520_v23  ;;  %2312 = vmatpush.msra.mxu2 %v744_v24  ;;  %v976_v55 = vld [vmem:[#allocation6 + $0x12d8] sm:$0xff] }
 0x1a7   :  { %2332 = vmatpush.msra.mxu3 %v872_v25  ;;  %2285 = vmatpush.msra.mxu0 %v384_v26  ;;  %v1104_v57 = vld [vmem:[#allocation6 + $0x16d8] sm:$0xff] }
 0x1a8   :  { %2305 = vmatpush.msra.mxu1 %v512_v27  ;;  %2313 = vmatpush.msra.mxu2 %v736_v30  ;;  %v688_v58 = vld [vmem:[#allocation6 + $0x9d8] sm:$0xff] }
 0x1a9   :  { %2333 = vmatpush.msra.mxu3 %v864_v31  ;;  %2286 = vmatpush.msra.mxu0 %v376_v32  ;;  %v816_v60 = vld [vmem:[#allocation6 + $0xdd8] sm:$0xff] }
 0x1aa   :  { %2306 = vmatpush.msra.mxu1 %v504_v33  ;;  %2287 = vmatmul.f32.vlgmr.msra.gmra.mxu0 %v4194_v28  ;;  %v968_v61 = vld [vmem:[#allocation6 + $0x1298] sm:$0xff] }
 0x1ab   :  { %2307 = vmatmul.f32.vlgmr.msra.gmra.mxu1 %v4196_v29  ;;  %2314 = vmatpush.msra.mxu2 %v728_v34  ;;  %v1096_v62 = vld [vmem:[#allocation6 + $0x1698] sm:$0xff] }
 0x1ac   :  { %2334 = vmatpush.msra.mxu3 %v856_v35  ;;  %2351 = vmatpush.msrb.mxu0 %v1008_v36  ;;  %v680_v0 = vld [vmem:[#allocation6 + $0x998] sm:$0xff] }
 0x1ad   :  { %2371 = vmatpush.msrb.mxu1 %v1136_v37  ;;  %2315 = vmatpush.msra.mxu2 %v720_v38  ;;  %v808_v1 = vld [vmem:[#allocation6 + $0xd98] sm:$0xff] }
 0x1ae   :  { %2335 = vmatpush.msra.mxu3 %v848_v39  ;;  %2352 = vmatpush.msrb.mxu0 %v1000_v40  ;;  %v960_v2 = vld [vmem:[#allocation6 + $0x1258] sm:$0xff] }
 0x1af   :  { %2372 = vmatpush.msrb.mxu1 %v1128_v41  ;;  %2316 = vmatpush.msra.mxu2 %v712_v42  ;;  %v1088_v3 = vld [vmem:[#allocation6 + $0x1658] sm:$0xff] }
 0x1b0   :  { %2336 = vmatpush.msra.mxu3 %v840_v43  ;;  %2353 = vmatpush.msrb.mxu0 %v992_v44  ;;  %v672_v4 = vld [vmem:[#allocation6 + $0x958] sm:$0xff] }
 0x1b1   :  { %2373 = vmatpush.msrb.mxu1 %v1120_v45  ;;  %2317 = vmatpush.msra.mxu2 %v704_v46  ;;  %v800_v5 = vld [vmem:[#allocation6 + $0xd58] sm:$0xff] }
 0x1b2   :  { %2337 = vmatpush.msra.mxu3 %v832_v47  ;;  %2354 = vmatpush.msrb.mxu0 %v984_v50  ;;  %v952_v6 = vld [vmem:[#allocation6 + $0x1218] sm:$0xff] }
 0x1b3   :  { %2374 = vmatpush.msrb.mxu1 %v1112_v51  ;;  %2318 = vmatpush.msra.mxu2 %v696_v53  ;;  %v1080_v7 = vld [vmem:[#allocation6 + $0x1618] sm:$0xff] }
 0x1b4   :  { %2338 = vmatpush.msra.mxu3 %v824_v54  ;;  %2355 = vmatpush.msrb.mxu0 %v976_v55  ;;  %v664_v9 = vld [vmem:[#allocation6 + $0x918] sm:$0xff] }
 0x1b5   :  { %2375 = vmatpush.msrb.mxu1 %v1104_v57  ;;  %2319 = vmatpush.msra.mxu2 %v688_v58  ;;  %v792_v10 = vld [vmem:[#allocation6 + $0xd18] sm:$0xff] }
 0x1b6   :  { %2339 = vmatpush.msra.mxu3 %v816_v60  ;;  %2356 = vmatpush.msrb.mxu0 %v968_v61  ;;  %v944_v11 = vld [vmem:[#allocation6 + $0x11d8] sm:$0xff] }
 0x1b7   :  { %2376 = vmatpush.msrb.mxu1 %v1096_v62  ;;  %2320 = vmatpush.msra.mxu2 %v680_v0  ;;  %v1072_v12 = vld [vmem:[#allocation6 + $0x15d8] sm:$0xff] }
 0x1b8   :  { %2340 = vmatpush.msra.mxu3 %v808_v1  ;;  %2357 = vmatpush.msrb.mxu0 %v960_v2  ;;  %v656_v13 = vld [vmem:[#allocation6 + $0x8d8] sm:$0xff] }
 0x1b9   :  { %2377 = vmatpush.msrb.mxu1 %v1088_v3  ;;  %2321 = vmatpush.msra.mxu2 %v672_v4  ;;  %v784_v14 = vld [vmem:[#allocation6 + $0xcd8] sm:$0xff] }
 0x1ba   :  { %2341 = vmatpush.msra.mxu3 %v800_v5  ;;  %2358 = vmatpush.msrb.mxu0 %v952_v6  ;;  %v936_v15 = vld [vmem:[#allocation6 + $0x1198] sm:$0xff] }
 0x1bb   :  { %2378 = vmatpush.msrb.mxu1 %v1080_v7  ;;  %2322 = vmatpush.msra.mxu2 %v664_v9  ;;  %v1064_v17 = vld [vmem:[#allocation6 + $0x1598] sm:$0xff] }
 0x1bc   :  { %2342 = vmatpush.msra.mxu3 %v792_v10  ;;  %2359 = vmatpush.msrb.mxu0 %v944_v11  ;;  %v648_v18 = vld [vmem:[#allocation6 + $0x898] sm:$0xff] }
 0x1bd   :  { %2379 = vmatpush.msrb.mxu1 %v1072_v12  ;;  %v776_v19 = vld [vmem:[#allocation6 + $0xc98] sm:$0xff]  ;;  %2323 = vmatpush.msra.mxu2 %v656_v13 }
 0x1be   :  { %2343 = vmatpush.msra.mxu3 %v784_v14  ;;  %v928_v20 = vld [vmem:[#allocation6 + $0x1158] sm:$0xff]  ;;  %2360 = vmatpush.msrb.mxu0 %v936_v15 }
 0x1bf   :  { %v1056_v21 = vld [vmem:[#allocation6 + $0x1558] sm:$0xff]  ;;  %2380 = vmatpush.msrb.mxu1 %v1064_v17  ;;  %2324 = vmatpush.msra.mxu2 %v648_v18 }
 0x1c0   :  { %v640_v23 = vld [vmem:[#allocation6 + $0x858] sm:$0xff]  ;;  %2344 = vmatpush.msra.mxu3 %v776_v19  ;;  %2361 = vmatpush.msrb.mxu0 %v928_v20 }
 0x1c1   :  { %v768_v24 = vld [vmem:[#allocation6 + $0xc58] sm:$0xff]  ;;  %2381 = vmatpush.msrb.mxu1 %v1056_v21  ;;  %2325 = vmatpush.msra.mxu2 %v640_v23 }
 0x1c2   :  { %v920_v25 = vld [vmem:[#allocation6 + $0x1118] sm:$0xff]  ;;  %2345 = vmatpush.msra.mxu3 %v768_v24 }
 0x1c3   :  { %v1048_v26 = vld [vmem:[#allocation6 + $0x1518] sm:$0xff]  ;;  %2362 = vmatpush.msrb.mxu0 %v920_v25 }
 0x1c4   :  { %v632_v27 = vld [vmem:[#allocation6 + $0x818] sm:$0xff]  ;;  %2382 = vmatpush.msrb.mxu1 %v1048_v26 }
 0x1c5   :  { %v760_v30 = vld [vmem:[#allocation6 + $0xc18] sm:$0xff]  ;;  %2326 = vmatpush.msra.mxu2 %v632_v27 }
 0x1c6   :  { %v912_v31 = vld [vmem:[#allocation6 + $0x10d8] sm:$0xff]  ;;  %2346 = vmatpush.msra.mxu3 %v760_v30  ;;  %2327 = vmatmul.f32.vlgmr.msra.gmra.mxu2 %v4204_v48 }
 0x1c7   :  { %v1040_v32 = vld [vmem:[#allocation6 + $0x14d8] sm:$0xff]  ;;  %2363 = vmatpush.msrb.mxu0 %v912_v31  ;;  %2347 = vmatmul.f32.vlgmr.msra.gmra.mxu3 %v4206_v49 }
 0x1c8   :  { %v1264_v33 = vld [vmem:[#allocation6 + $0x1bd8] sm:$0xff]  ;;  %2383 = vmatpush.msrb.mxu1 %v1040_v32 }
 0x1c9   :  { %v1392_v34 = vld [vmem:[#allocation6 + $0x1fd8] sm:$0xff]  ;;  %2391 = vmatpush.msrb.mxu2 %v1264_v33 }
 0x1ca   :  { %v904_v35 = vld [vmem:[#allocation6 + $0x1098] sm:$0xff]  ;;  %2411 = vmatpush.msrb.mxu3 %v1392_v34 }
 0x1cb   :  { %v1032_v36 = vld [vmem:[#allocation6 + $0x1498] sm:$0xff]  ;;  %2364 = vmatpush.msrb.mxu0 %v904_v35 }
 0x1cc   :  { %v1256_v37 = vld [vmem:[#allocation6 + $0x1b98] sm:$0xff]  ;;  %2384 = vmatpush.msrb.mxu1 %v1032_v36 }
 0x1cd   :  { %v1384_v38 = vld [vmem:[#allocation6 + $0x1f98] sm:$0xff]  ;;  %2392 = vmatpush.msrb.mxu2 %v1256_v37 }
 0x1ce   :  { %v896_v39 = vld [vmem:[#allocation6 + $0x1058] sm:$0xff]  ;;  %2412 = vmatpush.msrb.mxu3 %v1384_v38 }
 0x1cf   :  { %v1024_v40 = vld [vmem:[#allocation6 + $0x1458] sm:$0xff]  ;;  %2365 = vmatpush.msrb.mxu0 %v896_v39 }
 0x1d0   :  { %v1248_v41 = vld [vmem:[#allocation6 + $0x1b58] sm:$0xff]  ;;  %2385 = vmatpush.msrb.mxu1 %v1024_v40 }
 0x1d1   :  { %v1376_v42 = vld [vmem:[#allocation6 + $0x1f58] sm:$0xff]  ;;  %2393 = vmatpush.msrb.mxu2 %v1248_v41 }
 0x1d2   :  { %v888_v43 = vld [vmem:[#allocation6 + $0x1018] sm:$0xff]  ;;  %2413 = vmatpush.msrb.mxu3 %v1376_v42 }
 0x1d3   :  { %v1016_v44 = vld [vmem:[#allocation6 + $0x1418] sm:$0xff]  ;;  %2366 = vmatpush.msrb.mxu0 %v888_v43 }
 0x1d4   :  { %v1240_v45 = vld [vmem:[#allocation6 + $0x1b18] sm:$0xff]  ;;  %2386 = vmatpush.msrb.mxu1 %v1016_v44  ;;  %2367 = vmatmul.f32.vlgmr.msrb.gmra.mxu0 %v4208_v52  ;;  %v497_v44 = vld [vmem:[#allocation6 + $0x3e0] sm:$0xff] }
 0x1d5   :  { %v1368_v46 = vld [vmem:[#allocation6 + $0x1f18] sm:$0xff]  ;;  %2387 = vmatmul.f32.vlgmr.msrb.gmra.mxu1 %v4212_v56  ;;  %2394 = vmatpush.msrb.mxu2 %v1240_v45  ;;  %v625_v45 = vld [vmem:[#allocation6 + $0x7e0] sm:$0xff] }
 0x1d6   :  { %v1520_v47 = vld [vmem:[#allocation6 + $0x23d8] sm:$0xff]  ;;  %2414 = vmatpush.msrb.mxu3 %v1368_v46 }
 0x1d7   :  { %v1648_v50 = vld [vmem:[#allocation6 + $0x27d8] sm:$0xff]  ;;  %2431 = vmatpush.msra.mxu0 %v1520_v47 }
 0x1d8   :  { %v1232_v51 = vld [vmem:[#allocation6 + $0x1ad8] sm:$0xff]  ;;  %2451 = vmatpush.msra.mxu1 %v1648_v50  ;;  %v489_v50 = vld [vmem:[#allocation6 + $0x3a0] sm:$0xff] }
 0x1d9   :  { %v1360_v53 = vld [vmem:[#allocation6 + $0x1ed8] sm:$0xff]  ;;  %2395 = vmatpush.msrb.mxu2 %v1232_v51  ;;  %v617_v51 = vld [vmem:[#allocation6 + $0x7a0] sm:$0xff] }
 0x1da   :  { %v1512_v54 = vld [vmem:[#allocation6 + $0x2398] sm:$0xff]  ;;  %2415 = vmatpush.msrb.mxu3 %v1360_v53 }
 0x1db   :  { %v1640_v55 = vld [vmem:[#allocation6 + $0x2798] sm:$0xff]  ;;  %2432 = vmatpush.msra.mxu0 %v1512_v54 }
 0x1dc   :  { %v1224_v57 = vld [vmem:[#allocation6 + $0x1a98] sm:$0xff]  ;;  %2452 = vmatpush.msra.mxu1 %v1640_v55  ;;  %v481_v55 = vld [vmem:[#allocation6 + $0x360] sm:$0xff] }
 0x1dd   :  { %v1352_v58 = vld [vmem:[#allocation6 + $0x1e98] sm:$0xff]  ;;  %2396 = vmatpush.msrb.mxu2 %v1224_v57  ;;  %v609_v57 = vld [vmem:[#allocation6 + $0x760] sm:$0xff] }
 0x1de   :  { %v1504_v60 = vld [vmem:[#allocation6 + $0x2358] sm:$0xff]  ;;  %2416 = vmatpush.msrb.mxu3 %v1352_v58 }
 0x1df   :  { %v1632_v61 = vld [vmem:[#allocation6 + $0x2758] sm:$0xff]  ;;  %2433 = vmatpush.msra.mxu0 %v1504_v60 }
 0x1e0   :  { %v1216_v62 = vld [vmem:[#allocation6 + $0x1a58] sm:$0xff]  ;;  %2453 = vmatpush.msra.mxu1 %v1632_v61  ;;  %v473_v61 = vld [vmem:[#allocation6 + $0x320] sm:$0xff] }
 0x1e1   :  { %v1344_v0 = vld [vmem:[#allocation6 + $0x1e58] sm:$0xff]  ;;  %2397 = vmatpush.msrb.mxu2 %v1216_v62  ;;  %v601_v62 = vld [vmem:[#allocation6 + $0x720] sm:$0xff] }
 0x1e2   :  { %v1496_v1 = vld [vmem:[#allocation6 + $0x2318] sm:$0xff]  ;;  %2417 = vmatpush.msrb.mxu3 %v1344_v0  ;;  %v753_v0 = vld [vmem:[#allocation6 + $0xbe0] sm:$0xff] }
 0x1e3   :  { %v1624_v2 = vld [vmem:[#allocation6 + $0x2718] sm:$0xff]  ;;  %2434 = vmatpush.msra.mxu0 %v1496_v1  ;;  %v881_v1 = vld [vmem:[#allocation6 + $0xfe0] sm:$0xff] }
 0x1e4   :  { %v1208_v3 = vld [vmem:[#allocation6 + $0x1a18] sm:$0xff]  ;;  %2454 = vmatpush.msra.mxu1 %v1624_v2  ;;  %v465_v2 = vld [vmem:[#allocation6 + $0x2e0] sm:$0xff] }
 0x1e5   :  { %v1336_v4 = vld [vmem:[#allocation6 + $0x1e18] sm:$0xff]  ;;  %2398 = vmatpush.msrb.mxu2 %v1208_v3  ;;  %v593_v3 = vld [vmem:[#allocation6 + $0x6e0] sm:$0xff] }
 0x1e6   :  { %v1488_v5 = vld [vmem:[#allocation6 + $0x22d8] sm:$0xff]  ;;  %2418 = vmatpush.msrb.mxu3 %v1336_v4  ;;  %v745_v4 = vld [vmem:[#allocation6 + $0xba0] sm:$0xff] }
 0x1e7   :  { %v1616_v6 = vld [vmem:[#allocation6 + $0x26d8] sm:$0xff]  ;;  %2435 = vmatpush.msra.mxu0 %v1488_v5  ;;  %v873_v5 = vld [vmem:[#allocation6 + $0xfa0] sm:$0xff] }
 0x1e8   :  { %v1200_v7 = vld [vmem:[#allocation6 + $0x19d8] sm:$0xff]  ;;  %2455 = vmatpush.msra.mxu1 %v1616_v6  ;;  %v457_v6 = vld [vmem:[#allocation6 + $0x2a0] sm:$0xff] }
 0x1e9   :  { %v1328_v9 = vld [vmem:[#allocation6 + $0x1dd8] sm:$0xff]  ;;  %2399 = vmatpush.msrb.mxu2 %v1200_v7  ;;  %v585_v7 = vld [vmem:[#allocation6 + $0x6a0] sm:$0xff] }
 0x1ea   :  { %v1480_v10 = vld [vmem:[#allocation6 + $0x2298] sm:$0xff]  ;;  %2419 = vmatpush.msrb.mxu3 %v1328_v9  ;;  %v737_v9 = vld [vmem:[#allocation6 + $0xb60] sm:$0xff] }
 0x1eb   :  { %v1608_v11 = vld [vmem:[#allocation6 + $0x2698] sm:$0xff]  ;;  %2436 = vmatpush.msra.mxu0 %v1480_v10  ;;  %v865_v10 = vld [vmem:[#allocation6 + $0xf60] sm:$0xff] }
 0x1ec   :  { %v1192_v12 = vld [vmem:[#allocation6 + $0x1998] sm:$0xff]  ;;  %2456 = vmatpush.msra.mxu1 %v1608_v11  ;;  %v449_v11 = vld [vmem:[#allocation6 + $0x260] sm:$0xff] }
 0x1ed   :  { %v1320_v13 = vld [vmem:[#allocation6 + $0x1d98] sm:$0xff]  ;;  %2400 = vmatpush.msrb.mxu2 %v1192_v12  ;;  %v577_v12 = vld [vmem:[#allocation6 + $0x660] sm:$0xff] }
 0x1ee   :  { %v1472_v14 = vld [vmem:[#allocation6 + $0x2258] sm:$0xff]  ;;  %2420 = vmatpush.msrb.mxu3 %v1320_v13  ;;  %v729_v13 = vld [vmem:[#allocation6 + $0xb20] sm:$0xff] }
 0x1ef   :  { %v1600_v15 = vld [vmem:[#allocation6 + $0x2658] sm:$0xff]  ;;  %2437 = vmatpush.msra.mxu0 %v1472_v14  ;;  %v857_v14 = vld [vmem:[#allocation6 + $0xf20] sm:$0xff] }
 0x1f0   :  { %v1184_v17 = vld [vmem:[#allocation6 + $0x1958] sm:$0xff]  ;;  %2457 = vmatpush.msra.mxu1 %v1600_v15  ;;  %v441_v15 = vld [vmem:[#allocation6 + $0x220] sm:$0xff] }
 0x1f1   :  { %v1312_v18 = vld [vmem:[#allocation6 + $0x1d58] sm:$0xff]  ;;  %2401 = vmatpush.msrb.mxu2 %v1184_v17  ;;  %v569_v17 = vld [vmem:[#allocation6 + $0x620] sm:$0xff] }
 0x1f2   :  { %v1464_v19 = vld [vmem:[#allocation6 + $0x2218] sm:$0xff]  ;;  %2421 = vmatpush.msrb.mxu3 %v1312_v18  ;;  %v721_v18 = vld [vmem:[#allocation6 + $0xae0] sm:$0xff] }
 0x1f3   :  { %v1592_v20 = vld [vmem:[#allocation6 + $0x2618] sm:$0xff]  ;;  %2438 = vmatpush.msra.mxu0 %v1464_v19  ;;  %v849_v19 = vld [vmem:[#allocation6 + $0xee0] sm:$0xff] }
 0x1f4   :  { %v1176_v21 = vld [vmem:[#allocation6 + $0x1918] sm:$0xff]  ;;  %2458 = vmatpush.msra.mxu1 %v1592_v20  ;;  %v433_v20 = vld [vmem:[#allocation6 + $0x1e0] sm:$0xff] }
 0x1f5   :  { %v1304_v23 = vld [vmem:[#allocation6 + $0x1d18] sm:$0xff]  ;;  %2402 = vmatpush.msrb.mxu2 %v1176_v21  ;;  %v561_v21 = vld [vmem:[#allocation6 + $0x5e0] sm:$0xff] }
 0x1f6   :  { %v1456_v24 = vld [vmem:[#allocation6 + $0x21d8] sm:$0xff]  ;;  %2422 = vmatpush.msrb.mxu3 %v1304_v23  ;;  %v713_v23 = vld [vmem:[#allocation6 + $0xaa0] sm:$0xff] }
 0x1f7   :  { %v1584_v25 = vld [vmem:[#allocation6 + $0x25d8] sm:$0xff]  ;;  %2439 = vmatpush.msra.mxu0 %v1456_v24  ;;  %v841_v24 = vld [vmem:[#allocation6 + $0xea0] sm:$0xff] }
 0x1f8   :  { %v1168_v26 = vld [vmem:[#allocation6 + $0x18d8] sm:$0xff]  ;;  %2459 = vmatpush.msra.mxu1 %v1584_v25  ;;  %v425_v25 = vld [vmem:[#allocation6 + $0x1a0] sm:$0xff] }
 0x1f9   :  { %v1296_v27 = vld [vmem:[#allocation6 + $0x1cd8] sm:$0xff]  ;;  %2403 = vmatpush.msrb.mxu2 %v1168_v26  ;;  %v553_v26 = vld [vmem:[#allocation6 + $0x5a0] sm:$0xff] }
 0x1fa   :  { %v1448_v30 = vld [vmem:[#allocation6 + $0x2198] sm:$0xff]  ;;  %2423 = vmatpush.msrb.mxu3 %v1296_v27  ;;  %v705_v27 = vld [vmem:[#allocation6 + $0xa60] sm:$0xff] }
 0x1fb   :  { %v1576_v31 = vld [vmem:[#allocation6 + $0x2598] sm:$0xff]  ;;  %2440 = vmatpush.msra.mxu0 %v1448_v30  ;;  %v833_v30 = vld [vmem:[#allocation6 + $0xe60] sm:$0xff] }
 0x1fc   :  { %v1160_v32 = vld [vmem:[#allocation6 + $0x1898] sm:$0xff]  ;;  %2460 = vmatpush.msra.mxu1 %v1576_v31  ;;  %v417_v31 = vld [vmem:[#allocation6 + $0x160] sm:$0xff] }
 0x1fd   :  { %v1288_v33 = vld [vmem:[#allocation6 + $0x1c98] sm:$0xff]  ;;  %2404 = vmatpush.msrb.mxu2 %v1160_v32  ;;  %v545_v32 = vld [vmem:[#allocation6 + $0x560] sm:$0xff] }
 0x1fe   :  { %v1440_v34 = vld [vmem:[#allocation6 + $0x2158] sm:$0xff]  ;;  %2424 = vmatpush.msrb.mxu3 %v1288_v33  ;;  %v697_v33 = vld [vmem:[#allocation6 + $0xa20] sm:$0xff] }
 0x1ff   :  { %v1568_v35 = vld [vmem:[#allocation6 + $0x2558] sm:$0xff]  ;;  %2441 = vmatpush.msra.mxu0 %v1440_v34  ;;  %v825_v34 = vld [vmem:[#allocation6 + $0xe20] sm:$0xff] }
 0x200   :  { %v1152_v36 = vld [vmem:[#allocation6 + $0x1858] sm:$0xff]  ;;  %2461 = vmatpush.msra.mxu1 %v1568_v35  ;;  %v409_v35 = vld [vmem:[#allocation6 + $0x120] sm:$0xff] }
 0x201   :  { %v1280_v37 = vld [vmem:[#allocation6 + $0x1c58] sm:$0xff]  ;;  %2405 = vmatpush.msrb.mxu2 %v1152_v36  ;;  %v537_v36 = vld [vmem:[#allocation6 + $0x520] sm:$0xff] }
 0x202   :  { %v1432_v38 = vld [vmem:[#allocation6 + $0x2118] sm:$0xff]  ;;  %2425 = vmatpush.msrb.mxu3 %v1280_v37  ;;  %v689_v37 = vld [vmem:[#allocation6 + $0x9e0] sm:$0xff] }
 0x203   :  { %v1560_v39 = vld [vmem:[#allocation6 + $0x2518] sm:$0xff]  ;;  %2442 = vmatpush.msra.mxu0 %v1432_v38  ;;  %v817_v38 = vld [vmem:[#allocation6 + $0xde0] sm:$0xff] }
 0x204   :  { %v1144_v40 = vld [vmem:[#allocation6 + $0x1818] sm:$0xff]  ;;  %2462 = vmatpush.msra.mxu1 %v1560_v39  ;;  %v401_v39 = vld [vmem:[#allocation6 + $0xe0] sm:$0xff] }
 0x205   :  { %v1272_v41 = vld [vmem:[#allocation6 + $0x1c18] sm:$0xff]  ;;  %2406 = vmatpush.msrb.mxu2 %v1144_v40  ;;  %v529_v40 = vld [vmem:[#allocation6 + $0x4e0] sm:$0xff] }
 0x206   :  { %v1424_v42 = vld [vmem:[#allocation6 + $0x20d8] sm:$0xff]  ;;  %2426 = vmatpush.msrb.mxu3 %v1272_v41  ;;  %2407 = vmatmul.f32.vlgmr.msrb.gmra.mxu2 %v4218_v16  ;;  %v681_v41 = vld [vmem:[#allocation6 + $0x9a0] sm:$0xff] }
 0x207   :  { %v1552_v43 = vld [vmem:[#allocation6 + $0x24d8] sm:$0xff]  ;;  %2443 = vmatpush.msra.mxu0 %v1424_v42  ;;  %2427 = vmatmul.f32.vlgmr.msrb.gmra.mxu3 %v4220_v22  ;;  %v809_v42 = vld [vmem:[#allocation6 + $0xda0] sm:$0xff] }
 0x208   :  { %2463 = vmatpush.msra.mxu1 %v1552_v43  ;;  %v1416_v46 = vld [vmem:[#allocation6 + $0x2098] sm:$0xff]  ;;  %2471 = vmatpush.msra.mxu2 %v497_v44  ;;  %v393_v43 = vld [vmem:[#allocation6 + $0xa0] sm:$0xff] }
 0x209   :  { %v1544_v47 = vld [vmem:[#allocation6 + $0x2498] sm:$0xff]  ;;  %2491 = vmatpush.msra.mxu3 %v625_v45  ;;  %2444 = vmatpush.msra.mxu0 %v1416_v46  ;;  %v521_v44 = vld [vmem:[#allocation6 + $0x4a0] sm:$0xff] }
 0x20a   :  { %v1408_v53 = vld [vmem:[#allocation6 + $0x2058] sm:$0xff]  ;;  %2464 = vmatpush.msra.mxu1 %v1544_v47  ;;  %2472 = vmatpush.msra.mxu2 %v489_v50  ;;  %v673_v45 = vld [vmem:[#allocation6 + $0x960] sm:$0xff] }
 0x20b   :  { %v1536_v54 = vld [vmem:[#allocation6 + $0x2458] sm:$0xff]  ;;  %2492 = vmatpush.msra.mxu3 %v617_v51  ;;  %2445 = vmatpush.msra.mxu0 %v1408_v53  ;;  %v801_v46 = vld [vmem:[#allocation6 + $0xd60] sm:$0xff] }
 0x20c   :  { %v1400_v58 = vld [vmem:[#allocation6 + $0x2018] sm:$0xff]  ;;  %2465 = vmatpush.msra.mxu1 %v1536_v54  ;;  %2473 = vmatpush.msra.mxu2 %v481_v55  ;;  %v385_v47 = vld [vmem:[#allocation6 + $0x60] sm:$0xff] }
 0x20d   :  { %v1528_v60 = vld [vmem:[#allocation6 + $0x2418] sm:$0xff]  ;;  %2493 = vmatpush.msra.mxu3 %v609_v57  ;;  %2446 = vmatpush.msra.mxu0 %v1400_v58  ;;  %v513_v50 = vld [vmem:[#allocation6 + $0x460] sm:$0xff] }
 0x20e   :  { %2466 = vmatpush.msra.mxu1 %v1528_v60  ;;  %2447 = vmatmul.f32.vlgmr.msra.gmra.mxu0 %v4224_v59  ;;  %v665_v51 = vld [vmem:[#allocation6 + $0x920] sm:$0xff] }
 0x20f   :  { %2467 = vmatmul.f32.vlgmr.msra.gmra.mxu1 %v4226_v63  ;;  %2474 = vmatpush.msra.mxu2 %v473_v61  ;;  %v793_v53 = vld [vmem:[#allocation6 + $0xd20] sm:$0xff] }
 0x210   :  { %2494 = vmatpush.msra.mxu3 %v601_v62  ;;  %2511 = vmatpush.msrb.mxu0 %v753_v0  ;;  %v377_v54 = vld [vmem:[#allocation6 + $0x20] sm:$0xff] }
 0x211   :  { %2531 = vmatpush.msrb.mxu1 %v881_v1  ;;  %2475 = vmatpush.msra.mxu2 %v465_v2  ;;  %v505_v55 = vld [vmem:[#allocation6 + $0x420] sm:$0xff] }
 0x212   :  { %2495 = vmatpush.msra.mxu3 %v593_v3  ;;  %2512 = vmatpush.msrb.mxu0 %v745_v4  ;;  %v657_v57 = vld [vmem:[#allocation6 + $0x8e0] sm:$0xff] }
 0x213   :  { %2532 = vmatpush.msrb.mxu1 %v873_v5  ;;  %2476 = vmatpush.msra.mxu2 %v457_v6  ;;  %v785_v58 = vld [vmem:[#allocation6 + $0xce0] sm:$0xff] }
 0x214   :  { %2496 = vmatpush.msra.mxu3 %v585_v7  ;;  %2513 = vmatpush.msrb.mxu0 %v737_v9  ;;  %v1009_v60 = vld [vmem:[#allocation6 + $0x13e0] sm:$0xff] }
 0x215   :  { %2533 = vmatpush.msrb.mxu1 %v865_v10  ;;  %2477 = vmatpush.msra.mxu2 %v449_v11  ;;  %v1137_v61 = vld [vmem:[#allocation6 + $0x17e0] sm:$0xff] }
 0x216   :  { %2497 = vmatpush.msra.mxu3 %v577_v12  ;;  %2514 = vmatpush.msrb.mxu0 %v729_v13  ;;  %v649_v62 = vld [vmem:[#allocation6 + $0x8a0] sm:$0xff] }
 0x217   :  { %2534 = vmatpush.msrb.mxu1 %v857_v14  ;;  %2478 = vmatpush.msra.mxu2 %v441_v15  ;;  %v777_v0 = vld [vmem:[#allocation6 + $0xca0] sm:$0xff] }
 0x218   :  { %2498 = vmatpush.msra.mxu3 %v569_v17  ;;  %2515 = vmatpush.msrb.mxu0 %v721_v18  ;;  %v1001_v1 = vld [vmem:[#allocation6 + $0x13a0] sm:$0xff] }
 0x219   :  { %2535 = vmatpush.msrb.mxu1 %v849_v19  ;;  %2479 = vmatpush.msra.mxu2 %v433_v20  ;;  %v1129_v2 = vld [vmem:[#allocation6 + $0x17a0] sm:$0xff] }
 0x21a   :  { %2499 = vmatpush.msra.mxu3 %v561_v21  ;;  %2516 = vmatpush.msrb.mxu0 %v713_v23  ;;  %v641_v3 = vld [vmem:[#allocation6 + $0x860] sm:$0xff] }
 0x21b   :  { %2536 = vmatpush.msrb.mxu1 %v841_v24  ;;  %2480 = vmatpush.msra.mxu2 %v425_v25  ;;  %v769_v4 = vld [vmem:[#allocation6 + $0xc60] sm:$0xff] }
 0x21c   :  { %2500 = vmatpush.msra.mxu3 %v553_v26  ;;  %2517 = vmatpush.msrb.mxu0 %v705_v27  ;;  %v993_v5 = vld [vmem:[#allocation6 + $0x1360] sm:$0xff] }
 0x21d   :  { %2537 = vmatpush.msrb.mxu1 %v833_v30  ;;  %2481 = vmatpush.msra.mxu2 %v417_v31  ;;  %v1121_v6 = vld [vmem:[#allocation6 + $0x1760] sm:$0xff] }
 0x21e   :  { %2501 = vmatpush.msra.mxu3 %v545_v32  ;;  %2518 = vmatpush.msrb.mxu0 %v697_v33  ;;  %v633_v7 = vld [vmem:[#allocation6 + $0x820] sm:$0xff] }
 0x21f   :  { %2538 = vmatpush.msrb.mxu1 %v825_v34  ;;  %2482 = vmatpush.msra.mxu2 %v409_v35  ;;  %v761_v9 = vld [vmem:[#allocation6 + $0xc20] sm:$0xff] }
 0x220   :  { %2502 = vmatpush.msra.mxu3 %v537_v36  ;;  %2519 = vmatpush.msrb.mxu0 %v689_v37  ;;  %v985_v10 = vld [vmem:[#allocation6 + $0x1320] sm:$0xff] }
 0x221   :  { %2539 = vmatpush.msrb.mxu1 %v817_v38  ;;  %2483 = vmatpush.msra.mxu2 %v401_v39  ;;  %v1113_v11 = vld [vmem:[#allocation6 + $0x1720] sm:$0xff] }
 0x222   :  { %2503 = vmatpush.msra.mxu3 %v529_v40  ;;  %2520 = vmatpush.msrb.mxu0 %v681_v41  ;;  %v1265_v12 = vld [vmem:[#allocation6 + $0x1be0] sm:$0xff] }
 0x223   :  { %2540 = vmatpush.msrb.mxu1 %v809_v42  ;;  %2484 = vmatpush.msra.mxu2 %v393_v43  ;;  %v1393_v13 = vld [vmem:[#allocation6 + $0x1fe0] sm:$0xff] }
 0x224   :  { %2504 = vmatpush.msra.mxu3 %v521_v44  ;;  %2521 = vmatpush.msrb.mxu0 %v673_v45  ;;  %v977_v14 = vld [vmem:[#allocation6 + $0x12e0] sm:$0xff] }
 0x225   :  { %2541 = vmatpush.msrb.mxu1 %v801_v46  ;;  %2485 = vmatpush.msra.mxu2 %v385_v47  ;;  %v1105_v15 = vld [vmem:[#allocation6 + $0x16e0] sm:$0xff] }
 0x226   :  { %2505 = vmatpush.msra.mxu3 %v513_v50  ;;  %2522 = vmatpush.msrb.mxu0 %v665_v51  ;;  %v1257_v17 = vld [vmem:[#allocation6 + $0x1ba0] sm:$0xff] }
 0x227   :  { %2542 = vmatpush.msrb.mxu1 %v793_v53  ;;  %2486 = vmatpush.msra.mxu2 %v377_v54  ;;  %v1385_v18 = vld [vmem:[#allocation6 + $0x1fa0] sm:$0xff] }
 0x228   :  { %2506 = vmatpush.msra.mxu3 %v505_v55  ;;  %2523 = vmatpush.msrb.mxu0 %v657_v57  ;;  %v969_v19 = vld [vmem:[#allocation6 + $0x12a0] sm:$0xff] }
 0x229   :  { %2543 = vmatpush.msrb.mxu1 %v785_v58  ;;  %2487 = vmatmul.f32.vlgmr.msra.gmra.mxu2 %v4194_v28  ;;  %v1097_v20 = vld [vmem:[#allocation6 + $0x16a0] sm:$0xff] }
 0x22a   :  { %2507 = vmatmul.f32.vlgmr.msra.gmra.mxu3 %v4196_v29  ;;  %2551 = vmatpush.msrb.mxu2 %v1009_v60  ;;  %v1249_v21 = vld [vmem:[#allocation6 + $0x1b60] sm:$0xff] }
 0x22b   :  { %2571 = vmatpush.msrb.mxu3 %v1137_v61  ;;  %2524 = vmatpush.msrb.mxu0 %v649_v62  ;;  %v1377_v23 = vld [vmem:[#allocation6 + $0x1f60] sm:$0xff] }
 0x22c   :  { %2544 = vmatpush.msrb.mxu1 %v777_v0  ;;  %2552 = vmatpush.msrb.mxu2 %v1001_v1  ;;  %v961_v24 = vld [vmem:[#allocation6 + $0x1260] sm:$0xff] }
 0x22d   :  { %2572 = vmatpush.msrb.mxu3 %v1129_v2  ;;  %2525 = vmatpush.msrb.mxu0 %v641_v3  ;;  %v1089_v25 = vld [vmem:[#allocation6 + $0x1660] sm:$0xff] }
 0x22e   :  { %2545 = vmatpush.msrb.mxu1 %v769_v4  ;;  %2553 = vmatpush.msrb.mxu2 %v993_v5  ;;  %v1241_v26 = vld [vmem:[#allocation6 + $0x1b20] sm:$0xff] }
 0x22f   :  { %2573 = vmatpush.msrb.mxu3 %v1121_v6  ;;  %2526 = vmatpush.msrb.mxu0 %v633_v7  ;;  %v1369_v27 = vld [vmem:[#allocation6 + $0x1f20] sm:$0xff] }
 0x230   :  { %2546 = vmatpush.msrb.mxu1 %v761_v9  ;;  %2527 = vmatmul.f32.vlgmr.msrb.gmra.mxu0 %v4204_v48  ;;  %v953_v30 = vld [vmem:[#allocation6 + $0x1220] sm:$0xff] }
 0x231   :  { %2547 = vmatmul.f32.vlgmr.msrb.gmra.mxu1 %v4206_v49  ;;  %2554 = vmatpush.msrb.mxu2 %v985_v10  ;;  %v1081_v31 = vld [vmem:[#allocation6 + $0x1620] sm:$0xff] }
 0x232   :  { %2574 = vmatpush.msrb.mxu3 %v1113_v11  ;;  %2591 = vmatpush.msra.mxu0 %v1265_v12  ;;  %v1233_v32 = vld [vmem:[#allocation6 + $0x1ae0] sm:$0xff] }
 0x233   :  { %2611 = vmatpush.msra.mxu1 %v1393_v13  ;;  %2555 = vmatpush.msrb.mxu2 %v977_v14  ;;  %v1361_v33 = vld [vmem:[#allocation6 + $0x1ee0] sm:$0xff] }
 0x234   :  { %2575 = vmatpush.msrb.mxu3 %v1105_v15  ;;  %2592 = vmatpush.msra.mxu0 %v1257_v17  ;;  %v945_v34 = vld [vmem:[#allocation6 + $0x11e0] sm:$0xff] }
 0x235   :  { %2612 = vmatpush.msra.mxu1 %v1385_v18  ;;  %2556 = vmatpush.msrb.mxu2 %v969_v19  ;;  %v1073_v35 = vld [vmem:[#allocation6 + $0x15e0] sm:$0xff] }
 0x236   :  { %2576 = vmatpush.msrb.mxu3 %v1097_v20  ;;  %2593 = vmatpush.msra.mxu0 %v1249_v21  ;;  %v1225_v36 = vld [vmem:[#allocation6 + $0x1aa0] sm:$0xff] }
 0x237   :  { %2613 = vmatpush.msra.mxu1 %v1377_v23  ;;  %2557 = vmatpush.msrb.mxu2 %v961_v24  ;;  %v1353_v37 = vld [vmem:[#allocation6 + $0x1ea0] sm:$0xff] }
 0x238   :  { %2577 = vmatpush.msrb.mxu3 %v1089_v25  ;;  %2594 = vmatpush.msra.mxu0 %v1241_v26  ;;  %v937_v38 = vld [vmem:[#allocation6 + $0x11a0] sm:$0xff]  ;;  %v498_v25 = vld [vmem:[#allocation6 + $0x3e8] sm:$0xff] }
 0x239   :  { %2614 = vmatpush.msra.mxu1 %v1369_v27  ;;  %2558 = vmatpush.msrb.mxu2 %v953_v30  ;;  %v1065_v39 = vld [vmem:[#allocation6 + $0x15a0] sm:$0xff]  ;;  %v626_v26 = vld [vmem:[#allocation6 + $0x7e8] sm:$0xff] }
 0x23a   :  { %2578 = vmatpush.msrb.mxu3 %v1081_v31  ;;  %2595 = vmatpush.msra.mxu0 %v1233_v32  ;;  %v1217_v40 = vld [vmem:[#allocation6 + $0x1a60] sm:$0xff]  ;;  %v490_v31 = vld [vmem:[#allocation6 + $0x3a8] sm:$0xff] }
 0x23b   :  { %2615 = vmatpush.msra.mxu1 %v1361_v33  ;;  %2559 = vmatpush.msrb.mxu2 %v945_v34  ;;  %v1345_v41 = vld [vmem:[#allocation6 + $0x1e60] sm:$0xff]  ;;  %v618_v32 = vld [vmem:[#allocation6 + $0x7a8] sm:$0xff] }
 0x23c   :  { %2579 = vmatpush.msrb.mxu3 %v1073_v35  ;;  %2596 = vmatpush.msra.mxu0 %v1225_v36  ;;  %v929_v42 = vld [vmem:[#allocation6 + $0x1160] sm:$0xff]  ;;  %v482_v35 = vld [vmem:[#allocation6 + $0x368] sm:$0xff] }
 0x23d   :  { %2616 = vmatpush.msra.mxu1 %v1353_v37  ;;  %v1057_v43 = vld [vmem:[#allocation6 + $0x1560] sm:$0xff]  ;;  %2560 = vmatpush.msrb.mxu2 %v937_v38  ;;  %v610_v36 = vld [vmem:[#allocation6 + $0x768] sm:$0xff] }
 0x23e   :  { %2580 = vmatpush.msrb.mxu3 %v1065_v39  ;;  %v1209_v44 = vld [vmem:[#allocation6 + $0x1a20] sm:$0xff]  ;;  %2597 = vmatpush.msra.mxu0 %v1217_v40  ;;  %v474_v39 = vld [vmem:[#allocation6 + $0x328] sm:$0xff] }
 0x23f   :  { %v1337_v45 = vld [vmem:[#allocation6 + $0x1e20] sm:$0xff]  ;;  %2617 = vmatpush.msra.mxu1 %v1345_v41  ;;  %2561 = vmatpush.msrb.mxu2 %v929_v42  ;;  %v602_v40 = vld [vmem:[#allocation6 + $0x728] sm:$0xff] }
 0x240   :  { %v921_v46 = vld [vmem:[#allocation6 + $0x1120] sm:$0xff]  ;;  %2581 = vmatpush.msrb.mxu3 %v1057_v43  ;;  %2598 = vmatpush.msra.mxu0 %v1209_v44  ;;  %v466_v43 = vld [vmem:[#allocation6 + $0x2e8] sm:$0xff] }
 0x241   :  { %v1049_v47 = vld [vmem:[#allocation6 + $0x1520] sm:$0xff]  ;;  %2618 = vmatpush.msra.mxu1 %v1337_v45  ;;  %2562 = vmatpush.msrb.mxu2 %v921_v46  ;;  %v594_v44 = vld [vmem:[#allocation6 + $0x6e8] sm:$0xff] }
 0x242   :  { %v1201_v50 = vld [vmem:[#allocation6 + $0x19e0] sm:$0xff]  ;;  %2582 = vmatpush.msrb.mxu3 %v1049_v47  ;;  %v458_v47 = vld [vmem:[#allocation6 + $0x2a8] sm:$0xff] }
 0x243   :  { %v1329_v51 = vld [vmem:[#allocation6 + $0x1de0] sm:$0xff]  ;;  %2599 = vmatpush.msra.mxu0 %v1201_v50  ;;  %v586_v50 = vld [vmem:[#allocation6 + $0x6a8] sm:$0xff] }
 0x244   :  { %v913_v53 = vld [vmem:[#allocation6 + $0x10e0] sm:$0xff]  ;;  %2619 = vmatpush.msra.mxu1 %v1329_v51 }
 0x245   :  { %v1041_v54 = vld [vmem:[#allocation6 + $0x14e0] sm:$0xff]  ;;  %2563 = vmatpush.msrb.mxu2 %v913_v53 }
 0x246   :  { %v1193_v55 = vld [vmem:[#allocation6 + $0x19a0] sm:$0xff]  ;;  %2583 = vmatpush.msrb.mxu3 %v1041_v54  ;;  %v450_v54 = vld [vmem:[#allocation6 + $0x268] sm:$0xff] }
 0x247   :  { %v1321_v57 = vld [vmem:[#allocation6 + $0x1da0] sm:$0xff]  ;;  %2600 = vmatpush.msra.mxu0 %v1193_v55  ;;  %v578_v55 = vld [vmem:[#allocation6 + $0x668] sm:$0xff] }
 0x248   :  { %v905_v58 = vld [vmem:[#allocation6 + $0x10a0] sm:$0xff]  ;;  %2620 = vmatpush.msra.mxu1 %v1321_v57 }
 0x249   :  { %v1033_v60 = vld [vmem:[#allocation6 + $0x14a0] sm:$0xff]  ;;  %2564 = vmatpush.msrb.mxu2 %v905_v58 }
 0x24a   :  { %v1185_v61 = vld [vmem:[#allocation6 + $0x1960] sm:$0xff]  ;;  %2584 = vmatpush.msrb.mxu3 %v1033_v60  ;;  %v442_v60 = vld [vmem:[#allocation6 + $0x228] sm:$0xff] }
 0x24b   :  { %v1313_v62 = vld [vmem:[#allocation6 + $0x1d60] sm:$0xff]  ;;  %2601 = vmatpush.msra.mxu0 %v1185_v61  ;;  %v570_v61 = vld [vmem:[#allocation6 + $0x628] sm:$0xff] }
 0x24c   :  { %v897_v0 = vld [vmem:[#allocation6 + $0x1060] sm:$0xff]  ;;  %2621 = vmatpush.msra.mxu1 %v1313_v62 }
 0x24d   :  { %v1025_v1 = vld [vmem:[#allocation6 + $0x1460] sm:$0xff]  ;;  %2565 = vmatpush.msrb.mxu2 %v897_v0 }
 0x24e   :  { %v1177_v2 = vld [vmem:[#allocation6 + $0x1920] sm:$0xff]  ;;  %2585 = vmatpush.msrb.mxu3 %v1025_v1  ;;  %v434_v1 = vld [vmem:[#allocation6 + $0x1e8] sm:$0xff] }
 0x24f   :  { %v1305_v3 = vld [vmem:[#allocation6 + $0x1d20] sm:$0xff]  ;;  %2602 = vmatpush.msra.mxu0 %v1177_v2  ;;  %v562_v2 = vld [vmem:[#allocation6 + $0x5e8] sm:$0xff] }
 0x250   :  { %v889_v4 = vld [vmem:[#allocation6 + $0x1020] sm:$0xff]  ;;  %2622 = vmatpush.msra.mxu1 %v1305_v3 }
 0x251   :  { %v1017_v5 = vld [vmem:[#allocation6 + $0x1420] sm:$0xff]  ;;  %2566 = vmatpush.msrb.mxu2 %v889_v4 }
 0x252   :  { %v1169_v6 = vld [vmem:[#allocation6 + $0x18e0] sm:$0xff]  ;;  %2586 = vmatpush.msrb.mxu3 %v1017_v5  ;;  %2567 = vmatmul.f32.vlgmr.msrb.gmra.mxu2 %v4208_v52  ;;  %v426_v5 = vld [vmem:[#allocation6 + $0x1a8] sm:$0xff] }
 0x253   :  { %v1297_v7 = vld [vmem:[#allocation6 + $0x1ce0] sm:$0xff]  ;;  %2603 = vmatpush.msra.mxu0 %v1169_v6  ;;  %2587 = vmatmul.f32.vlgmr.msrb.gmra.mxu3 %v4212_v56  ;;  %v554_v6 = vld [vmem:[#allocation6 + $0x5a8] sm:$0xff] }
 0x254   :  { %v1521_v9 = vld [vmem:[#allocation6 + $0x23e0] sm:$0xff]  ;;  %2623 = vmatpush.msra.mxu1 %v1297_v7 }
 0x255   :  { %v1649_v10 = vld [vmem:[#allocation6 + $0x27e0] sm:$0xff]  ;;  %2631 = vmatpush.msra.mxu2 %v1521_v9 }
 0x256   :  { %v1161_v11 = vld [vmem:[#allocation6 + $0x18a0] sm:$0xff]  ;;  %2651 = vmatpush.msra.mxu3 %v1649_v10  ;;  %v418_v10 = vld [vmem:[#allocation6 + $0x168] sm:$0xff] }
 0x257   :  { %v1289_v12 = vld [vmem:[#allocation6 + $0x1ca0] sm:$0xff]  ;;  %2604 = vmatpush.msra.mxu0 %v1161_v11  ;;  %v546_v11 = vld [vmem:[#allocation6 + $0x568] sm:$0xff] }
 0x258   :  { %v1513_v13 = vld [vmem:[#allocation6 + $0x23a0] sm:$0xff]  ;;  %2624 = vmatpush.msra.mxu1 %v1289_v12 }
 0x259   :  { %v1641_v14 = vld [vmem:[#allocation6 + $0x27a0] sm:$0xff]  ;;  %2632 = vmatpush.msra.mxu2 %v1513_v13 }
 0x25a   :  { %v1153_v15 = vld [vmem:[#allocation6 + $0x1860] sm:$0xff]  ;;  %2652 = vmatpush.msra.mxu3 %v1641_v14  ;;  %v410_v14 = vld [vmem:[#allocation6 + $0x128] sm:$0xff] }
 0x25b   :  { %v1281_v17 = vld [vmem:[#allocation6 + $0x1c60] sm:$0xff]  ;;  %2605 = vmatpush.msra.mxu0 %v1153_v15  ;;  %v538_v15 = vld [vmem:[#allocation6 + $0x528] sm:$0xff] }
 0x25c   :  { %v1505_v18 = vld [vmem:[#allocation6 + $0x2360] sm:$0xff]  ;;  %2625 = vmatpush.msra.mxu1 %v1281_v17 }
 0x25d   :  { %v1633_v19 = vld [vmem:[#allocation6 + $0x2760] sm:$0xff]  ;;  %2633 = vmatpush.msra.mxu2 %v1505_v18 }
 0x25e   :  { %v1145_v20 = vld [vmem:[#allocation6 + $0x1820] sm:$0xff]  ;;  %2653 = vmatpush.msra.mxu3 %v1633_v19  ;;  %v402_v19 = vld [vmem:[#allocation6 + $0xe8] sm:$0xff] }
 0x25f   :  { %v1273_v21 = vld [vmem:[#allocation6 + $0x1c20] sm:$0xff]  ;;  %2606 = vmatpush.msra.mxu0 %v1145_v20  ;;  %v530_v20 = vld [vmem:[#allocation6 + $0x4e8] sm:$0xff] }
 0x260   :  { %v1497_v23 = vld [vmem:[#allocation6 + $0x2320] sm:$0xff]  ;;  %2626 = vmatpush.msra.mxu1 %v1273_v21  ;;  %2607 = vmatmul.f32.vlgmr.msra.gmra.mxu0 %v4218_v16  ;;  %v754_v21 = vld [vmem:[#allocation6 + $0xbe8] sm:$0xff] }
 0x261   :  { %v1625_v24 = vld [vmem:[#allocation6 + $0x2720] sm:$0xff]  ;;  %2627 = vmatmul.f32.vlgmr.msra.gmra.mxu1 %v4220_v22  ;;  %2634 = vmatpush.msra.mxu2 %v1497_v23  ;;  %v882_v23 = vld [vmem:[#allocation6 + $0xfe8] sm:$0xff] }
 0x262   :  { %v1489_v27 = vld [vmem:[#allocation6 + $0x22e0] sm:$0xff]  ;;  %2654 = vmatpush.msra.mxu3 %v1625_v24  ;;  %2671 = vmatpush.msrb.mxu0 %v498_v25  ;;  %v394_v24 = vld [vmem:[#allocation6 + $0xa8] sm:$0xff] }
 0x263   :  { %v1617_v30 = vld [vmem:[#allocation6 + $0x26e0] sm:$0xff]  ;;  %2691 = vmatpush.msrb.mxu1 %v626_v26  ;;  %2635 = vmatpush.msra.mxu2 %v1489_v27  ;;  %v522_v25 = vld [vmem:[#allocation6 + $0x4a8] sm:$0xff] }
 0x264   :  { %v1481_v33 = vld [vmem:[#allocation6 + $0x22a0] sm:$0xff]  ;;  %2655 = vmatpush.msra.mxu3 %v1617_v30  ;;  %2672 = vmatpush.msrb.mxu0 %v490_v31  ;;  %v746_v26 = vld [vmem:[#allocation6 + $0xba8] sm:$0xff] }
 0x265   :  { %v1609_v34 = vld [vmem:[#allocation6 + $0x26a0] sm:$0xff]  ;;  %2692 = vmatpush.msrb.mxu1 %v618_v32  ;;  %2636 = vmatpush.msra.mxu2 %v1481_v33  ;;  %v874_v27 = vld [vmem:[#allocation6 + $0xfa8] sm:$0xff] }
 0x266   :  { %v1473_v37 = vld [vmem:[#allocation6 + $0x2260] sm:$0xff]  ;;  %2656 = vmatpush.msra.mxu3 %v1609_v34  ;;  %2673 = vmatpush.msrb.mxu0 %v482_v35  ;;  %v386_v30 = vld [vmem:[#allocation6 + $0x68] sm:$0xff] }
 0x267   :  { %v1601_v38 = vld [vmem:[#allocation6 + $0x2660] sm:$0xff]  ;;  %2693 = vmatpush.msrb.mxu1 %v610_v36  ;;  %2637 = vmatpush.msra.mxu2 %v1473_v37  ;;  %v514_v31 = vld [vmem:[#allocation6 + $0x468] sm:$0xff] }
 0x268   :  { %v1465_v41 = vld [vmem:[#allocation6 + $0x2220] sm:$0xff]  ;;  %2657 = vmatpush.msra.mxu3 %v1601_v38  ;;  %2674 = vmatpush.msrb.mxu0 %v474_v39  ;;  %v738_v32 = vld [vmem:[#allocation6 + $0xb68] sm:$0xff] }
 0x269   :  { %v1593_v42 = vld [vmem:[#allocation6 + $0x2620] sm:$0xff]  ;;  %2694 = vmatpush.msrb.mxu1 %v602_v40  ;;  %2638 = vmatpush.msra.mxu2 %v1465_v41  ;;  %v866_v33 = vld [vmem:[#allocation6 + $0xf68] sm:$0xff] }
 0x26a   :  { %v1457_v45 = vld [vmem:[#allocation6 + $0x21e0] sm:$0xff]  ;;  %2658 = vmatpush.msra.mxu3 %v1593_v42  ;;  %2675 = vmatpush.msrb.mxu0 %v466_v43  ;;  %v378_v34 = vld [vmem:[#allocation6 + $0x28] sm:$0xff] }
 0x26b   :  { %v1585_v46 = vld [vmem:[#allocation6 + $0x25e0] sm:$0xff]  ;;  %2695 = vmatpush.msrb.mxu1 %v594_v44  ;;  %2639 = vmatpush.msra.mxu2 %v1457_v45  ;;  %v506_v35 = vld [vmem:[#allocation6 + $0x428] sm:$0xff] }
 0x26c   :  { %v1449_v51 = vld [vmem:[#allocation6 + $0x21a0] sm:$0xff]  ;;  %2659 = vmatpush.msra.mxu3 %v1585_v46  ;;  %2676 = vmatpush.msrb.mxu0 %v458_v47  ;;  %v730_v36 = vld [vmem:[#allocation6 + $0xb28] sm:$0xff] }
 0x26d   :  { %v1577_v53 = vld [vmem:[#allocation6 + $0x25a0] sm:$0xff]  ;;  %2696 = vmatpush.msrb.mxu1 %v586_v50  ;;  %2640 = vmatpush.msra.mxu2 %v1449_v51  ;;  %v858_v37 = vld [vmem:[#allocation6 + $0xf28] sm:$0xff] }
 0x26e   :  { %v1441_v57 = vld [vmem:[#allocation6 + $0x2160] sm:$0xff]  ;;  %2660 = vmatpush.msra.mxu3 %v1577_v53  ;;  %2677 = vmatpush.msrb.mxu0 %v450_v54  ;;  %v1010_v38 = vld [vmem:[#allocation6 + $0x13e8] sm:$0xff] }
 0x26f   :  { %v1569_v58 = vld [vmem:[#allocation6 + $0x2560] sm:$0xff]  ;;  %2697 = vmatpush.msrb.mxu1 %v578_v55  ;;  %2641 = vmatpush.msra.mxu2 %v1441_v57  ;;  %v1138_v39 = vld [vmem:[#allocation6 + $0x17e8] sm:$0xff] }
 0x270   :  { %v1433_v62 = vld [vmem:[#allocation6 + $0x2120] sm:$0xff]  ;;  %2661 = vmatpush.msra.mxu3 %v1569_v58  ;;  %2678 = vmatpush.msrb.mxu0 %v442_v60  ;;  %v722_v40 = vld [vmem:[#allocation6 + $0xae8] sm:$0xff] }
 0x271   :  { %v1561_v0 = vld [vmem:[#allocation6 + $0x2520] sm:$0xff]  ;;  %2698 = vmatpush.msrb.mxu1 %v570_v61  ;;  %2642 = vmatpush.msra.mxu2 %v1433_v62  ;;  %v850_v41 = vld [vmem:[#allocation6 + $0xee8] sm:$0xff] }
 0x272   :  { %v1425_v3 = vld [vmem:[#allocation6 + $0x20e0] sm:$0xff]  ;;  %2662 = vmatpush.msra.mxu3 %v1561_v0  ;;  %2679 = vmatpush.msrb.mxu0 %v434_v1  ;;  %v1002_v42 = vld [vmem:[#allocation6 + $0x13a8] sm:$0xff] }
 0x273   :  { %v1553_v4 = vld [vmem:[#allocation6 + $0x24e0] sm:$0xff]  ;;  %2699 = vmatpush.msrb.mxu1 %v562_v2  ;;  %2643 = vmatpush.msra.mxu2 %v1425_v3  ;;  %v1130_v43 = vld [vmem:[#allocation6 + $0x17a8] sm:$0xff] }
 0x274   :  { %v1417_v7 = vld [vmem:[#allocation6 + $0x20a0] sm:$0xff]  ;;  %2663 = vmatpush.msra.mxu3 %v1553_v4  ;;  %2680 = vmatpush.msrb.mxu0 %v426_v5  ;;  %v714_v44 = vld [vmem:[#allocation6 + $0xaa8] sm:$0xff] }
 0x275   :  { %v1545_v9 = vld [vmem:[#allocation6 + $0x24a0] sm:$0xff]  ;;  %2700 = vmatpush.msrb.mxu1 %v554_v6  ;;  %2644 = vmatpush.msra.mxu2 %v1417_v7  ;;  %v842_v45 = vld [vmem:[#allocation6 + $0xea8] sm:$0xff] }
 0x276   :  { %v1409_v12 = vld [vmem:[#allocation6 + $0x2060] sm:$0xff]  ;;  %2664 = vmatpush.msra.mxu3 %v1545_v9  ;;  %2681 = vmatpush.msrb.mxu0 %v418_v10  ;;  %v994_v46 = vld [vmem:[#allocation6 + $0x1368] sm:$0xff] }
 0x277   :  { %v1537_v13 = vld [vmem:[#allocation6 + $0x2460] sm:$0xff]  ;;  %2701 = vmatpush.msrb.mxu1 %v546_v11  ;;  %2645 = vmatpush.msra.mxu2 %v1409_v12  ;;  %v1122_v47 = vld [vmem:[#allocation6 + $0x1768] sm:$0xff] }
 0x278   :  { %v1401_v17 = vld [vmem:[#allocation6 + $0x2020] sm:$0xff]  ;;  %2665 = vmatpush.msra.mxu3 %v1537_v13  ;;  %2682 = vmatpush.msrb.mxu0 %v410_v14  ;;  %v706_v50 = vld [vmem:[#allocation6 + $0xa68] sm:$0xff] }
 0x279   :  { %v1529_v18 = vld [vmem:[#allocation6 + $0x2420] sm:$0xff]  ;;  %2702 = vmatpush.msrb.mxu1 %v538_v15  ;;  %2646 = vmatpush.msra.mxu2 %v1401_v17  ;;  %v834_v51 = vld [vmem:[#allocation6 + $0xe68] sm:$0xff] }
 0x27a   :  { %2666 = vmatpush.msra.mxu3 %v1529_v18  ;;  %2683 = vmatpush.msrb.mxu0 %v402_v19  ;;  %v986_v53 = vld [vmem:[#allocation6 + $0x1328] sm:$0xff] }
 0x27b   :  { %2703 = vmatpush.msrb.mxu1 %v530_v20  ;;  %2647 = vmatmul.f32.vlgmr.msra.gmra.mxu2 %v4224_v59  ;;  %v1114_v54 = vld [vmem:[#allocation6 + $0x1728] sm:$0xff] }
 0x27c   :  { %2667 = vmatmul.f32.vlgmr.msra.gmra.mxu3 %v4226_v63  ;;  %2711 = vmatpush.msrb.mxu2 %v754_v21  ;;  %v698_v55 = vld [vmem:[#allocation6 + $0xa28] sm:$0xff] }
 0x27d   :  { %2731 = vmatpush.msrb.mxu3 %v882_v23  ;;  %2684 = vmatpush.msrb.mxu0 %v394_v24  ;;  %v826_v57 = vld [vmem:[#allocation6 + $0xe28] sm:$0xff] }
 0x27e   :  { %2704 = vmatpush.msrb.mxu1 %v522_v25  ;;  %2712 = vmatpush.msrb.mxu2 %v746_v26  ;;  %v978_v58 = vld [vmem:[#allocation6 + $0x12e8] sm:$0xff] }
 0x27f   :  { %2732 = vmatpush.msrb.mxu3 %v874_v27  ;;  %2685 = vmatpush.msrb.mxu0 %v386_v30  ;;  %v1106_v60 = vld [vmem:[#allocation6 + $0x16e8] sm:$0xff] }
 0x280   :  { %2705 = vmatpush.msrb.mxu1 %v514_v31  ;;  %2713 = vmatpush.msrb.mxu2 %v738_v32  ;;  %v690_v61 = vld [vmem:[#allocation6 + $0x9e8] sm:$0xff] }
 0x281   :  { %2733 = vmatpush.msrb.mxu3 %v866_v33  ;;  %2686 = vmatpush.msrb.mxu0 %v378_v34  ;;  %v818_v62 = vld [vmem:[#allocation6 + $0xde8] sm:$0xff] }
 0x282   :  { %2706 = vmatpush.msrb.mxu1 %v506_v35  ;;  %2687 = vmatmul.f32.vlgmr.msrb.gmra.mxu0 %v4194_v28  ;;  %v970_v0 = vld [vmem:[#allocation6 + $0x12a8] sm:$0xff] }
 0x283   :  { %2707 = vmatmul.f32.vlgmr.msrb.gmra.mxu1 %v4196_v29  ;;  %2714 = vmatpush.msrb.mxu2 %v730_v36  ;;  %v1098_v1 = vld [vmem:[#allocation6 + $0x16a8] sm:$0xff] }
 0x284   :  { %2734 = vmatpush.msrb.mxu3 %v858_v37  ;;  %2751 = vmatpush.msra.mxu0 %v1010_v38  ;;  %v682_v2 = vld [vmem:[#allocation6 + $0x9a8] sm:$0xff] }
 0x285   :  { %2771 = vmatpush.msra.mxu1 %v1138_v39  ;;  %2715 = vmatpush.msrb.mxu2 %v722_v40  ;;  %v810_v3 = vld [vmem:[#allocation6 + $0xda8] sm:$0xff] }
 0x286   :  { %2735 = vmatpush.msrb.mxu3 %v850_v41  ;;  %2752 = vmatpush.msra.mxu0 %v1002_v42  ;;  %v962_v4 = vld [vmem:[#allocation6 + $0x1268] sm:$0xff] }
 0x287   :  { %2772 = vmatpush.msra.mxu1 %v1130_v43  ;;  %2716 = vmatpush.msrb.mxu2 %v714_v44  ;;  %v1090_v5 = vld [vmem:[#allocation6 + $0x1668] sm:$0xff] }
 0x288   :  { %2736 = vmatpush.msrb.mxu3 %v842_v45  ;;  %2753 = vmatpush.msra.mxu0 %v994_v46  ;;  %v674_v6 = vld [vmem:[#allocation6 + $0x968] sm:$0xff] }
 0x289   :  { %2773 = vmatpush.msra.mxu1 %v1122_v47  ;;  %2717 = vmatpush.msrb.mxu2 %v706_v50  ;;  %v802_v7 = vld [vmem:[#allocation6 + $0xd68] sm:$0xff] }
 0x28a   :  { %2737 = vmatpush.msrb.mxu3 %v834_v51  ;;  %2754 = vmatpush.msra.mxu0 %v986_v53  ;;  %v954_v9 = vld [vmem:[#allocation6 + $0x1228] sm:$0xff] }
 0x28b   :  { %2774 = vmatpush.msra.mxu1 %v1114_v54  ;;  %2718 = vmatpush.msrb.mxu2 %v698_v55  ;;  %v1082_v10 = vld [vmem:[#allocation6 + $0x1628] sm:$0xff] }
 0x28c   :  { %2738 = vmatpush.msrb.mxu3 %v826_v57  ;;  %2755 = vmatpush.msra.mxu0 %v978_v58  ;;  %v666_v11 = vld [vmem:[#allocation6 + $0x928] sm:$0xff] }
 0x28d   :  { %2775 = vmatpush.msra.mxu1 %v1106_v60  ;;  %2719 = vmatpush.msrb.mxu2 %v690_v61  ;;  %v794_v12 = vld [vmem:[#allocation6 + $0xd28] sm:$0xff] }
 0x28e   :  { %2739 = vmatpush.msrb.mxu3 %v818_v62  ;;  %2756 = vmatpush.msra.mxu0 %v970_v0  ;;  %v946_v13 = vld [vmem:[#allocation6 + $0x11e8] sm:$0xff] }
 0x28f   :  { %2776 = vmatpush.msra.mxu1 %v1098_v1  ;;  %2720 = vmatpush.msrb.mxu2 %v682_v2  ;;  %v1074_v14 = vld [vmem:[#allocation6 + $0x15e8] sm:$0xff] }
 0x290   :  { %2740 = vmatpush.msrb.mxu3 %v810_v3  ;;  %2757 = vmatpush.msra.mxu0 %v962_v4  ;;  %v658_v15 = vld [vmem:[#allocation6 + $0x8e8] sm:$0xff] }
 0x291   :  { %2777 = vmatpush.msra.mxu1 %v1090_v5  ;;  %2721 = vmatpush.msrb.mxu2 %v674_v6  ;;  %v786_v17 = vld [vmem:[#allocation6 + $0xce8] sm:$0xff] }
 0x292   :  { %2741 = vmatpush.msrb.mxu3 %v802_v7  ;;  %2758 = vmatpush.msra.mxu0 %v954_v9  ;;  %v938_v18 = vld [vmem:[#allocation6 + $0x11a8] sm:$0xff] }
 0x293   :  { %2778 = vmatpush.msra.mxu1 %v1082_v10  ;;  %2722 = vmatpush.msrb.mxu2 %v666_v11  ;;  %v1066_v19 = vld [vmem:[#allocation6 + $0x15a8] sm:$0xff] }
 0x294   :  { %2742 = vmatpush.msrb.mxu3 %v794_v12  ;;  %2759 = vmatpush.msra.mxu0 %v946_v13  ;;  %v650_v20 = vld [vmem:[#allocation6 + $0x8a8] sm:$0xff] }
 0x295   :  { %2779 = vmatpush.msra.mxu1 %v1074_v14  ;;  %v778_v21 = vld [vmem:[#allocation6 + $0xca8] sm:$0xff]  ;;  %2723 = vmatpush.msrb.mxu2 %v658_v15 }
 0x296   :  { %2743 = vmatpush.msrb.mxu3 %v786_v17  ;;  %v930_v23 = vld [vmem:[#allocation6 + $0x1168] sm:$0xff]  ;;  %2760 = vmatpush.msra.mxu0 %v938_v18 }
 0x297   :  { %v1058_v24 = vld [vmem:[#allocation6 + $0x1568] sm:$0xff]  ;;  %2780 = vmatpush.msra.mxu1 %v1066_v19  ;;  %2724 = vmatpush.msrb.mxu2 %v650_v20 }
 0x298   :  { %v642_v25 = vld [vmem:[#allocation6 + $0x868] sm:$0xff]  ;;  %2744 = vmatpush.msrb.mxu3 %v778_v21  ;;  %2761 = vmatpush.msra.mxu0 %v930_v23 }
 0x299   :  { %v770_v26 = vld [vmem:[#allocation6 + $0xc68] sm:$0xff]  ;;  %2781 = vmatpush.msra.mxu1 %v1058_v24  ;;  %2725 = vmatpush.msrb.mxu2 %v642_v25 }
 0x29a   :  { %v922_v27 = vld [vmem:[#allocation6 + $0x1128] sm:$0xff]  ;;  %2745 = vmatpush.msrb.mxu3 %v770_v26 }
 0x29b   :  { %v1050_v30 = vld [vmem:[#allocation6 + $0x1528] sm:$0xff]  ;;  %2762 = vmatpush.msra.mxu0 %v922_v27 }
 0x29c   :  { %v634_v31 = vld [vmem:[#allocation6 + $0x828] sm:$0xff]  ;;  %2782 = vmatpush.msra.mxu1 %v1050_v30 }
 0x29d   :  { %v762_v32 = vld [vmem:[#allocation6 + $0xc28] sm:$0xff]  ;;  %2726 = vmatpush.msrb.mxu2 %v634_v31 }
 0x29e   :  { %v914_v33 = vld [vmem:[#allocation6 + $0x10e8] sm:$0xff]  ;;  %2746 = vmatpush.msrb.mxu3 %v762_v32  ;;  %2727 = vmatmul.f32.vlgmr.msrb.gmra.mxu2 %v4204_v48 }
 0x29f   :  { %v1042_v34 = vld [vmem:[#allocation6 + $0x14e8] sm:$0xff]  ;;  %2763 = vmatpush.msra.mxu0 %v914_v33  ;;  %2747 = vmatmul.f32.vlgmr.msrb.gmra.mxu3 %v4206_v49 }
 0x2a0   :  { %v1266_v35 = vld [vmem:[#allocation6 + $0x1be8] sm:$0xff]  ;;  %2783 = vmatpush.msra.mxu1 %v1042_v34 }
 0x2a1   :  { %v1394_v36 = vld [vmem:[#allocation6 + $0x1fe8] sm:$0xff]  ;;  %2791 = vmatpush.msra.mxu2 %v1266_v35 }
 0x2a2   :  { %v906_v37 = vld [vmem:[#allocation6 + $0x10a8] sm:$0xff]  ;;  %2811 = vmatpush.msra.mxu3 %v1394_v36 }
 0x2a3   :  { %v1034_v38 = vld [vmem:[#allocation6 + $0x14a8] sm:$0xff]  ;;  %2764 = vmatpush.msra.mxu0 %v906_v37 }
 0x2a4   :  { %v1258_v39 = vld [vmem:[#allocation6 + $0x1ba8] sm:$0xff]  ;;  %2784 = vmatpush.msra.mxu1 %v1034_v38 }
 0x2a5   :  { %v1386_v40 = vld [vmem:[#allocation6 + $0x1fa8] sm:$0xff]  ;;  %2792 = vmatpush.msra.mxu2 %v1258_v39 }
 0x2a6   :  { %v898_v41 = vld [vmem:[#allocation6 + $0x1068] sm:$0xff]  ;;  %2812 = vmatpush.msra.mxu3 %v1386_v40 }
 0x2a7   :  { %v1026_v42 = vld [vmem:[#allocation6 + $0x1468] sm:$0xff]  ;;  %2765 = vmatpush.msra.mxu0 %v898_v41 }
 0x2a8   :  { %v1250_v43 = vld [vmem:[#allocation6 + $0x1b68] sm:$0xff]  ;;  %2785 = vmatpush.msra.mxu1 %v1026_v42 }
 0x2a9   :  { %v1378_v44 = vld [vmem:[#allocation6 + $0x1f68] sm:$0xff]  ;;  %2793 = vmatpush.msra.mxu2 %v1250_v43 }
 0x2aa   :  { %v890_v45 = vld [vmem:[#allocation6 + $0x1028] sm:$0xff]  ;;  %2813 = vmatpush.msra.mxu3 %v1378_v44 }
 0x2ab   :  { %v1018_v46 = vld [vmem:[#allocation6 + $0x1428] sm:$0xff]  ;;  %2766 = vmatpush.msra.mxu0 %v890_v45 }
 0x2ac   :  { %v1242_v47 = vld [vmem:[#allocation6 + $0x1b28] sm:$0xff]  ;;  %2786 = vmatpush.msra.mxu1 %v1018_v46  ;;  %2767 = vmatmul.f32.vlgmr.msra.gmra.mxu0 %v4208_v52  ;;  %v499_v46 = vld [vmem:[#allocation6 + $0x3f0] sm:$0xff] }
 0x2ad   :  { %v1370_v50 = vld [vmem:[#allocation6 + $0x1f28] sm:$0xff]  ;;  %2787 = vmatmul.f32.vlgmr.msra.gmra.mxu1 %v4212_v56  ;;  %2794 = vmatpush.msra.mxu2 %v1242_v47  ;;  %v627_v47 = vld [vmem:[#allocation6 + $0x7f0] sm:$0xff] }
 0x2ae   :  { %v1522_v51 = vld [vmem:[#allocation6 + $0x23e8] sm:$0xff]  ;;  %2814 = vmatpush.msra.mxu3 %v1370_v50 }
 0x2af   :  { %v1650_v53 = vld [vmem:[#allocation6 + $0x27e8] sm:$0xff]  ;;  %2831 = vmatpush.msrb.mxu0 %v1522_v51 }
 0x2b0   :  { %v1234_v54 = vld [vmem:[#allocation6 + $0x1ae8] sm:$0xff]  ;;  %2851 = vmatpush.msrb.mxu1 %v1650_v53  ;;  %v491_v53 = vld [vmem:[#allocation6 + $0x3b0] sm:$0xff] }
 0x2b1   :  { %v1362_v55 = vld [vmem:[#allocation6 + $0x1ee8] sm:$0xff]  ;;  %2795 = vmatpush.msra.mxu2 %v1234_v54  ;;  %v619_v54 = vld [vmem:[#allocation6 + $0x7b0] sm:$0xff] }
 0x2b2   :  { %v1514_v57 = vld [vmem:[#allocation6 + $0x23a8] sm:$0xff]  ;;  %2815 = vmatpush.msra.mxu3 %v1362_v55 }
 0x2b3   :  { %v1642_v58 = vld [vmem:[#allocation6 + $0x27a8] sm:$0xff]  ;;  %2832 = vmatpush.msrb.mxu0 %v1514_v57 }
 0x2b4   :  { %v1226_v60 = vld [vmem:[#allocation6 + $0x1aa8] sm:$0xff]  ;;  %2852 = vmatpush.msrb.mxu1 %v1642_v58  ;;  %v483_v58 = vld [vmem:[#allocation6 + $0x370] sm:$0xff] }
 0x2b5   :  { %v1354_v61 = vld [vmem:[#allocation6 + $0x1ea8] sm:$0xff]  ;;  %2796 = vmatpush.msra.mxu2 %v1226_v60  ;;  %v611_v60 = vld [vmem:[#allocation6 + $0x770] sm:$0xff] }
 0x2b6   :  { %v1506_v62 = vld [vmem:[#allocation6 + $0x2368] sm:$0xff]  ;;  %2816 = vmatpush.msra.mxu3 %v1354_v61 }
 0x2b7   :  { %v1634_v0 = vld [vmem:[#allocation6 + $0x2768] sm:$0xff]  ;;  %2833 = vmatpush.msrb.mxu0 %v1506_v62 }
 0x2b8   :  { %v1218_v1 = vld [vmem:[#allocation6 + $0x1a68] sm:$0xff]  ;;  %2853 = vmatpush.msrb.mxu1 %v1634_v0  ;;  %v475_v0 = vld [vmem:[#allocation6 + $0x330] sm:$0xff] }
 0x2b9   :  { %v1346_v2 = vld [vmem:[#allocation6 + $0x1e68] sm:$0xff]  ;;  %2797 = vmatpush.msra.mxu2 %v1218_v1  ;;  %v603_v1 = vld [vmem:[#allocation6 + $0x730] sm:$0xff] }
 0x2ba   :  { %v1498_v3 = vld [vmem:[#allocation6 + $0x2328] sm:$0xff]  ;;  %2817 = vmatpush.msra.mxu3 %v1346_v2  ;;  %v755_v2 = vld [vmem:[#allocation6 + $0xbf0] sm:$0xff] }
 0x2bb   :  { %v1626_v4 = vld [vmem:[#allocation6 + $0x2728] sm:$0xff]  ;;  %2834 = vmatpush.msrb.mxu0 %v1498_v3  ;;  %v883_v3 = vld [vmem:[#allocation6 + $0xff0] sm:$0xff] }
 0x2bc   :  { %v1210_v5 = vld [vmem:[#allocation6 + $0x1a28] sm:$0xff]  ;;  %2854 = vmatpush.msrb.mxu1 %v1626_v4  ;;  %v467_v4 = vld [vmem:[#allocation6 + $0x2f0] sm:$0xff] }
 0x2bd   :  { %v1338_v6 = vld [vmem:[#allocation6 + $0x1e28] sm:$0xff]  ;;  %2798 = vmatpush.msra.mxu2 %v1210_v5  ;;  %v595_v5 = vld [vmem:[#allocation6 + $0x6f0] sm:$0xff] }
 0x2be   :  { %v1490_v7 = vld [vmem:[#allocation6 + $0x22e8] sm:$0xff]  ;;  %2818 = vmatpush.msra.mxu3 %v1338_v6  ;;  %v747_v6 = vld [vmem:[#allocation6 + $0xbb0] sm:$0xff] }
 0x2bf   :  { %v1618_v9 = vld [vmem:[#allocation6 + $0x26e8] sm:$0xff]  ;;  %2835 = vmatpush.msrb.mxu0 %v1490_v7  ;;  %v875_v7 = vld [vmem:[#allocation6 + $0xfb0] sm:$0xff] }
 0x2c0   :  { %v1202_v10 = vld [vmem:[#allocation6 + $0x19e8] sm:$0xff]  ;;  %2855 = vmatpush.msrb.mxu1 %v1618_v9  ;;  %v459_v9 = vld [vmem:[#allocation6 + $0x2b0] sm:$0xff] }
 0x2c1   :  { %v1330_v11 = vld [vmem:[#allocation6 + $0x1de8] sm:$0xff]  ;;  %2799 = vmatpush.msra.mxu2 %v1202_v10  ;;  %v587_v10 = vld [vmem:[#allocation6 + $0x6b0] sm:$0xff] }
 0x2c2   :  { %v1482_v12 = vld [vmem:[#allocation6 + $0x22a8] sm:$0xff]  ;;  %2819 = vmatpush.msra.mxu3 %v1330_v11  ;;  %v739_v11 = vld [vmem:[#allocation6 + $0xb70] sm:$0xff] }
 0x2c3   :  { %v1610_v13 = vld [vmem:[#allocation6 + $0x26a8] sm:$0xff]  ;;  %2836 = vmatpush.msrb.mxu0 %v1482_v12  ;;  %v867_v12 = vld [vmem:[#allocation6 + $0xf70] sm:$0xff] }
 0x2c4   :  { %v1194_v14 = vld [vmem:[#allocation6 + $0x19a8] sm:$0xff]  ;;  %2856 = vmatpush.msrb.mxu1 %v1610_v13  ;;  %v451_v13 = vld [vmem:[#allocation6 + $0x270] sm:$0xff] }
 0x2c5   :  { %v1322_v15 = vld [vmem:[#allocation6 + $0x1da8] sm:$0xff]  ;;  %2800 = vmatpush.msra.mxu2 %v1194_v14  ;;  %v579_v14 = vld [vmem:[#allocation6 + $0x670] sm:$0xff] }
 0x2c6   :  { %v1474_v17 = vld [vmem:[#allocation6 + $0x2268] sm:$0xff]  ;;  %2820 = vmatpush.msra.mxu3 %v1322_v15  ;;  %v731_v15 = vld [vmem:[#allocation6 + $0xb30] sm:$0xff] }
 0x2c7   :  { %v1602_v18 = vld [vmem:[#allocation6 + $0x2668] sm:$0xff]  ;;  %2837 = vmatpush.msrb.mxu0 %v1474_v17  ;;  %v859_v17 = vld [vmem:[#allocation6 + $0xf30] sm:$0xff] }
 0x2c8   :  { %v1186_v19 = vld [vmem:[#allocation6 + $0x1968] sm:$0xff]  ;;  %2857 = vmatpush.msrb.mxu1 %v1602_v18  ;;  %v443_v18 = vld [vmem:[#allocation6 + $0x230] sm:$0xff] }
 0x2c9   :  { %v1314_v20 = vld [vmem:[#allocation6 + $0x1d68] sm:$0xff]  ;;  %2801 = vmatpush.msra.mxu2 %v1186_v19  ;;  %v571_v19 = vld [vmem:[#allocation6 + $0x630] sm:$0xff] }
 0x2ca   :  { %v1466_v21 = vld [vmem:[#allocation6 + $0x2228] sm:$0xff]  ;;  %2821 = vmatpush.msra.mxu3 %v1314_v20  ;;  %v723_v20 = vld [vmem:[#allocation6 + $0xaf0] sm:$0xff] }
 0x2cb   :  { %v1594_v23 = vld [vmem:[#allocation6 + $0x2628] sm:$0xff]  ;;  %2838 = vmatpush.msrb.mxu0 %v1466_v21  ;;  %v851_v21 = vld [vmem:[#allocation6 + $0xef0] sm:$0xff] }
 0x2cc   :  { %v1178_v24 = vld [vmem:[#allocation6 + $0x1928] sm:$0xff]  ;;  %2858 = vmatpush.msrb.mxu1 %v1594_v23  ;;  %v435_v23 = vld [vmem:[#allocation6 + $0x1f0] sm:$0xff] }
 0x2cd   :  { %v1306_v25 = vld [vmem:[#allocation6 + $0x1d28] sm:$0xff]  ;;  %2802 = vmatpush.msra.mxu2 %v1178_v24  ;;  %v563_v24 = vld [vmem:[#allocation6 + $0x5f0] sm:$0xff] }
 0x2ce   :  { %v1458_v26 = vld [vmem:[#allocation6 + $0x21e8] sm:$0xff]  ;;  %2822 = vmatpush.msra.mxu3 %v1306_v25  ;;  %v715_v25 = vld [vmem:[#allocation6 + $0xab0] sm:$0xff] }
 0x2cf   :  { %v1586_v27 = vld [vmem:[#allocation6 + $0x25e8] sm:$0xff]  ;;  %2839 = vmatpush.msrb.mxu0 %v1458_v26  ;;  %v843_v26 = vld [vmem:[#allocation6 + $0xeb0] sm:$0xff] }
 0x2d0   :  { %v1170_v30 = vld [vmem:[#allocation6 + $0x18e8] sm:$0xff]  ;;  %2859 = vmatpush.msrb.mxu1 %v1586_v27  ;;  %v427_v27 = vld [vmem:[#allocation6 + $0x1b0] sm:$0xff] }
 0x2d1   :  { %v1298_v31 = vld [vmem:[#allocation6 + $0x1ce8] sm:$0xff]  ;;  %2803 = vmatpush.msra.mxu2 %v1170_v30  ;;  %v555_v30 = vld [vmem:[#allocation6 + $0x5b0] sm:$0xff] }
 0x2d2   :  { %v1450_v32 = vld [vmem:[#allocation6 + $0x21a8] sm:$0xff]  ;;  %2823 = vmatpush.msra.mxu3 %v1298_v31  ;;  %v707_v31 = vld [vmem:[#allocation6 + $0xa70] sm:$0xff] }
 0x2d3   :  { %v1578_v33 = vld [vmem:[#allocation6 + $0x25a8] sm:$0xff]  ;;  %2840 = vmatpush.msrb.mxu0 %v1450_v32  ;;  %v835_v32 = vld [vmem:[#allocation6 + $0xe70] sm:$0xff] }
 0x2d4   :  { %v1162_v34 = vld [vmem:[#allocation6 + $0x18a8] sm:$0xff]  ;;  %2860 = vmatpush.msrb.mxu1 %v1578_v33  ;;  %v419_v33 = vld [vmem:[#allocation6 + $0x170] sm:$0xff] }
 0x2d5   :  { %v1290_v35 = vld [vmem:[#allocation6 + $0x1ca8] sm:$0xff]  ;;  %2804 = vmatpush.msra.mxu2 %v1162_v34  ;;  %v547_v34 = vld [vmem:[#allocation6 + $0x570] sm:$0xff] }
 0x2d6   :  { %v1442_v36 = vld [vmem:[#allocation6 + $0x2168] sm:$0xff]  ;;  %2824 = vmatpush.msra.mxu3 %v1290_v35  ;;  %v699_v35 = vld [vmem:[#allocation6 + $0xa30] sm:$0xff] }
 0x2d7   :  { %v1570_v37 = vld [vmem:[#allocation6 + $0x2568] sm:$0xff]  ;;  %2841 = vmatpush.msrb.mxu0 %v1442_v36  ;;  %v827_v36 = vld [vmem:[#allocation6 + $0xe30] sm:$0xff] }
 0x2d8   :  { %v1154_v38 = vld [vmem:[#allocation6 + $0x1868] sm:$0xff]  ;;  %2861 = vmatpush.msrb.mxu1 %v1570_v37  ;;  %v411_v37 = vld [vmem:[#allocation6 + $0x130] sm:$0xff] }
 0x2d9   :  { %v1282_v39 = vld [vmem:[#allocation6 + $0x1c68] sm:$0xff]  ;;  %2805 = vmatpush.msra.mxu2 %v1154_v38  ;;  %v539_v38 = vld [vmem:[#allocation6 + $0x530] sm:$0xff] }
 0x2da   :  { %v1434_v40 = vld [vmem:[#allocation6 + $0x2128] sm:$0xff]  ;;  %2825 = vmatpush.msra.mxu3 %v1282_v39  ;;  %v691_v39 = vld [vmem:[#allocation6 + $0x9f0] sm:$0xff] }
 0x2db   :  { %v1562_v41 = vld [vmem:[#allocation6 + $0x2528] sm:$0xff]  ;;  %2842 = vmatpush.msrb.mxu0 %v1434_v40  ;;  %v819_v40 = vld [vmem:[#allocation6 + $0xdf0] sm:$0xff] }
 0x2dc   :  { %v1146_v42 = vld [vmem:[#allocation6 + $0x1828] sm:$0xff]  ;;  %2862 = vmatpush.msrb.mxu1 %v1562_v41  ;;  %v403_v41 = vld [vmem:[#allocation6 + $0xf0] sm:$0xff] }
 0x2dd   :  { %v1274_v43 = vld [vmem:[#allocation6 + $0x1c28] sm:$0xff]  ;;  %2806 = vmatpush.msra.mxu2 %v1146_v42  ;;  %v531_v42 = vld [vmem:[#allocation6 + $0x4f0] sm:$0xff] }
 0x2de   :  { %v1426_v44 = vld [vmem:[#allocation6 + $0x20e8] sm:$0xff]  ;;  %2826 = vmatpush.msra.mxu3 %v1274_v43  ;;  %2807 = vmatmul.f32.vlgmr.msra.gmra.mxu2 %v4218_v16  ;;  %v683_v43 = vld [vmem:[#allocation6 + $0x9b0] sm:$0xff] }
 0x2df   :  { %v1554_v45 = vld [vmem:[#allocation6 + $0x24e8] sm:$0xff]  ;;  %2843 = vmatpush.msrb.mxu0 %v1426_v44  ;;  %2827 = vmatmul.f32.vlgmr.msra.gmra.mxu3 %v4220_v22  ;;  %v811_v44 = vld [vmem:[#allocation6 + $0xdb0] sm:$0xff] }
 0x2e0   :  { %2863 = vmatpush.msrb.mxu1 %v1554_v45  ;;  %v1418_v50 = vld [vmem:[#allocation6 + $0x20a8] sm:$0xff]  ;;  %2871 = vmatpush.msrb.mxu2 %v499_v46  ;;  %v395_v45 = vld [vmem:[#allocation6 + $0xb0] sm:$0xff] }
 0x2e1   :  { %v1546_v51 = vld [vmem:[#allocation6 + $0x24a8] sm:$0xff]  ;;  %2891 = vmatpush.msrb.mxu3 %v627_v47  ;;  %2844 = vmatpush.msrb.mxu0 %v1418_v50  ;;  %v523_v46 = vld [vmem:[#allocation6 + $0x4b0] sm:$0xff] }
 0x2e2   :  { %v1410_v55 = vld [vmem:[#allocation6 + $0x2068] sm:$0xff]  ;;  %2864 = vmatpush.msrb.mxu1 %v1546_v51  ;;  %2872 = vmatpush.msrb.mxu2 %v491_v53  ;;  %v675_v47 = vld [vmem:[#allocation6 + $0x970] sm:$0xff] }
 0x2e3   :  { %v1538_v57 = vld [vmem:[#allocation6 + $0x2468] sm:$0xff]  ;;  %2892 = vmatpush.msrb.mxu3 %v619_v54  ;;  %2845 = vmatpush.msrb.mxu0 %v1410_v55  ;;  %v803_v50 = vld [vmem:[#allocation6 + $0xd70] sm:$0xff] }
 0x2e4   :  { %v1402_v61 = vld [vmem:[#allocation6 + $0x2028] sm:$0xff]  ;;  %2865 = vmatpush.msrb.mxu1 %v1538_v57  ;;  %2873 = vmatpush.msrb.mxu2 %v483_v58  ;;  %v387_v51 = vld [vmem:[#allocation6 + $0x70] sm:$0xff] }
 0x2e5   :  { %v1530_v62 = vld [vmem:[#allocation6 + $0x2428] sm:$0xff]  ;;  %2893 = vmatpush.msrb.mxu3 %v611_v60  ;;  %2846 = vmatpush.msrb.mxu0 %v1402_v61  ;;  %v515_v53 = vld [vmem:[#allocation6 + $0x470] sm:$0xff] }
 0x2e6   :  { %2866 = vmatpush.msrb.mxu1 %v1530_v62  ;;  %2847 = vmatmul.f32.vlgmr.msrb.gmra.mxu0 %v4224_v59  ;;  %v667_v54 = vld [vmem:[#allocation6 + $0x930] sm:$0xff] }
 0x2e7   :  { %2867 = vmatmul.f32.vlgmr.msrb.gmra.mxu1 %v4226_v63  ;;  %2874 = vmatpush.msrb.mxu2 %v475_v0  ;;  %v795_v55 = vld [vmem:[#allocation6 + $0xd30] sm:$0xff] }
 0x2e8   :  { %2894 = vmatpush.msrb.mxu3 %v603_v1  ;;  %2911 = vmatpush.msra.mxu0 %v755_v2  ;;  %v379_v57 = vld [vmem:[#allocation6 + $0x30] sm:$0xff] }
 0x2e9   :  { %2931 = vmatpush.msra.mxu1 %v883_v3  ;;  %2875 = vmatpush.msrb.mxu2 %v467_v4  ;;  %v507_v58 = vld [vmem:[#allocation6 + $0x430] sm:$0xff] }
 0x2ea   :  { %2895 = vmatpush.msrb.mxu3 %v595_v5  ;;  %2912 = vmatpush.msra.mxu0 %v747_v6  ;;  %v659_v60 = vld [vmem:[#allocation6 + $0x8f0] sm:$0xff] }
 0x2eb   :  { %2932 = vmatpush.msra.mxu1 %v875_v7  ;;  %2876 = vmatpush.msrb.mxu2 %v459_v9  ;;  %v787_v61 = vld [vmem:[#allocation6 + $0xcf0] sm:$0xff] }
 0x2ec   :  { %2896 = vmatpush.msrb.mxu3 %v587_v10  ;;  %2913 = vmatpush.msra.mxu0 %v739_v11  ;;  %v1011_v62 = vld [vmem:[#allocation6 + $0x13f0] sm:$0xff] }
 0x2ed   :  { %2933 = vmatpush.msra.mxu1 %v867_v12  ;;  %2877 = vmatpush.msrb.mxu2 %v451_v13  ;;  %v1139_v0 = vld [vmem:[#allocation6 + $0x17f0] sm:$0xff] }
 0x2ee   :  { %2897 = vmatpush.msrb.mxu3 %v579_v14  ;;  %2914 = vmatpush.msra.mxu0 %v731_v15  ;;  %v651_v1 = vld [vmem:[#allocation6 + $0x8b0] sm:$0xff] }
 0x2ef   :  { %2934 = vmatpush.msra.mxu1 %v859_v17  ;;  %2878 = vmatpush.msrb.mxu2 %v443_v18  ;;  %v779_v2 = vld [vmem:[#allocation6 + $0xcb0] sm:$0xff] }
 0x2f0   :  { %2898 = vmatpush.msrb.mxu3 %v571_v19  ;;  %2915 = vmatpush.msra.mxu0 %v723_v20  ;;  %v1003_v3 = vld [vmem:[#allocation6 + $0x13b0] sm:$0xff] }
 0x2f1   :  { %2935 = vmatpush.msra.mxu1 %v851_v21  ;;  %2879 = vmatpush.msrb.mxu2 %v435_v23  ;;  %v1131_v4 = vld [vmem:[#allocation6 + $0x17b0] sm:$0xff] }
 0x2f2   :  { %2899 = vmatpush.msrb.mxu3 %v563_v24  ;;  %2916 = vmatpush.msra.mxu0 %v715_v25  ;;  %v643_v5 = vld [vmem:[#allocation6 + $0x870] sm:$0xff] }
 0x2f3   :  { %2936 = vmatpush.msra.mxu1 %v843_v26  ;;  %2880 = vmatpush.msrb.mxu2 %v427_v27  ;;  %v771_v6 = vld [vmem:[#allocation6 + $0xc70] sm:$0xff] }
 0x2f4   :  { %2900 = vmatpush.msrb.mxu3 %v555_v30  ;;  %2917 = vmatpush.msra.mxu0 %v707_v31  ;;  %v995_v7 = vld [vmem:[#allocation6 + $0x1370] sm:$0xff] }
 0x2f5   :  { %2937 = vmatpush.msra.mxu1 %v835_v32  ;;  %2881 = vmatpush.msrb.mxu2 %v419_v33  ;;  %v1123_v9 = vld [vmem:[#allocation6 + $0x1770] sm:$0xff] }
 0x2f6   :  { %2901 = vmatpush.msrb.mxu3 %v547_v34  ;;  %2918 = vmatpush.msra.mxu0 %v699_v35  ;;  %v635_v10 = vld [vmem:[#allocation6 + $0x830] sm:$0xff] }
 0x2f7   :  { %2938 = vmatpush.msra.mxu1 %v827_v36  ;;  %2882 = vmatpush.msrb.mxu2 %v411_v37  ;;  %v763_v11 = vld [vmem:[#allocation6 + $0xc30] sm:$0xff] }
 0x2f8   :  { %2902 = vmatpush.msrb.mxu3 %v539_v38  ;;  %2919 = vmatpush.msra.mxu0 %v691_v39  ;;  %v987_v12 = vld [vmem:[#allocation6 + $0x1330] sm:$0xff] }
 0x2f9   :  { %2939 = vmatpush.msra.mxu1 %v819_v40  ;;  %2883 = vmatpush.msrb.mxu2 %v403_v41  ;;  %v1115_v13 = vld [vmem:[#allocation6 + $0x1730] sm:$0xff] }
 0x2fa   :  { %2903 = vmatpush.msrb.mxu3 %v531_v42  ;;  %2920 = vmatpush.msra.mxu0 %v683_v43  ;;  %v1267_v14 = vld [vmem:[#allocation6 + $0x1bf0] sm:$0xff] }
 0x2fb   :  { %2940 = vmatpush.msra.mxu1 %v811_v44  ;;  %2884 = vmatpush.msrb.mxu2 %v395_v45  ;;  %v1395_v15 = vld [vmem:[#allocation6 + $0x1ff0] sm:$0xff] }
 0x2fc   :  { %2904 = vmatpush.msrb.mxu3 %v523_v46  ;;  %2921 = vmatpush.msra.mxu0 %v675_v47  ;;  %v979_v17 = vld [vmem:[#allocation6 + $0x12f0] sm:$0xff] }
 0x2fd   :  { %2941 = vmatpush.msra.mxu1 %v803_v50  ;;  %2885 = vmatpush.msrb.mxu2 %v387_v51  ;;  %v1107_v18 = vld [vmem:[#allocation6 + $0x16f0] sm:$0xff] }
 0x2fe   :  { %2905 = vmatpush.msrb.mxu3 %v515_v53  ;;  %2922 = vmatpush.msra.mxu0 %v667_v54  ;;  %v1259_v19 = vld [vmem:[#allocation6 + $0x1bb0] sm:$0xff] }
 0x2ff   :  { %2942 = vmatpush.msra.mxu1 %v795_v55  ;;  %2886 = vmatpush.msrb.mxu2 %v379_v57  ;;  %v1387_v20 = vld [vmem:[#allocation6 + $0x1fb0] sm:$0xff] }
 0x300   :  { %2906 = vmatpush.msrb.mxu3 %v507_v58  ;;  %2923 = vmatpush.msra.mxu0 %v659_v60  ;;  %v971_v21 = vld [vmem:[#allocation6 + $0x12b0] sm:$0xff] }
 0x301   :  { %2943 = vmatpush.msra.mxu1 %v787_v61  ;;  %2887 = vmatmul.f32.vlgmr.msrb.gmra.mxu2 %v4194_v28  ;;  %v1099_v23 = vld [vmem:[#allocation6 + $0x16b0] sm:$0xff] }
 0x302   :  { %2907 = vmatmul.f32.vlgmr.msrb.gmra.mxu3 %v4196_v29  ;;  %2951 = vmatpush.msra.mxu2 %v1011_v62  ;;  %v1251_v24 = vld [vmem:[#allocation6 + $0x1b70] sm:$0xff] }
 0x303   :  { %2971 = vmatpush.msra.mxu3 %v1139_v0  ;;  %2924 = vmatpush.msra.mxu0 %v651_v1  ;;  %v1379_v25 = vld [vmem:[#allocation6 + $0x1f70] sm:$0xff] }
 0x304   :  { %2944 = vmatpush.msra.mxu1 %v779_v2  ;;  %2952 = vmatpush.msra.mxu2 %v1003_v3  ;;  %v963_v26 = vld [vmem:[#allocation6 + $0x1270] sm:$0xff] }
 0x305   :  { %2972 = vmatpush.msra.mxu3 %v1131_v4  ;;  %2925 = vmatpush.msra.mxu0 %v643_v5  ;;  %v1091_v27 = vld [vmem:[#allocation6 + $0x1670] sm:$0xff] }
 0x306   :  { %2945 = vmatpush.msra.mxu1 %v771_v6  ;;  %2953 = vmatpush.msra.mxu2 %v995_v7  ;;  %v1243_v30 = vld [vmem:[#allocation6 + $0x1b30] sm:$0xff] }
 0x307   :  { %2973 = vmatpush.msra.mxu3 %v1123_v9  ;;  %2926 = vmatpush.msra.mxu0 %v635_v10  ;;  %v1371_v31 = vld [vmem:[#allocation6 + $0x1f30] sm:$0xff] }
 0x308   :  { %2946 = vmatpush.msra.mxu1 %v763_v11  ;;  %2927 = vmatmul.f32.vlgmr.msra.gmra.mxu0 %v4204_v48  ;;  %v955_v32 = vld [vmem:[#allocation6 + $0x1230] sm:$0xff] }
 0x309   :  { %2947 = vmatmul.f32.vlgmr.msra.gmra.mxu1 %v4206_v49  ;;  %2954 = vmatpush.msra.mxu2 %v987_v12  ;;  %v1083_v33 = vld [vmem:[#allocation6 + $0x1630] sm:$0xff] }
 0x30a   :  { %2974 = vmatpush.msra.mxu3 %v1115_v13  ;;  %2991 = vmatpush.msrb.mxu0 %v1267_v14  ;;  %v1235_v34 = vld [vmem:[#allocation6 + $0x1af0] sm:$0xff] }
 0x30b   :  { %3011 = vmatpush.msrb.mxu1 %v1395_v15  ;;  %2955 = vmatpush.msra.mxu2 %v979_v17  ;;  %v1363_v35 = vld [vmem:[#allocation6 + $0x1ef0] sm:$0xff] }
 0x30c   :  { %2975 = vmatpush.msra.mxu3 %v1107_v18  ;;  %2992 = vmatpush.msrb.mxu0 %v1259_v19  ;;  %v947_v36 = vld [vmem:[#allocation6 + $0x11f0] sm:$0xff] }
 0x30d   :  { %3012 = vmatpush.msrb.mxu1 %v1387_v20  ;;  %2956 = vmatpush.msra.mxu2 %v971_v21  ;;  %v1075_v37 = vld [vmem:[#allocation6 + $0x15f0] sm:$0xff] }
 0x30e   :  { %2976 = vmatpush.msra.mxu3 %v1099_v23  ;;  %2993 = vmatpush.msrb.mxu0 %v1251_v24  ;;  %v1227_v38 = vld [vmem:[#allocation6 + $0x1ab0] sm:$0xff] }
 0x30f   :  { %3013 = vmatpush.msrb.mxu1 %v1379_v25  ;;  %2957 = vmatpush.msra.mxu2 %v963_v26  ;;  %v1355_v39 = vld [vmem:[#allocation6 + $0x1eb0] sm:$0xff] }
 0x310   :  { %2977 = vmatpush.msra.mxu3 %v1091_v27  ;;  %2994 = vmatpush.msrb.mxu0 %v1243_v30  ;;  %v939_v40 = vld [vmem:[#allocation6 + $0x11b0] sm:$0xff]  ;;  %v500_v27 = vld [vmem:[#allocation6 + $0x3f8] sm:$0xff] }
 0x311   :  { %3014 = vmatpush.msrb.mxu1 %v1371_v31  ;;  %2958 = vmatpush.msra.mxu2 %v955_v32  ;;  %v1067_v41 = vld [vmem:[#allocation6 + $0x15b0] sm:$0xff]  ;;  %v628_v30 = vld [vmem:[#allocation6 + $0x7f8] sm:$0xff] }
 0x312   :  { %2978 = vmatpush.msra.mxu3 %v1083_v33  ;;  %2995 = vmatpush.msrb.mxu0 %v1235_v34  ;;  %v1219_v42 = vld [vmem:[#allocation6 + $0x1a70] sm:$0xff]  ;;  %v492_v33 = vld [vmem:[#allocation6 + $0x3b8] sm:$0xff] }
 0x313   :  { %3015 = vmatpush.msrb.mxu1 %v1363_v35  ;;  %2959 = vmatpush.msra.mxu2 %v947_v36  ;;  %v1347_v43 = vld [vmem:[#allocation6 + $0x1e70] sm:$0xff]  ;;  %v620_v34 = vld [vmem:[#allocation6 + $0x7b8] sm:$0xff] }
 0x314   :  { %2979 = vmatpush.msra.mxu3 %v1075_v37  ;;  %2996 = vmatpush.msrb.mxu0 %v1227_v38  ;;  %v931_v44 = vld [vmem:[#allocation6 + $0x1170] sm:$0xff]  ;;  %v484_v37 = vld [vmem:[#allocation6 + $0x378] sm:$0xff] }
 0x315   :  { %3016 = vmatpush.msrb.mxu1 %v1355_v39  ;;  %v1059_v45 = vld [vmem:[#allocation6 + $0x1570] sm:$0xff]  ;;  %2960 = vmatpush.msra.mxu2 %v939_v40  ;;  %v612_v38 = vld [vmem:[#allocation6 + $0x778] sm:$0xff] }
 0x316   :  { %2980 = vmatpush.msra.mxu3 %v1067_v41  ;;  %v1211_v46 = vld [vmem:[#allocation6 + $0x1a30] sm:$0xff]  ;;  %2997 = vmatpush.msrb.mxu0 %v1219_v42  ;;  %v476_v41 = vld [vmem:[#allocation6 + $0x338] sm:$0xff] }
 0x317   :  { %v1339_v47 = vld [vmem:[#allocation6 + $0x1e30] sm:$0xff]  ;;  %3017 = vmatpush.msrb.mxu1 %v1347_v43  ;;  %2961 = vmatpush.msra.mxu2 %v931_v44  ;;  %v604_v42 = vld [vmem:[#allocation6 + $0x738] sm:$0xff] }
 0x318   :  { %v923_v50 = vld [vmem:[#allocation6 + $0x1130] sm:$0xff]  ;;  %2981 = vmatpush.msra.mxu3 %v1059_v45  ;;  %2998 = vmatpush.msrb.mxu0 %v1211_v46  ;;  %v468_v45 = vld [vmem:[#allocation6 + $0x2f8] sm:$0xff] }
 0x319   :  { %v1051_v51 = vld [vmem:[#allocation6 + $0x1530] sm:$0xff]  ;;  %3018 = vmatpush.msrb.mxu1 %v1339_v47  ;;  %2962 = vmatpush.msra.mxu2 %v923_v50  ;;  %v596_v46 = vld [vmem:[#allocation6 + $0x6f8] sm:$0xff] }
 0x31a   :  { %v1203_v53 = vld [vmem:[#allocation6 + $0x19f0] sm:$0xff]  ;;  %2982 = vmatpush.msra.mxu3 %v1051_v51  ;;  %v460_v51 = vld [vmem:[#allocation6 + $0x2b8] sm:$0xff] }
 0x31b   :  { %v1331_v54 = vld [vmem:[#allocation6 + $0x1df0] sm:$0xff]  ;;  %2999 = vmatpush.msrb.mxu0 %v1203_v53  ;;  %v588_v53 = vld [vmem:[#allocation6 + $0x6b8] sm:$0xff] }
 0x31c   :  { %v915_v55 = vld [vmem:[#allocation6 + $0x10f0] sm:$0xff]  ;;  %3019 = vmatpush.msrb.mxu1 %v1331_v54 }
 0x31d   :  { %v1043_v57 = vld [vmem:[#allocation6 + $0x14f0] sm:$0xff]  ;;  %2963 = vmatpush.msra.mxu2 %v915_v55 }
 0x31e   :  { %v1195_v58 = vld [vmem:[#allocation6 + $0x19b0] sm:$0xff]  ;;  %2983 = vmatpush.msra.mxu3 %v1043_v57  ;;  %v452_v57 = vld [vmem:[#allocation6 + $0x278] sm:$0xff] }
 0x31f   :  { %v1323_v60 = vld [vmem:[#allocation6 + $0x1db0] sm:$0xff]  ;;  %3000 = vmatpush.msrb.mxu0 %v1195_v58  ;;  %v580_v58 = vld [vmem:[#allocation6 + $0x678] sm:$0xff] }
 0x320   :  { %v907_v61 = vld [vmem:[#allocation6 + $0x10b0] sm:$0xff]  ;;  %3020 = vmatpush.msrb.mxu1 %v1323_v60 }
 0x321   :  { %v1035_v62 = vld [vmem:[#allocation6 + $0x14b0] sm:$0xff]  ;;  %2964 = vmatpush.msra.mxu2 %v907_v61 }
 0x322   :  { %v1187_v0 = vld [vmem:[#allocation6 + $0x1970] sm:$0xff]  ;;  %2984 = vmatpush.msra.mxu3 %v1035_v62  ;;  %v444_v62 = vld [vmem:[#allocation6 + $0x238] sm:$0xff] }
 0x323   :  { %v1315_v1 = vld [vmem:[#allocation6 + $0x1d70] sm:$0xff]  ;;  %3001 = vmatpush.msrb.mxu0 %v1187_v0  ;;  %v572_v0 = vld [vmem:[#allocation6 + $0x638] sm:$0xff] }
 0x324   :  { %v899_v2 = vld [vmem:[#allocation6 + $0x1070] sm:$0xff]  ;;  %3021 = vmatpush.msrb.mxu1 %v1315_v1 }
 0x325   :  { %v1027_v3 = vld [vmem:[#allocation6 + $0x1470] sm:$0xff]  ;;  %2965 = vmatpush.msra.mxu2 %v899_v2 }
 0x326   :  { %v1179_v4 = vld [vmem:[#allocation6 + $0x1930] sm:$0xff]  ;;  %2985 = vmatpush.msra.mxu3 %v1027_v3  ;;  %v436_v3 = vld [vmem:[#allocation6 + $0x1f8] sm:$0xff] }
 0x327   :  { %v1307_v5 = vld [vmem:[#allocation6 + $0x1d30] sm:$0xff]  ;;  %3002 = vmatpush.msrb.mxu0 %v1179_v4  ;;  %v564_v4 = vld [vmem:[#allocation6 + $0x5f8] sm:$0xff] }
 0x328   :  { %v891_v6 = vld [vmem:[#allocation6 + $0x1030] sm:$0xff]  ;;  %3022 = vmatpush.msrb.mxu1 %v1307_v5 }
 0x329   :  { %v1019_v7 = vld [vmem:[#allocation6 + $0x1430] sm:$0xff]  ;;  %2966 = vmatpush.msra.mxu2 %v891_v6 }
 0x32a   :  { %v1171_v9 = vld [vmem:[#allocation6 + $0x18f0] sm:$0xff]  ;;  %2986 = vmatpush.msra.mxu3 %v1019_v7  ;;  %2967 = vmatmul.f32.vlgmr.msra.gmra.mxu2 %v4208_v52  ;;  %v428_v7 = vld [vmem:[#allocation6 + $0x1b8] sm:$0xff] }
 0x32b   :  { %v1299_v10 = vld [vmem:[#allocation6 + $0x1cf0] sm:$0xff]  ;;  %3003 = vmatpush.msrb.mxu0 %v1171_v9  ;;  %2987 = vmatmul.f32.vlgmr.msra.gmra.mxu3 %v4212_v56  ;;  %v556_v9 = vld [vmem:[#allocation6 + $0x5b8] sm:$0xff] }
 0x32c   :  { %v1523_v11 = vld [vmem:[#allocation6 + $0x23f0] sm:$0xff]  ;;  %3023 = vmatpush.msrb.mxu1 %v1299_v10 }
 0x32d   :  { %v1651_v12 = vld [vmem:[#allocation6 + $0x27f0] sm:$0xff]  ;;  %3031 = vmatpush.msrb.mxu2 %v1523_v11 }
 0x32e   :  { %v1163_v13 = vld [vmem:[#allocation6 + $0x18b0] sm:$0xff]  ;;  %3051 = vmatpush.msrb.mxu3 %v1651_v12  ;;  %v420_v12 = vld [vmem:[#allocation6 + $0x178] sm:$0xff] }
 0x32f   :  { %v1291_v14 = vld [vmem:[#allocation6 + $0x1cb0] sm:$0xff]  ;;  %3004 = vmatpush.msrb.mxu0 %v1163_v13  ;;  %v548_v13 = vld [vmem:[#allocation6 + $0x578] sm:$0xff] }
 0x330   :  { %v1515_v15 = vld [vmem:[#allocation6 + $0x23b0] sm:$0xff]  ;;  %3024 = vmatpush.msrb.mxu1 %v1291_v14 }
 0x331   :  { %v1643_v17 = vld [vmem:[#allocation6 + $0x27b0] sm:$0xff]  ;;  %3032 = vmatpush.msrb.mxu2 %v1515_v15 }
 0x332   :  { %v1155_v18 = vld [vmem:[#allocation6 + $0x1870] sm:$0xff]  ;;  %3052 = vmatpush.msrb.mxu3 %v1643_v17  ;;  %v412_v17 = vld [vmem:[#allocation6 + $0x138] sm:$0xff] }
 0x333   :  { %v1283_v19 = vld [vmem:[#allocation6 + $0x1c70] sm:$0xff]  ;;  %3005 = vmatpush.msrb.mxu0 %v1155_v18  ;;  %v540_v18 = vld [vmem:[#allocation6 + $0x538] sm:$0xff] }
 0x334   :  { %v1507_v20 = vld [vmem:[#allocation6 + $0x2370] sm:$0xff]  ;;  %3025 = vmatpush.msrb.mxu1 %v1283_v19 }
 0x335   :  { %v1635_v21 = vld [vmem:[#allocation6 + $0x2770] sm:$0xff]  ;;  %3033 = vmatpush.msrb.mxu2 %v1507_v20 }
 0x336   :  { %v1147_v23 = vld [vmem:[#allocation6 + $0x1830] sm:$0xff]  ;;  %3053 = vmatpush.msrb.mxu3 %v1635_v21  ;;  %v404_v21 = vld [vmem:[#allocation6 + $0xf8] sm:$0xff] }
 0x337   :  { %v1275_v24 = vld [vmem:[#allocation6 + $0x1c30] sm:$0xff]  ;;  %3006 = vmatpush.msrb.mxu0 %v1147_v23  ;;  %v532_v23 = vld [vmem:[#allocation6 + $0x4f8] sm:$0xff] }
 0x338   :  { %v1499_v25 = vld [vmem:[#allocation6 + $0x2330] sm:$0xff]  ;;  %3026 = vmatpush.msrb.mxu1 %v1275_v24  ;;  %3007 = vmatmul.f32.vlgmr.msrb.gmra.mxu0 %v4218_v16  ;;  %v756_v24 = vld [vmem:[#allocation6 + $0xbf8] sm:$0xff] }
 0x339   :  { %v1627_v26 = vld [vmem:[#allocation6 + $0x2730] sm:$0xff]  ;;  %3027 = vmatmul.f32.vlgmr.msrb.gmra.mxu1 %v4220_v22  ;;  %3034 = vmatpush.msrb.mxu2 %v1499_v25  ;;  %v884_v25 = vld [vmem:[#allocation6 + $0xff8] sm:$0xff] }
 0x33a   :  { %v1491_v31 = vld [vmem:[#allocation6 + $0x22f0] sm:$0xff]  ;;  %3054 = vmatpush.msrb.mxu3 %v1627_v26  ;;  %3071 = vmatpush.msra.mxu0 %v500_v27  ;;  %v396_v26 = vld [vmem:[#allocation6 + $0xb8] sm:$0xff] }
 0x33b   :  { %v1619_v32 = vld [vmem:[#allocation6 + $0x26f0] sm:$0xff]  ;;  %3091 = vmatpush.msra.mxu1 %v628_v30  ;;  %3035 = vmatpush.msrb.mxu2 %v1491_v31  ;;  %v524_v27 = vld [vmem:[#allocation6 + $0x4b8] sm:$0xff] }
 0x33c   :  { %v1483_v35 = vld [vmem:[#allocation6 + $0x22b0] sm:$0xff]  ;;  %3055 = vmatpush.msrb.mxu3 %v1619_v32  ;;  %3072 = vmatpush.msra.mxu0 %v492_v33  ;;  %v748_v30 = vld [vmem:[#allocation6 + $0xbb8] sm:$0xff] }
 0x33d   :  { %v1611_v36 = vld [vmem:[#allocation6 + $0x26b0] sm:$0xff]  ;;  %3092 = vmatpush.msra.mxu1 %v620_v34  ;;  %3036 = vmatpush.msrb.mxu2 %v1483_v35  ;;  %v876_v31 = vld [vmem:[#allocation6 + $0xfb8] sm:$0xff] }
 0x33e   :  { %v1475_v39 = vld [vmem:[#allocation6 + $0x2270] sm:$0xff]  ;;  %3056 = vmatpush.msrb.mxu3 %v1611_v36  ;;  %3073 = vmatpush.msra.mxu0 %v484_v37  ;;  %v388_v32 = vld [vmem:[#allocation6 + $0x78] sm:$0xff] }
 0x33f   :  { %v1603_v40 = vld [vmem:[#allocation6 + $0x2670] sm:$0xff]  ;;  %3093 = vmatpush.msra.mxu1 %v612_v38  ;;  %3037 = vmatpush.msrb.mxu2 %v1475_v39  ;;  %v516_v33 = vld [vmem:[#allocation6 + $0x478] sm:$0xff]  ;;  %v4295_v38 = vpop.f32.mrf.mxu2 }
 0x340   :  { %v1467_v43 = vld [vmem:[#allocation6 + $0x2230] sm:$0xff]  ;;  %3057 = vmatpush.msrb.mxu3 %v1603_v40  ;;  %3074 = vmatpush.msra.mxu0 %v476_v41  ;;  %v740_v34 = vld [vmem:[#allocation6 + $0xb78] sm:$0xff] }
 0x341   :  { %v1595_v44 = vld [vmem:[#allocation6 + $0x2630] sm:$0xff]  ;;  %3094 = vmatpush.msra.mxu1 %v604_v42  ;;  %3038 = vmatpush.msrb.mxu2 %v1467_v43  ;;  %v868_v35 = vld [vmem:[#allocation6 + $0xf78] sm:$0xff]  ;;  %v4297_v43 = vpop.f32.mrf.mxu0 }
 0x342   :  { %v1459_v47 = vld [vmem:[#allocation6 + $0x21f0] sm:$0xff]  ;;  %3058 = vmatpush.msrb.mxu3 %v1595_v44  ;;  %3075 = vmatpush.msra.mxu0 %v468_v45  ;;  %v380_v36 = vld [vmem:[#allocation6 + $0x38] sm:$0xff] }
 0x343   :  { %v1587_v50 = vld [vmem:[#allocation6 + $0x25f0] sm:$0xff]  ;;  %3095 = vmatpush.msra.mxu1 %v596_v46  ;;  %3039 = vmatpush.msrb.mxu2 %v1459_v47  ;;  %v508_v37 = vld [vmem:[#allocation6 + $0x438] sm:$0xff] }
 0x344   :  { %v1451_v54 = vld [vmem:[#allocation6 + $0x21b0] sm:$0xff]  ;;  %3059 = vmatpush.msrb.mxu3 %v1587_v50  ;;  %3076 = vmatpush.msra.mxu0 %v460_v51  ;;  %v732_v39 = vld [vmem:[#allocation6 + $0xb38] sm:$0xff] }
 0x345   :  { %v1579_v55 = vld [vmem:[#allocation6 + $0x25b0] sm:$0xff]  ;;  %3096 = vmatpush.msra.mxu1 %v588_v53  ;;  %3040 = vmatpush.msrb.mxu2 %v1451_v54  ;;  %v860_v40 = vld [vmem:[#allocation6 + $0xf38] sm:$0xff] }
 0x346   :  { %v1443_v60 = vld [vmem:[#allocation6 + $0x2170] sm:$0xff]  ;;  %3060 = vmatpush.msrb.mxu3 %v1579_v55  ;;  %3077 = vmatpush.msra.mxu0 %v452_v57  ;;  %v1012_v41 = vld [vmem:[#allocation6 + $0x13f8] sm:$0xff]  ;;  %v4301_v55 = vpop.f32.mrf.mxu1  ;;  %v4303_v57 = vpop.f32.mrf.mxu3 }
 0x347   :  { %v1571_v61 = vld [vmem:[#allocation6 + $0x2570] sm:$0xff]  ;;  %3097 = vmatpush.msra.mxu1 %v580_v58  ;;  %3041 = vmatpush.msrb.mxu2 %v1443_v60  ;;  %v1140_v42 = vld [vmem:[#allocation6 + $0x17f8] sm:$0xff] }
 0x348   :  { %v1435_v1 = vld [vmem:[#allocation6 + $0x2130] sm:$0xff]  ;;  %3061 = vmatpush.msrb.mxu3 %v1571_v61  ;;  %3078 = vmatpush.msra.mxu0 %v444_v62  ;;  %v724_v44 = vld [vmem:[#allocation6 + $0xaf8] sm:$0xff]  ;;  %v4305_v61 = vpop.f32.mrf.mxu2 }
 0x349   :  { %v1563_v2 = vld [vmem:[#allocation6 + $0x2530] sm:$0xff]  ;;  %3098 = vmatpush.msra.mxu1 %v572_v0  ;;  %3042 = vmatpush.msrb.mxu2 %v1435_v1  ;;  %v852_v45 = vld [vmem:[#allocation6 + $0xef8] sm:$0xff] }
 0x34a   :  { %v1427_v5 = vld [vmem:[#allocation6 + $0x20f0] sm:$0xff]  ;;  %3062 = vmatpush.msrb.mxu3 %v1563_v2  ;;  %3079 = vmatpush.msra.mxu0 %v436_v3  ;;  %v1004_v46 = vld [vmem:[#allocation6 + $0x13b8] sm:$0xff]  ;;  %v4307_v3 = vpop.f32.mrf.mxu0 }
 0x34b   :  { %v1555_v6 = vld [vmem:[#allocation6 + $0x24f0] sm:$0xff]  ;;  %3099 = vmatpush.msra.mxu1 %v564_v4  ;;  %3043 = vmatpush.msrb.mxu2 %v1427_v5  ;;  %v1132_v47 = vld [vmem:[#allocation6 + $0x17b8] sm:$0xff] }
 0x34c   :  { %v1419_v10 = vld [vmem:[#allocation6 + $0x20b0] sm:$0xff]  ;;  %3063 = vmatpush.msrb.mxu3 %v1555_v6  ;;  %3080 = vmatpush.msra.mxu0 %v428_v7  ;;  %v716_v50 = vld [vmem:[#allocation6 + $0xab8] sm:$0xff] }
 0x34d   :  { %v1547_v11 = vld [vmem:[#allocation6 + $0x24b0] sm:$0xff]  ;;  %3100 = vmatpush.msra.mxu1 %v556_v9  ;;  %3044 = vmatpush.msrb.mxu2 %v1419_v10  ;;  %v844_v51 = vld [vmem:[#allocation6 + $0xeb8] sm:$0xff] }
 0x34e   :  { %v1411_v14 = vld [vmem:[#allocation6 + $0x2070] sm:$0xff]  ;;  %3064 = vmatpush.msrb.mxu3 %v1547_v11  ;;  %3081 = vmatpush.msra.mxu0 %v420_v12  ;;  %v996_v53 = vld [vmem:[#allocation6 + $0x1378] sm:$0xff] }
 0x34f   :  { %v1539_v15 = vld [vmem:[#allocation6 + $0x2470] sm:$0xff]  ;;  %3101 = vmatpush.msra.mxu1 %v548_v13  ;;  %3045 = vmatpush.msrb.mxu2 %v1411_v14  ;;  %v1124_v54 = vld [vmem:[#allocation6 + $0x1778] sm:$0xff]  ;;  %v4309_v13 = vpop.f32.mrf.mxu1  ;;  %v4311_v14 = vpop.f32.mrf.mxu3 }
 0x350   :  { %v1403_v19 = vld [vmem:[#allocation6 + $0x2030] sm:$0xff]  ;;  %3065 = vmatpush.msrb.mxu3 %v1539_v15  ;;  %3082 = vmatpush.msra.mxu0 %v412_v17  ;;  %v988_v58 = vld [vmem:[#allocation6 + $0x1338] sm:$0xff] }
 0x351   :  { %v1531_v20 = vld [vmem:[#allocation6 + $0x2430] sm:$0xff]  ;;  %3102 = vmatpush.msra.mxu1 %v540_v18  ;;  %3046 = vmatpush.msrb.mxu2 %v1403_v19  ;;  %v1116_v60 = vld [vmem:[#allocation6 + $0x1738] sm:$0xff] }
 0x352   :  { %3066 = vmatpush.msrb.mxu3 %v1531_v20  ;;  %3083 = vmatpush.msra.mxu0 %v404_v21  ;;  %v700_v62 = vld [vmem:[#allocation6 + $0xa38] sm:$0xff]  ;;  %v4313_v20 = vpop.f32.mrf.mxu2 }
 0x353   :  { %3103 = vmatpush.msra.mxu1 %v532_v23  ;;  %3047 = vmatmul.f32.vlgmr.msrb.gmra.mxu2 %v4224_v59  ;;  %v828_v0 = vld [vmem:[#allocation6 + $0xe38] sm:$0xff] }
 0x354   :  { %3067 = vmatmul.f32.vlgmr.msrb.gmra.mxu3 %v4226_v63  ;;  %3111 = vmatpush.msra.mxu2 %v756_v24  ;;  %v980_v1 = vld [vmem:[#allocation6 + $0x12f8] sm:$0xff] }
 0x355   :  { %3131 = vmatpush.msra.mxu3 %v884_v25  ;;  %3084 = vmatpush.msra.mxu0 %v396_v26  ;;  %v1108_v2 = vld [vmem:[#allocation6 + $0x16f8] sm:$0xff]  ;;  %v4315_v26 = vpop.f32.mrf.mxu0 }
 0x356   :  { %3104 = vmatpush.msra.mxu1 %v524_v27  ;;  %3112 = vmatpush.msra.mxu2 %v748_v30  ;;  %v692_v4 = vld [vmem:[#allocation6 + $0x9f8] sm:$0xff] }
 0x357   :  { %3132 = vmatpush.msra.mxu3 %v876_v31  ;;  %3085 = vmatpush.msra.mxu0 %v388_v32  ;;  %v820_v5 = vld [vmem:[#allocation6 + $0xdf8] sm:$0xff] }
 0x358   :  { %3105 = vmatpush.msra.mxu1 %v516_v33  ;;  %3113 = vmatpush.msra.mxu2 %v740_v34  ;;  %v972_v6 = vld [vmem:[#allocation6 + $0x12b8] sm:$0xff] }
 0x359   :  { %3133 = vmatpush.msra.mxu3 %v868_v35  ;;  %3086 = vmatpush.msra.mxu0 %v380_v36  ;;  %v1100_v7 = vld [vmem:[#allocation6 + $0x16b8] sm:$0xff] }
 0x35a   :  { %3106 = vmatpush.msra.mxu1 %v508_v37  ;;  %3087 = vmatmul.f32.vlgmr.msra.gmra.mxu0 %v4194_v28  ;;  %v708_v28 = vld [vmem:[#allocation6 + $0xa78] sm:$0xff]  ;;  %v4317_v37 = vpop.f32.mrf.mxu1 }
 0x35b   :  { %3107 = vmatmul.f32.vlgmr.msra.gmra.mxu1 %v4196_v29  ;;  %3114 = vmatpush.msra.mxu2 %v732_v39  ;;  %v836_v29 = vld [vmem:[#allocation6 + $0xe78] sm:$0xff]  ;;  %v4319_v39 = vpop.f32.mrf.mxu3 }
 0x35c   :  { %3134 = vmatpush.msra.mxu3 %v860_v40  ;;  %3151 = vmatpush.msrb.mxu0 %v1012_v41  ;;  %v684_v9 = vld [vmem:[#allocation6 + $0x9b8] sm:$0xff] }
 0x35d   :  { %3171 = vmatpush.msrb.mxu1 %v1140_v42  ;;  %3115 = vmatpush.msra.mxu2 %v724_v44  ;;  %v812_v10 = vld [vmem:[#allocation6 + $0xdb8] sm:$0xff] }
 0x35e   :  { %3135 = vmatpush.msra.mxu3 %v852_v45  ;;  %3152 = vmatpush.msrb.mxu0 %v1004_v46  ;;  %v964_v11 = vld [vmem:[#allocation6 + $0x1278] sm:$0xff]  ;;  %v4321_v45 = vpop.f32.mrf.mxu2 }
 0x35f   :  { %3172 = vmatpush.msrb.mxu1 %v1132_v47  ;;  %3116 = vmatpush.msra.mxu2 %v716_v50  ;;  %v1092_v12 = vld [vmem:[#allocation6 + $0x1678] sm:$0xff] }
 0x360   :  { %3136 = vmatpush.msra.mxu3 %v844_v51  ;;  %3153 = vmatpush.msrb.mxu0 %v996_v53  ;;  %v676_v15 = vld [vmem:[#allocation6 + $0x978] sm:$0xff]  ;;  %v4323_v53 = vpop.f32.mrf.mxu0 }
 0x361   :  { %3173 = vmatpush.msrb.mxu1 %v1124_v54  ;;  %3117 = vmatpush.msra.mxu2 %v708_v28  ;;  %v804_v17 = vld [vmem:[#allocation6 + $0xd78] sm:$0xff] }
 0x362   :  { %3137 = vmatpush.msra.mxu3 %v836_v29  ;;  %3154 = vmatpush.msrb.mxu0 %v988_v58  ;;  %v956_v18 = vld [vmem:[#allocation6 + $0x1238] sm:$0xff] }
 0x363   :  { %3174 = vmatpush.msrb.mxu1 %v1116_v60  ;;  %3118 = vmatpush.msra.mxu2 %v700_v62  ;;  %v1084_v19 = vld [vmem:[#allocation6 + $0x1638] sm:$0xff] }
 0x364   :  { %3138 = vmatpush.msra.mxu3 %v828_v0  ;;  %3155 = vmatpush.msrb.mxu0 %v980_v1  ;;  %v668_v21 = vld [vmem:[#allocation6 + $0x938] sm:$0xff]  ;;  %v4327_v0 = vpop.f32.mrf.mxu1  ;;  %v4329_v1 = vpop.f32.mrf.mxu3 }
 0x365   :  { %3175 = vmatpush.msrb.mxu1 %v1108_v2  ;;  %3119 = vmatpush.msra.mxu2 %v692_v4  ;;  %v796_v23 = vld [vmem:[#allocation6 + $0xd38] sm:$0xff] }
 0x366   :  { %3139 = vmatpush.msra.mxu3 %v820_v5  ;;  %3156 = vmatpush.msrb.mxu0 %v972_v6  ;;  %v948_v24 = vld [vmem:[#allocation6 + $0x11f8] sm:$0xff] }
 0x367   :  { %3176 = vmatpush.msrb.mxu1 %v1100_v7  ;;  %3120 = vmatpush.msra.mxu2 %v684_v9  ;;  %v1076_v25 = vld [vmem:[#allocation6 + $0x15f8] sm:$0xff]  ;;  %v4331_v7 = vpop.f32.mrf.mxu2 }
 0x368   :  { %3140 = vmatpush.msra.mxu3 %v812_v10  ;;  %3157 = vmatpush.msrb.mxu0 %v964_v11  ;;  %v660_v27 = vld [vmem:[#allocation6 + $0x8f8] sm:$0xff]  ;;  %v4333_v9 = vpop.f32.mrf.mxu0 }
 0x369   :  { %3177 = vmatpush.msrb.mxu1 %v1092_v12  ;;  %3121 = vmatpush.msra.mxu2 %v676_v15  ;;  %v788_v30 = vld [vmem:[#allocation6 + $0xcf8] sm:$0xff] }
 0x36a   :  { %3141 = vmatpush.msra.mxu3 %v804_v17  ;;  %3158 = vmatpush.msrb.mxu0 %v956_v18  ;;  %v940_v31 = vld [vmem:[#allocation6 + $0x11b8] sm:$0xff] }
 0x36b   :  { %3178 = vmatpush.msrb.mxu1 %v1084_v19  ;;  %3122 = vmatpush.msra.mxu2 %v668_v21  ;;  %v1068_v32 = vld [vmem:[#allocation6 + $0x15b8] sm:$0xff] }
 0x36c   :  { %3142 = vmatpush.msra.mxu3 %v796_v23  ;;  %3159 = vmatpush.msrb.mxu0 %v948_v24  ;;  %v652_v33 = vld [vmem:[#allocation6 + $0x8b8] sm:$0xff]  ;;  %v4337_v23 = vpop.f32.mrf.mxu1  ;;  %v4339_v24 = vpop.f32.mrf.mxu3 }
 0x36d   :  { %3179 = vmatpush.msrb.mxu1 %v1076_v25  ;;  %v780_v34 = vld [vmem:[#allocation6 + $0xcb8] sm:$0xff]  ;;  %3123 = vmatpush.msra.mxu2 %v660_v27 }
 0x36e   :  { %3143 = vmatpush.msra.mxu3 %v788_v30  ;;  %v932_v35 = vld [vmem:[#allocation6 + $0x1178] sm:$0xff]  ;;  %3160 = vmatpush.msrb.mxu0 %v940_v31 }
 0x36f   :  { %v1060_v36 = vld [vmem:[#allocation6 + $0x1578] sm:$0xff]  ;;  %3180 = vmatpush.msrb.mxu1 %v1068_v32  ;;  %3124 = vmatpush.msra.mxu2 %v652_v33  ;;  %v4341_v31 = vpop.f32.mrf.mxu2 }
 0x370   :  { %v644_v40 = vld [vmem:[#allocation6 + $0x878] sm:$0xff]  ;;  %3144 = vmatpush.msra.mxu3 %v780_v34  ;;  %3161 = vmatpush.msrb.mxu0 %v932_v35  ;;  %v4343_v35 = vpop.f32.mrf.mxu0 }
 0x371   :  { %v772_v41 = vld [vmem:[#allocation6 + $0xc78] sm:$0xff]  ;;  %3181 = vmatpush.msrb.mxu1 %v1060_v36  ;;  %3125 = vmatpush.msra.mxu2 %v644_v40 }
 0x372   :  { %v924_v42 = vld [vmem:[#allocation6 + $0x1138] sm:$0xff]  ;;  %3145 = vmatpush.msra.mxu3 %v772_v41 }
 0x373   :  { %v1052_v44 = vld [vmem:[#allocation6 + $0x1538] sm:$0xff]  ;;  %3162 = vmatpush.msrb.mxu0 %v924_v42 }
 0x374   :  { %v636_v46 = vld [vmem:[#allocation6 + $0x838] sm:$0xff]  ;;  %3182 = vmatpush.msrb.mxu1 %v1052_v44 }
 0x375   :  { %v764_v47 = vld [vmem:[#allocation6 + $0xc38] sm:$0xff]  ;;  %3126 = vmatpush.msra.mxu2 %v636_v46 }
 0x376   :  { %v916_v50 = vld [vmem:[#allocation6 + $0x10f8] sm:$0xff]  ;;  %3146 = vmatpush.msra.mxu3 %v764_v47  ;;  %3127 = vmatmul.f32.vlgmr.msra.gmra.mxu2 %v4204_v48 }
 0x377   :  { %v1044_v51 = vld [vmem:[#allocation6 + $0x14f8] sm:$0xff]  ;;  %3163 = vmatpush.msrb.mxu0 %v916_v50  ;;  %3147 = vmatmul.f32.vlgmr.msra.gmra.mxu3 %v4206_v49 }
 0x378   :  { %v1268_v54 = vld [vmem:[#allocation6 + $0x1bf8] sm:$0xff]  ;;  %3183 = vmatpush.msrb.mxu1 %v1044_v51  ;;  %v4345_v51 = vpop.f32.mrf.mxu1 }
 0x379   :  { %v1396_v28 = vld [vmem:[#allocation6 + $0x1ff8] sm:$0xff]  ;;  %3191 = vmatpush.msrb.mxu2 %v1268_v54  ;;  %v4347_v54 = vpop.f32.mrf.mxu3 }
 0x37a   :  { %v908_v29 = vld [vmem:[#allocation6 + $0x10b8] sm:$0xff]  ;;  %3211 = vmatpush.msrb.mxu3 %v1396_v28 }
 0x37b   :  { %v1036_v58 = vld [vmem:[#allocation6 + $0x14b8] sm:$0xff]  ;;  %3164 = vmatpush.msrb.mxu0 %v908_v29 }
 0x37c   :  { %v1260_v60 = vld [vmem:[#allocation6 + $0x1bb8] sm:$0xff]  ;;  %3184 = vmatpush.msrb.mxu1 %v1036_v58 }
 0x37d   :  { %v1388_v62 = vld [vmem:[#allocation6 + $0x1fb8] sm:$0xff]  ;;  %3192 = vmatpush.msrb.mxu2 %v1260_v60 }
 0x37e   :  { %v900_v2 = vld [vmem:[#allocation6 + $0x1078] sm:$0xff]  ;;  %3212 = vmatpush.msrb.mxu3 %v1388_v62  ;;  %v4349_v62 = vpop.f32.mrf.mxu2 }
 0x37f   :  { %v1028_v4 = vld [vmem:[#allocation6 + $0x1478] sm:$0xff]  ;;  %3165 = vmatpush.msrb.mxu0 %v900_v2 }
 0x380   :  { %v1252_v5 = vld [vmem:[#allocation6 + $0x1b78] sm:$0xff]  ;;  %3185 = vmatpush.msrb.mxu1 %v1028_v4 }
 0x381   :  { %v1380_v6 = vld [vmem:[#allocation6 + $0x1f78] sm:$0xff]  ;;  %3193 = vmatpush.msrb.mxu2 %v1252_v5 }
 0x382   :  { %v892_v48 = vld [vmem:[#allocation6 + $0x1038] sm:$0xff]  ;;  %3213 = vmatpush.msrb.mxu3 %v1380_v6 }
 0x383   :  { %v1020_v49 = vld [vmem:[#allocation6 + $0x1438] sm:$0xff]  ;;  %3166 = vmatpush.msrb.mxu0 %v892_v48  ;;  %v4351_v48 = vpop.f32.mrf.mxu0 }
 0x384   :  { %v1244_v10 = vld [vmem:[#allocation6 + $0x1b38] sm:$0xff]  ;;  %3186 = vmatpush.msrb.mxu1 %v1020_v49  ;;  %3167 = vmatmul.f32.vlgmr.msrb.gmra.mxu0 %v4208_v52 }
 0x385   :  { %v1372_v11 = vld [vmem:[#allocation6 + $0x1f38] sm:$0xff]  ;;  %3187 = vmatmul.f32.vlgmr.msrb.gmra.mxu1 %v4212_v56  ;;  %3194 = vmatpush.msrb.mxu2 %v1244_v10 }
 0x386   :  { %v1524_v12 = vld [vmem:[#allocation6 + $0x23f8] sm:$0xff]  ;;  %3214 = vmatpush.msrb.mxu3 %v1372_v11 }
 0x387   :  { %v1652_v15 = vld [vmem:[#allocation6 + $0x27f8] sm:$0xff]  ;;  %3231 = vmatpush.msra.mxu0 %v1524_v12 }
 0x388   :  { %v1236_v17 = vld [vmem:[#allocation6 + $0x1af8] sm:$0xff]  ;;  %3251 = vmatpush.msra.mxu1 %v1652_v15 }
 0x389   :  { %v1364_v18 = vld [vmem:[#allocation6 + $0x1ef8] sm:$0xff]  ;;  %3195 = vmatpush.msrb.mxu2 %v1236_v17 }
 0x38a   :  { %v1516_v19 = vld [vmem:[#allocation6 + $0x23b8] sm:$0xff]  ;;  %3215 = vmatpush.msrb.mxu3 %v1364_v18 }
 0x38b   :  { %v1644_v21 = vld [vmem:[#allocation6 + $0x27b8] sm:$0xff]  ;;  %3232 = vmatpush.msra.mxu0 %v1516_v19 }
 0x38c   :  { %v1228_v25 = vld [vmem:[#allocation6 + $0x1ab8] sm:$0xff]  ;;  %3252 = vmatpush.msra.mxu1 %v1644_v21  ;;  %v4353_v21 = vpop.f32.mrf.mxu1 }
 0x38d   :  { %v1356_v27 = vld [vmem:[#allocation6 + $0x1eb8] sm:$0xff]  ;;  %3196 = vmatpush.msrb.mxu2 %v1228_v25  ;;  %v4355_v25 = vpop.f32.mrf.mxu3 }
 0x38e   :  { %v1508_v30 = vld [vmem:[#allocation6 + $0x2378] sm:$0xff]  ;;  %3216 = vmatpush.msrb.mxu3 %v1356_v27 }
 0x38f   :  { %v1636_v52 = vld [vmem:[#allocation6 + $0x2778] sm:$0xff]  ;;  %3233 = vmatpush.msra.mxu0 %v1508_v30 }
 0x390   :  { %v1220_v56 = vld [vmem:[#allocation6 + $0x1a78] sm:$0xff]  ;;  %3253 = vmatpush.msra.mxu1 %v1636_v52  ;;  %v4357_v52 = vld [vmem:[#allocation7] sm:$0xff] }
 0x391   :  { %v1348_v32 = vld [vmem:[#allocation6 + $0x1e78] sm:$0xff]  ;;  %3197 = vmatpush.msrb.mxu2 %v1220_v56  ;;  %v1656_v56 = vperm.slane %v4357_v52, 1 }
 0x392   :  { %v1500_v33 = vld [vmem:[#allocation6 + $0x2338] sm:$0xff]  ;;  %3217 = vmatpush.msrb.mxu3 %v1348_v32 }
 0x393   :  { %v1628_v34 = vld [vmem:[#allocation6 + $0x2738] sm:$0xff]  ;;  %3234 = vmatpush.msra.mxu0 %v1500_v33 }
 0x394   :  { %v1212_v36 = vld [vmem:[#allocation6 + $0x1a38] sm:$0xff]  ;;  %3254 = vmatpush.msra.mxu1 %v1628_v34  ;;  %v4360_v34 = vpop.f32.mrf.mxu2 }
 0x395   :  { %v1340_v40 = vld [vmem:[#allocation6 + $0x1e38] sm:$0xff]  ;;  %3198 = vmatpush.msrb.mxu2 %v1212_v36 }
 0x396   :  { %v1492_v41 = vld [vmem:[#allocation6 + $0x22f8] sm:$0xff]  ;;  %3218 = vmatpush.msrb.mxu3 %v1340_v40 }
 0x397   :  { %v1620_v42 = vld [vmem:[#allocation6 + $0x26f8] sm:$0xff]  ;;  %3235 = vmatpush.msra.mxu0 %v1492_v41 }
 0x398   :  { %v1204_v44 = vld [vmem:[#allocation6 + $0x19f8] sm:$0xff]  ;;  %3255 = vmatpush.msra.mxu1 %v1620_v42 }
 0x399   :  { %v1332_v46 = vld [vmem:[#allocation6 + $0x1df8] sm:$0xff]  ;;  %3199 = vmatpush.msrb.mxu2 %v1204_v44  ;;  %v4362_v44 = vpop.f32.mrf.mxu0 }
 0x39a   :  { %v1484_v47 = vld [vmem:[#allocation6 + $0x22b8] sm:$0xff]  ;;  %3219 = vmatpush.msrb.mxu3 %v1332_v46 }
 0x39b   :  { %v1612_v50 = vld [vmem:[#allocation6 + $0x26b8] sm:$0xff]  ;;  %3236 = vmatpush.msra.mxu0 %v1484_v47 }
 0x39c   :  { %v1196_v28 = vld [vmem:[#allocation6 + $0x19b8] sm:$0xff]  ;;  %3256 = vmatpush.msra.mxu1 %v1612_v50  ;;  %v1889_v50 = vadd.f32 %v4297_v43, %v1656_v56 }
 0x39d   :  { %v1324_v29 = vld [vmem:[#allocation6 + $0x1db8] sm:$0xff]  ;;  %3200 = vmatpush.msrb.mxu2 %v1196_v28 }
 0x39e   :  { %v1476_v58 = vld [vmem:[#allocation6 + $0x2278] sm:$0xff]  ;;  %3220 = vmatpush.msrb.mxu3 %v1324_v29 }
 0x39f   :  { %v1604_v60 = vld [vmem:[#allocation6 + $0x2678] sm:$0xff]  ;;  %3237 = vmatpush.msra.mxu0 %v1476_v58 }
 0x3a0   :  { %v1188_v2 = vld [vmem:[#allocation6 + $0x1978] sm:$0xff]  ;;  %3257 = vmatpush.msra.mxu1 %v1604_v60 }
 0x3a1   :  { %v1316_v4 = vld [vmem:[#allocation6 + $0x1d78] sm:$0xff]  ;;  %3201 = vmatpush.msrb.mxu2 %v1188_v2  ;;  %v1657_v2 = vperm.slane %v4357_v52, 2  ;;  %v4379_v56 = vpop.f32.mrf.mxu0 }
 0x3a2   :  { %v1468_v5 = vld [vmem:[#allocation6 + $0x2238] sm:$0xff]  ;;  %3221 = vmatpush.msrb.mxu3 %v1316_v4  ;;  %v1658_v4 = vperm.slane %v4357_v52, 3 }
 0x3a3   :  { %v1596_v6 = vld [vmem:[#allocation6 + $0x2638] sm:$0xff]  ;;  %3238 = vmatpush.msra.mxu0 %v1468_v5  ;;  %v4367_v5 = vpop.f32.mrf.mxu1 }
 0x3a4   :  { %v1180_v49 = vld [vmem:[#allocation6 + $0x1938] sm:$0xff]  ;;  %3258 = vmatpush.msra.mxu1 %v1596_v6  ;;  %v4369_v6 = vpop.f32.mrf.mxu3 }
 0x3a5   :  { %v1308_v10 = vld [vmem:[#allocation6 + $0x1d38] sm:$0xff]  ;;  %3202 = vmatpush.msrb.mxu2 %v1180_v49 }
 0x3a6   :  { %v1460_v11 = vld [vmem:[#allocation6 + $0x21f8] sm:$0xff]  ;;  %3222 = vmatpush.msrb.mxu3 %v1308_v10  ;;  %v1909_v10 = vadd.f32 %v4301_v55, %v1889_v50  ;;  %v2089_v55 = vadd.f32 %v4313_v20, %v1657_v2 }
 0x3a7   :  { %v1588_v12 = vld [vmem:[#allocation6 + $0x25f8] sm:$0xff]  ;;  %3239 = vmatpush.msra.mxu0 %v1460_v11  ;;  %v3307_v11 = vld [vmem:[#allocation9 + $0xe0] sm:$0xff] }
 0x3a8   :  { %v1172_v15 = vld [vmem:[#allocation6 + $0x18f8] sm:$0xff]  ;;  %3259 = vmatpush.msra.mxu1 %v1588_v12  ;;  %v3339_v12 = vld [vmem:[#allocation9 + $0x1e0] sm:$0xff] }
 0x3a9   :  { %v1300_v17 = vld [vmem:[#allocation6 + $0x1cf8] sm:$0xff]  ;;  %3203 = vmatpush.msrb.mxu2 %v1172_v15  ;;  %v4374_v15 = vpop.f32.mrf.mxu2 }
 0x3aa   :  { %v1452_v18 = vld [vmem:[#allocation6 + $0x21b8] sm:$0xff]  ;;  %3223 = vmatpush.msrb.mxu3 %v1300_v17 }
 0x3ab   :  { %v1580_v19 = vld [vmem:[#allocation6 + $0x25b8] sm:$0xff]  ;;  %3240 = vmatpush.msra.mxu0 %v1452_v18 }
 0x3ac   :  { %v1164_v27 = vld [vmem:[#allocation6 + $0x18b8] sm:$0xff]  ;;  %3260 = vmatpush.msra.mxu1 %v1580_v19  ;;  %v1929_v19 = vadd.f32 %v4295_v38, %v1909_v10  ;;  %v3335_v38 = vld [vmem:[#allocation9 + $0x1c0] sm:$0xff] }
 0x3ad   :  { %v1292_v30 = vld [vmem:[#allocation6 + $0x1cb8] sm:$0xff]  ;;  %3204 = vmatpush.msrb.mxu2 %v1164_v27  ;;  %v3399_v10 = vld [vmem:[#allocation9 + $0x3c0] sm:$0xff] }
 0x3ae   :  { %v1444_v32 = vld [vmem:[#allocation6 + $0x2178] sm:$0xff]  ;;  %3224 = vmatpush.msrb.mxu3 %v1292_v30 }
 0x3af   :  { %v1572_v33 = vld [vmem:[#allocation6 + $0x2578] sm:$0xff]  ;;  %3241 = vmatpush.msra.mxu0 %v1444_v32 }
 0x3b0   :  { %v1156_v36 = vld [vmem:[#allocation6 + $0x1878] sm:$0xff]  ;;  %3261 = vmatpush.msra.mxu1 %v1572_v33  ;;  %v3303_v33 = vld [vmem:[#allocation9 + $0xc0] sm:$0xff] }
 0x3b1   :  { %v1284_v40 = vld [vmem:[#allocation6 + $0x1c78] sm:$0xff]  ;;  %3205 = vmatpush.msrb.mxu2 %v1156_v36  ;;  %v1949_v36 = vadd.f32 %v4303_v57, %v1929_v19  ;;  %v3371_v57 = vld [vmem:[#allocation9 + $0x2e0] sm:$0xff] }
 0x3b2   :  { %v1436_v41 = vld [vmem:[#allocation6 + $0x2138] sm:$0xff]  ;;  %3225 = vmatpush.msrb.mxu3 %v1284_v40 }
 0x3b3   :  { %v1564_v42 = vld [vmem:[#allocation6 + $0x2538] sm:$0xff]  ;;  %3242 = vmatpush.msra.mxu0 %v1436_v41 }
 0x3b4   :  { %v1148_v46 = vld [vmem:[#allocation6 + $0x1838] sm:$0xff]  ;;  %3262 = vmatpush.msra.mxu1 %v1564_v42  ;;  %v4384_v42 = vpop.f32.mrf.mxu1 }
 0x3b5   :  { %v1276_v47 = vld [vmem:[#allocation6 + $0x1c38] sm:$0xff]  ;;  %3206 = vmatpush.msrb.mxu2 %v1148_v46  ;;  %v4386_v46 = vpop.f32.mrf.mxu3 }
 0x3b6   :  { %v1428_v28 = vld [vmem:[#allocation6 + $0x20f8] sm:$0xff]  ;;  %3226 = vmatpush.msrb.mxu3 %v1276_v47  ;;  %3207 = vmatmul.f32.vlgmr.msrb.gmra.mxu2 %v4218_v16  ;;  %v2289_v16 = vadd.f32 %v4343_v35, %v1658_v4  ;;  %v2109_v35 = vadd.f32 %v4319_v39, %v2089_v55  ;;  %v3299_v39 = vld [vmem:[#allocation9 + $0xa0] sm:$0xff]  ;;  %v4395_v4 = vpop.f32.mrf.mxu0 }
 0x3b7   :  { %v1556_v29 = vld [vmem:[#allocation6 + $0x24f8] sm:$0xff]  ;;  %3243 = vmatpush.msra.mxu0 %v1428_v28  ;;  %3227 = vmatmul.f32.vlgmr.msrb.gmra.mxu3 %v4220_v22  ;;  %v3403_v28 = vld [vmem:[#allocation9 + $0x3e0] sm:$0xff] }
 0x3b8   :  { %v3309_v58 = vld [vmem:[#allocation9 + $0xf0] sm:$0xff]  ;;  %3263 = vmatpush.msra.mxu1 %v1556_v29  ;;  %v2309_v41 = vadd.f32 %v4345_v51, %v2289_v16  ;;  %v3331_v51 = vld [vmem:[#allocation9 + $0x1a0] sm:$0xff]  ;;  %v2129_v2 = vadd.f32 %v4323_v53, %v2109_v35 }
 0x3b9   :  { %v3341_v60 = vld [vmem:[#allocation9 + $0x1f0] sm:$0xff]  ;;  %3541 = vmatpush.msra.mxu2 %v3309_v58  ;;  %v4391_v58 = vpop.f32.mrf.mxu2 }
 0x3ba   :  { %v1420_v43 = vld [vmem:[#allocation6 + $0x20b8] sm:$0xff]  ;;  %3561 = vmatpush.msra.mxu3 %v3341_v60  ;;  %v2329_v29 = vadd.f32 %v4341_v31, %v2309_v41  ;;  %v1969_v60 = vadd.f32 %v4307_v3, %v1949_v36  ;;  %v3295_v3 = vld [vmem:[#allocation9 + $0x80] sm:$0xff]  ;;  %v2149_v19 = vadd.f32 %v4327_v0, %v2129_v2 }
 0x3bb   :  { %v1548_v49 = vld [vmem:[#allocation6 + $0x24b8] sm:$0xff]  ;;  %3244 = vmatpush.msra.mxu0 %v1420_v43  ;;  %3542 = vmatpush.msra.mxu2 %v3307_v11  ;;  %v3291_v0 = vld [vmem:[#allocation9 + $0x60] sm:$0xff] }
 0x3bc   :  { %v1412_v17 = vld [vmem:[#allocation6 + $0x2078] sm:$0xff]  ;;  %3264 = vmatpush.msra.mxu1 %v1548_v49  ;;  %3562 = vmatpush.msra.mxu3 %v3339_v12  ;;  %v3367_v49 = vld [vmem:[#allocation9 + $0x2c0] sm:$0xff]  ;;  %v2349_v11 = vadd.f32 %v4347_v54, %v2329_v29 }
 0x3bd   :  { %v1540_v18 = vld [vmem:[#allocation6 + $0x2478] sm:$0xff]  ;;  %3245 = vmatpush.msra.mxu0 %v1412_v17  ;;  %v3327_v12 = vld [vmem:[#allocation9 + $0x180] sm:$0xff]  ;;  %v1989_v17 = vadd.f32 %v4309_v13, %v1969_v60 }
 0x3be   :  { %v3305_v27 = vld [vmem:[#allocation9 + $0xd0] sm:$0xff]  ;;  %3265 = vmatpush.msra.mxu1 %v1540_v18  ;;  %v3395_v13 = vld [vmem:[#allocation9 + $0x3a0] sm:$0xff]  ;;  %v2688_v35 = vpop.f32.mrf.mxu0 }
 0x3bf   :  { %v3337_v30 = vld [vmem:[#allocation9 + $0x1d0] sm:$0xff]  ;;  %3543 = vmatpush.msra.mxu2 %v3305_v27  ;;  %v4400_v27 = vpop.f32.mrf.mxu1  ;;  %v2009_v16 = vadd.f32 %v4305_v61, %v1989_v17  ;;  %v3323_v36 = vld [vmem:[#allocation9 + $0x160] sm:$0xff] }
 0x3c0   :  { %v1404_v22 = vld [vmem:[#allocation6 + $0x2038] sm:$0xff]  ;;  %3563 = vmatpush.msra.mxu3 %v3337_v30  ;;  %v4402_v30 = vpop.f32.mrf.mxu3  ;;  %v3319_v29 = vld [vmem:[#allocation9 + $0x140] sm:$0xff] }
 0x3c1   :  { %v1532_v32 = vld [vmem:[#allocation6 + $0x2438] sm:$0xff]  ;;  %3246 = vmatpush.msra.mxu0 %v1404_v22  ;;  %3544 = vmatpush.msra.mxu2 %v3303_v33  ;;  %v3363_v22 = vld [vmem:[#allocation9 + $0x2a0] sm:$0xff]  ;;  %v2369_v33 = vadd.f32 %v4351_v48, %v2349_v11 }
 0x3c2   :  { %3266 = vmatpush.msra.mxu1 %v1532_v32  ;;  %v3373_v40 = vld [vmem:[#allocation9 + $0x2f0] sm:$0xff]  ;;  %3247 = vmatmul.f32.vlgmr.msra.gmra.mxu0 %v4224_v59  ;;  %v2169_v32 = vadd.f32 %v4321_v45, %v2149_v19  ;;  %v3359_v45 = vld [vmem:[#allocation9 + $0x280] sm:$0xff] }
 0x3c3   :  { %v3405_v20 = vld [vmem:[#allocation9 + $0x3f0] sm:$0xff]  ;;  %3267 = vmatmul.f32.vlgmr.msra.gmra.mxu1 %v4226_v63  ;;  %3564 = vmatpush.msra.mxu3 %v3335_v38  ;;  %v4407_v38 = vpop.f32.mrf.mxu2  ;;  %v3391_v48 = vld [vmem:[#allocation9 + $0x380] sm:$0xff] }
 0x3c4   :  { %v3301_v47 = vld [vmem:[#allocation9 + $0xb0] sm:$0xff]  ;;  %3581 = vmatpush.msrb.mxu0 %v3373_v40  ;;  %3601 = vmatpush.msrb.mxu1 %v3405_v20  ;;  %v3355_v2 = vld [vmem:[#allocation9 + $0x260] sm:$0xff] }
 0x3c5   :  { %v3333_v50 = vld [vmem:[#allocation9 + $0x1b0] sm:$0xff]  ;;  %3545 = vmatpush.msra.mxu2 %v3301_v47  ;;  %v2029_v47 = vadd.f32 %v4311_v14, %v2009_v16  ;;  %v3315_v11 = vld [vmem:[#allocation9 + $0x120] sm:$0xff] }
 0x3c6   :  { %3565 = vmatpush.msra.mxu3 %v3333_v50  ;;  %v3369_v59 = vld [vmem:[#allocation9 + $0x2d0] sm:$0xff]  ;;  %3582 = vmatpush.msrb.mxu0 %v3371_v57  ;;  %v2189_v50 = vadd.f32 %v4329_v1, %v2169_v32  ;;  %v2389_v57 = vadd.f32 %v4353_v21, %v2369_v33 }
 0x3c7   :  { %v3401_v63 = vld [vmem:[#allocation9 + $0x3d0] sm:$0xff]  ;;  %3602 = vmatpush.msrb.mxu1 %v3403_v28  ;;  %3546 = vmatpush.msra.mxu2 %v3299_v39  ;;  %v3287_v28 = vld [vmem:[#allocation9 + $0x40] sm:$0xff]  ;;  %v2049_v21 = vadd.f32 %v4315_v26, %v2029_v47 }
 0x3c8   :  { %v3297_v43 = vld [vmem:[#allocation9 + $0x90] sm:$0xff]  ;;  %3566 = vmatpush.msra.mxu3 %v3331_v51  ;;  %3583 = vmatpush.msrb.mxu0 %v3369_v59  ;;  %v2409_v60 = vadd.f32 %v4349_v62, %v2389_v57  ;;  %v4413_v59 = vpop.f32.mrf.mxu1  ;;  %v4415_v14 = vpop.f32.mrf.mxu3  ;;  %v3283_v62 = vld [vmem:[#allocation9 + $0x20] sm:$0xff] }
 0x3c9   :  { %v3329_v31 = vld [vmem:[#allocation9 + $0x190] sm:$0xff]  ;;  %3603 = vmatpush.msrb.mxu1 %v3401_v63  ;;  %3547 = vmatpush.msra.mxu2 %v3297_v43  ;;  %v3387_v43 = vld [vmem:[#allocation9 + $0x360] sm:$0xff]  ;;  %v4427_v19 = vadd.f32 %v4317_v37, %v2049_v21 }
 0x3ca   :  { %3567 = vmatpush.msra.mxu3 %v3329_v31  ;;  %v3365_v53 = vld [vmem:[#allocation9 + $0x2b0] sm:$0xff]  ;;  %3584 = vmatpush.msrb.mxu0 %v3367_v49  ;;  %v2209_v31 = vadd.f32 %v4333_v9, %v2189_v50  ;;  %v1659_v49 = vperm.slane %v4357_v52, 4  ;;  %v2429_v17 = vadd.f32 %v4355_v25, %v2409_v60  ;;  %v3279_v25 = vld [vmem:[#allocation9] sm:$0xff] }
 0x3cb   :  { %v3397_v18 = vld [vmem:[#allocation9 + $0x3b0] sm:$0xff]  ;;  %3604 = vmatpush.msrb.mxu1 %v3399_v10  ;;  %3548 = vmatpush.msra.mxu2 %v3295_v3  ;;  %v4420_v10 = vpop.f32.mrf.mxu2  ;;  %v1660_v3 = vperm.slane %v4357_v52, 5  ;;  %v3467_v50 = vld [vmem:[#allocation9 + $0x5e0] sm:$0xff] }
 0x3cc   :  { %v3293_v55 = vld [vmem:[#allocation9 + $0x70] sm:$0xff]  ;;  %3568 = vmatpush.msra.mxu3 %v3327_v12  ;;  %3585 = vmatpush.msrb.mxu0 %v3365_v53  ;;  %v4424_v53 = vpop.f32.mrf.mxu0  ;;  %v2229_v16 = vadd.f32 %v4337_v23, %v2209_v31  ;;  %v3271_v23 = vmax.f32 %v4247_v8, 0.0  ;;  %v3431_v31 = vld [vmem:[#allocation9 + $0x4c0] sm:$0xff]  ;;  %v3432_v8 = vld [vmem:[#allocation9 + $0x4c8] sm:$0xff] }
 0x3cd   :  { %v3325_v54 = vld [vmem:[#allocation9 + $0x170] sm:$0xff]  ;;  %3605 = vmatpush.msrb.mxu1 %v3397_v18  ;;  %3549 = vmatpush.msra.mxu2 %v3293_v55  ;;  %v3351_v55 = vld [vmem:[#allocation9 + $0x240] sm:$0xff]  ;;  %v2689_v32 = vadd.f32 %v2688_v35, %v1660_v3  ;;  %v1661_v35 = vperm.slane %v4357_v52, 6 }
 0x3ce   :  { %3569 = vmatpush.msra.mxu3 %v3325_v54  ;;  %v3361_v40 = vld [vmem:[#allocation9 + $0x290] sm:$0xff]  ;;  %3586 = vmatpush.msrb.mxu0 %v3363_v22  ;;  %v3383_v54 = vld [vmem:[#allocation9 + $0x340] sm:$0xff]  ;;  %v2489_v22 = vadd.f32 %v4360_v34, %v1659_v49  ;;  %v2249_v37 = vadd.f32 %v4331_v7, %v2229_v16  ;;  %v3272_v34 = vmax.f32 %v4427_v19, 0.0  ;;  %v3430_v19 = vld [vmem:[#allocation9 + $0x4b8] sm:$0xff] }
 0x3cf   :  { %v3393_v20 = vld [vmem:[#allocation9 + $0x390] sm:$0xff]  ;;  %3606 = vmatpush.msrb.mxu1 %v3395_v13  ;;  %3550 = vmatpush.msra.mxu2 %v3291_v0  ;;  %v3311_v13 = vld [vmem:[#allocation9 + $0x100] sm:$0xff] }
 0x3d0   :  { %v3289_v61 = vld [vmem:[#allocation9 + $0x50] sm:$0xff]  ;;  %3570 = vmatpush.msra.mxu3 %v3323_v36  ;;  %3587 = vmatpush.msrb.mxu0 %v3361_v40  ;;  %v2449_v36 = vadd.f32 %v4362_v44, %v2429_v17  ;;  %v4433_v40 = vpop.f32.mrf.mxu1  ;;  %v2509_v7 = vadd.f32 %v4369_v6, %v2489_v22  ;;  %v3347_v44 = vld [vmem:[#allocation9 + $0x220] sm:$0xff]  ;;  %v4447_v57 = vadd.f32 %v4339_v24, %v2249_v37 }
 0x3d1   :  { %v3321_v41 = vld [vmem:[#allocation9 + $0x150] sm:$0xff]  ;;  %3607 = vmatpush.msrb.mxu1 %v3393_v20  ;;  %3551 = vmatpush.msra.mxu2 %v3289_v61  ;;  %v4435_v20 = vpop.f32.mrf.mxu3  ;;  %v3435_v52 = vld [vmem:[#allocation9 + $0x4e0] sm:$0xff] }
 0x3d2   :  { %3571 = vmatpush.msra.mxu3 %v3321_v41  ;;  %v3357_v39 = vld [vmem:[#allocation9 + $0x270] sm:$0xff]  ;;  %3588 = vmatpush.msrb.mxu0 %v3359_v45  ;;  %v3379_v45 = vld [vmem:[#allocation9 + $0x320] sm:$0xff]  ;;  %v4450_v6 = vadd.f32 %v4367_v5, %v2449_v36  ;;  %v3273_v21 = vmax.f32 %v4447_v57, 0.0  ;;  %v3458_v57 = vld [vmem:[#allocation9 + $0x598] sm:$0xff] }
 0x3d3   :  { %v3389_v51 = vld [vmem:[#allocation9 + $0x370] sm:$0xff]  ;;  %3608 = vmatpush.msrb.mxu1 %v3391_v48  ;;  %3552 = vmatpush.msra.mxu2 %v3287_v28  ;;  %v2888_v47 = vpop.f32.mrf.mxu2  ;;  %v2709_v48 = vadd.f32 %v4413_v59, %v2689_v32  ;;  %v3343_v24 = vld [vmem:[#allocation9 + $0x200] sm:$0xff] }
 0x3d4   :  { %v3285_v63 = vld [vmem:[#allocation9 + $0x30] sm:$0xff]  ;;  %3572 = vmatpush.msra.mxu3 %v3319_v29  ;;  %3589 = vmatpush.msrb.mxu0 %v3357_v39  ;;  %v4452_v28 = vpop.f32.mrf.mxu0  ;;  %v2889_v60 = vadd.f32 %v2888_v47, %v1661_v35  ;;  %v3375_v5 = vld [vmem:[#allocation9 + $0x300] sm:$0xff] }
 0x3d5   :  { %v3317_v1 = vld [vmem:[#allocation9 + $0x130] sm:$0xff]  ;;  %3609 = vmatpush.msrb.mxu1 %v3389_v51  ;;  %3553 = vmatpush.msra.mxu2 %v3285_v63  ;;  %v2729_v51 = vadd.f32 %v4407_v38, %v2709_v48  ;;  %v3463_v49 = vld [vmem:[#allocation9 + $0x5c0] sm:$0xff] }
 0x3d6   :  { %3573 = vmatpush.msra.mxu3 %v3317_v1  ;;  %v3353_v12 = vld [vmem:[#allocation9 + $0x250] sm:$0xff]  ;;  %3590 = vmatpush.msrb.mxu0 %v3355_v2  ;;  %v2529_v1 = vadd.f32 %v4379_v56, %v2509_v7  ;;  %v3274_v2 = vmax.f32 %v4450_v6, 0.0  ;;  %v3499_v17 = vld [vmem:[#allocation9 + $0x6e0] sm:$0xff]  ;;  %v3506_v6 = vld [vmem:[#allocation9 + $0x718] sm:$0xff] }
 0x3d7   :  { %v3385_v26 = vld [vmem:[#allocation9 + $0x350] sm:$0xff]  ;;  %3610 = vmatpush.msrb.mxu1 %v3387_v43  ;;  %3554 = vmatpush.msra.mxu2 %v3283_v62  ;;  %v2749_v62 = vadd.f32 %v4415_v14, %v2729_v51  ;;  %v3455_v37 = vld [vmem:[#allocation9 + $0x580] sm:$0xff] }
 0x3d8   :  { %v3281_v9 = vld [vmem:[#allocation9 + $0x10] sm:$0xff]  ;;  %3574 = vmatpush.msra.mxu3 %v3315_v11  ;;  %3591 = vmatpush.msrb.mxu0 %v3353_v12  ;;  %v4458_v43 = vpop.f32.mrf.mxu1  ;;  %v2549_v3 = vadd.f32 %v4384_v42, %v2529_v1  ;;  %v3451_v48 = vld [vmem:[#allocation9 + $0x560] sm:$0xff] }
 0x3d9   :  { %v3313_v18 = vld [vmem:[#allocation9 + $0x110] sm:$0xff]  ;;  %3611 = vmatpush.msrb.mxu1 %v3385_v26  ;;  %3555 = vmatpush.msra.mxu2 %v3281_v9  ;;  %v2908_v38 = vpop.f32.mrf.mxu3  ;;  %v3531_v1 = vld [vmem:[#allocation9 + $0x7e0] sm:$0xff] }
 0x3da   :  { %3575 = vmatpush.msra.mxu3 %v3313_v18  ;;  %v3349_v33 = vld [vmem:[#allocation9 + $0x230] sm:$0xff]  ;;  %3592 = vmatpush.msrb.mxu0 %v3351_v55  ;;  %v2909_v56 = vadd.f32 %v2908_v38, %v2889_v60  ;;  %v2569_v9 = vadd.f32 %v4374_v15, %v2549_v3  ;;  %v3427_v18 = vld [vmem:[#allocation9 + $0x4a0] sm:$0xff] }
 0x3db   :  { %v3381_v0 = vld [vmem:[#allocation9 + $0x330] sm:$0xff]  ;;  %3612 = vmatpush.msrb.mxu1 %v3383_v54  ;;  %3556 = vmatpush.msra.mxu2 %v3279_v25  ;;  %v3459_v55 = vld [vmem:[#allocation9 + $0x5a0] sm:$0xff]  ;;  %v2769_v54 = vadd.f32 %v4424_v53, %v2749_v62  ;;  %v2968_v15 = vpop.f32.mrf.mxu2 }
 0x3dc   :  { %3576 = vmatpush.msra.mxu3 %v3311_v13  ;;  %v3437_v61 = vld [vmem:[#allocation9 + $0x4f0] sm:$0xff]  ;;  %3593 = vmatpush.msrb.mxu0 %v3349_v33  ;;  %v2928_v14 = vpop.f32.mrf.mxu0  ;;  %v3495_v13 = vld [vmem:[#allocation9 + $0x6c0] sm:$0xff]  ;;  %v2589_v32 = vadd.f32 %v4386_v46, %v2569_v9 }
 0x3dd   :  { %v3469_v41 = vld [vmem:[#allocation9 + $0x5f0] sm:$0xff]  ;;  %3613 = vmatpush.msrb.mxu1 %v3381_v0  ;;  %3557 = vmatmul.f32.vlgmr.msra.gmra.mxu2 %v3271_v23  ;;  %v2929_v42 = vadd.f32 %v2928_v14, %v2909_v56  ;;  %v3423_v0 = vld [vmem:[#allocation9 + $0x480] sm:$0xff]  ;;  %v2789_v36 = vadd.f32 %v4433_v40, %v2769_v54 }
 0x3de   :  { %3577 = vmatmul.f32.vlgmr.msra.gmra.mxu3 %v3272_v34  ;;  %3621 = vmatpush.msrb.mxu2 %v3437_v61  ;;  %v3345_v29 = vld [vmem:[#allocation9 + $0x210] sm:$0xff]  ;;  %v3491_v46 = vld [vmem:[#allocation9 + $0x6a0] sm:$0xff] }
 0x3df   :  { %3641 = vmatpush.msrb.mxu3 %v3469_v41  ;;  %v3377_v39 = vld [vmem:[#allocation9 + $0x310] sm:$0xff]  ;;  %3594 = vmatpush.msrb.mxu0 %v3347_v44  ;;  %v2809_v7 = vadd.f32 %v4420_v10, %v2789_v36  ;;  %v2609_v44 = vadd.f32 %v4395_v4, %v2589_v32  ;;  %v3487_v60 = vld [vmem:[#allocation9 + $0x680] sm:$0xff]  ;;  %v3308_v36 = vld [vmem:[#allocation9 + $0xe8] sm:$0xff] }
 0x3e0   :  { %3614 = vmatpush.msrb.mxu1 %v3379_v45  ;;  %v3433_v59 = vld [vmem:[#allocation9 + $0x4d0] sm:$0xff]  ;;  %3622 = vmatpush.msrb.mxu2 %v3435_v52  ;;  %v2948_v33 = vpop.f32.mrf.mxu1  ;;  %v3419_v45 = vld [vmem:[#allocation9 + $0x460] sm:$0xff] }
 0x3e1   :  { %v3465_v63 = vld [vmem:[#allocation9 + $0x5d0] sm:$0xff]  ;;  %3642 = vmatpush.msrb.mxu3 %v3467_v50  ;;  %3595 = vmatpush.msrb.mxu0 %v3345_v29  ;;  %v2949_v53 = vadd.f32 %v2948_v33, %v2929_v42  ;;  %v2988_v52 = vpop.f32.mrf.mxu3  ;;  %v2829_v51 = vadd.f32 %v4435_v20, %v2809_v7  ;;  %v3415_v4 = vld [vmem:[#allocation9 + $0x440] sm:$0xff]  ;;  %v3310_v33 = vld [vmem:[#allocation9 + $0xf8] sm:$0xff] }
 0x3e2   :  { %3615 = vmatpush.msrb.mxu1 %v3377_v39  ;;  %3623 = vmatpush.msrb.mxu2 %v3433_v59  ;;  %v3501_v11 = vld [vmem:[#allocation9 + $0x6f0] sm:$0xff]  ;;  %v2629_v59 = vadd.f32 %v4400_v27, %v2609_v44  ;;  %v3483_v27 = vld [vmem:[#allocation9 + $0x660] sm:$0xff]  ;;  %v3306_v7 = vld [vmem:[#allocation9 + $0xd8] sm:$0xff] }
 0x3e3   :  { %3643 = vmatpush.msrb.mxu3 %v3465_v63  ;;  %3596 = vmatpush.msrb.mxu0 %v3343_v24  ;;  %v3429_v12 = vld [vmem:[#allocation9 + $0x4b0] sm:$0xff]  ;;  %v2969_v47 = vadd.f32 %v2968_v15, %v2949_v53  ;;  %v3447_v63 = vld [vmem:[#allocation9 + $0x540] sm:$0xff]  ;;  %v2849_v62 = vadd.f32 %v4452_v28, %v2829_v51  ;;  %v3342_v15 = vld [vmem:[#allocation9 + $0x1f8] sm:$0xff] }
 0x3e4   :  { %3616 = vmatpush.msrb.mxu1 %v3375_v5  ;;  %3597 = vmatmul.f32.vlgmr.msrb.gmra.mxu0 %v3273_v21  ;;  %v3461_v26 = vld [vmem:[#allocation9 + $0x5b0] sm:$0xff]  ;;  %v2649_v5 = vadd.f32 %v4391_v58, %v2629_v59  ;;  %v3008_v38 = vpop.f32.mrf.mxu0  ;;  %v3443_v3 = vld [vmem:[#allocation9 + $0x520] sm:$0xff]  ;;  %v3332_v59 = vld [vmem:[#allocation9 + $0x1a8] sm:$0xff] }
 0x3e5   :  { %3617 = vmatmul.f32.vlgmr.msrb.gmra.mxu1 %v3274_v2  ;;  %3624 = vmatpush.msrb.mxu2 %v3431_v31  ;;  %v3497_v16 = vld [vmem:[#allocation9 + $0x6d0] sm:$0xff]  ;;  %v2989_v10 = vadd.f32 %v2988_v52, %v2969_v47  ;;  %v3479_v54 = vld [vmem:[#allocation9 + $0x640] sm:$0xff]  ;;  %v3336_v52 = vld [vmem:[#allocation9 + $0x1c8] sm:$0xff] }
 0x3e6   :  { %3644 = vmatpush.msrb.mxu3 %v3463_v49  ;;  %3661 = vmatpush.msra.mxu0 %v3501_v11  ;;  %v3425_v22 = vld [vmem:[#allocation9 + $0x490] sm:$0xff]  ;;  %v3411_v11 = vld [vmem:[#allocation9 + $0x420] sm:$0xff] }
 0x3e7   :  { %3625 = vmatpush.msrb.mxu2 %v3429_v12  ;;  %v3457_v25 = vld [vmem:[#allocation9 + $0x590] sm:$0xff]  ;;  %v3009_v56 = vadd.f32 %v3008_v38, %v2989_v10  ;;  %v3527_v12 = vld [vmem:[#allocation9 + $0x7c0] sm:$0xff]  ;;  %v3300_v10 = vld [vmem:[#allocation9 + $0xa8] sm:$0xff] }
 0x3e8   :  { %3645 = vmatpush.msrb.mxu3 %v3461_v26  ;;  %3662 = vmatpush.msra.mxu0 %v3499_v17  ;;  %v3493_v35 = vld [vmem:[#allocation9 + $0x6b0] sm:$0xff]  ;;  %v4477_v26 = vadd.f32 %v4402_v30, %v2649_v5  ;;  %v3028_v17 = vpop.f32.mrf.mxu1  ;;  %v3407_v42 = vld [vmem:[#allocation9 + $0x400] sm:$0xff]  ;;  %v3296_v38 = vld [vmem:[#allocation9 + $0x88] sm:$0xff] }
 0x3e9   :  { %3626 = vmatpush.msrb.mxu2 %v3427_v18  ;;  %v3421_v61 = vld [vmem:[#allocation9 + $0x470] sm:$0xff]  ;;  %v4480_v18 = vadd.f32 %v4458_v43, %v2849_v62  ;;  %v3523_v30 = vld [vmem:[#allocation9 + $0x7a0] sm:$0xff]  ;;  %v3294_v62 = vld [vmem:[#allocation9 + $0x78] sm:$0xff] }
 0x3ea   :  { %3646 = vmatpush.msrb.mxu3 %v3459_v55  ;;  %3663 = vmatpush.msra.mxu0 %v3497_v16  ;;  %v3453_v41 = vld [vmem:[#allocation9 + $0x570] sm:$0xff]  ;;  %v3029_v55 = vadd.f32 %v3028_v17, %v3009_v56  ;;  %v3439_v16 = vld [vmem:[#allocation9 + $0x500] sm:$0xff]  ;;  %v3275_v32 = vmax.f32 %v4477_v26, 0.0  ;;  %v3364_v56 = vld [vmem:[#allocation9 + $0x2a8] sm:$0xff] }
 0x3eb   :  { %3627 = vmatpush.msrb.mxu2 %v3425_v22  ;;  %v3489_v40 = vld [vmem:[#allocation9 + $0x690] sm:$0xff]  ;;  %v3048_v22 = vpop.f32.mrf.mxu2  ;;  %v3276_v43 = vmax.f32 %v4480_v18, 0.0  ;;  %v3519_v47 = vld [vmem:[#allocation9 + $0x780] sm:$0xff]  ;;  %v3532_v18 = vld [vmem:[#allocation9 + $0x7e8] sm:$0xff] }
 0x3ec   :  { %3647 = vmatpush.msrb.mxu3 %v3457_v25  ;;  %3664 = vmatpush.msra.mxu0 %v3495_v13  ;;  %v3417_v50 = vld [vmem:[#allocation9 + $0x450] sm:$0xff]  ;;  %v3049_v13 = vadd.f32 %v3048_v22, %v3029_v55  ;;  %v3471_v44 = vld [vmem:[#allocation9 + $0x600] sm:$0xff] }
 0x3ed   :  { %3628 = vmatpush.msrb.mxu2 %v3423_v0  ;;  %v3449_v29 = vld [vmem:[#allocation9 + $0x550] sm:$0xff]  ;;  %v3475_v0 = vld [vmem:[#allocation9 + $0x620] sm:$0xff] }
 0x3ee   :  { %3648 = vmatpush.msrb.mxu3 %v3455_v37  ;;  %3665 = vmatpush.msra.mxu0 %v3493_v35  ;;  %v3533_v39 = vld [vmem:[#allocation9 + $0x7f0] sm:$0xff]  ;;  %v3068_v37 = vpop.f32.mrf.mxu3  ;;  %v3507_v17 = vld [vmem:[#allocation9 + $0x720] sm:$0xff] }
 0x3ef   :  { %3629 = vmatpush.msrb.mxu2 %v3421_v61  ;;  %3681 = vmatpush.msra.mxu1 %v3533_v39  ;;  %v3485_v24 = vld [vmem:[#allocation9 + $0x670] sm:$0xff]  ;;  %v4486_v53 = vadd.f32 %v3068_v37, %v3049_v13  ;;  %v3340_v61 = vld [vmem:[#allocation9 + $0x1e8] sm:$0xff]  ;;  %v3334_v39 = vld [vmem:[#allocation9 + $0x1b8] sm:$0xff] }
 0x3f0   :  { %3649 = vmatpush.msrb.mxu3 %v3453_v41  ;;  %3666 = vmatpush.msra.mxu0 %v3491_v46  ;;  %v3413_v31 = vld [vmem:[#allocation9 + $0x430] sm:$0xff]  ;;  %v3338_v46 = vld [vmem:[#allocation9 + $0x1d8] sm:$0xff]  ;;  %v3503_v22 = vld [vmem:[#allocation9 + $0x700] sm:$0xff] }
 0x3f1   :  { %3630 = vmatpush.msrb.mxu2 %v3419_v45  ;;  %v3445_v20 = vld [vmem:[#allocation9 + $0x530] sm:$0xff]  ;;  %3682 = vmatpush.msra.mxu1 %v3531_v1  ;;  %v3304_v45 = vld [vmem:[#allocation9 + $0xc8] sm:$0xff]  ;;  %v3318_v13 = vld [vmem:[#allocation9 + $0x138] sm:$0xff] }
 0x3f2   :  { %3650 = vmatpush.msrb.mxu3 %v3451_v48  ;;  %3667 = vmatpush.msra.mxu0 %v3489_v40  ;;  %v3529_v49 = vld [vmem:[#allocation9 + $0x7d0] sm:$0xff]  ;;  %v3374_v48 = vld [vmem:[#allocation9 + $0x2f8] sm:$0xff]  ;;  %v3277_v40 = vmax.f32 %v4486_v53, 0.0  ;;  %v3368_v1 = vld [vmem:[#allocation9 + $0x2c8] sm:$0xff] }
 0x3f3   :  { %3631 = vmatpush.msrb.mxu2 %v3417_v50  ;;  %3683 = vmatpush.msra.mxu1 %v3529_v49  ;;  %v3481_v58 = vld [vmem:[#allocation9 + $0x650] sm:$0xff]  ;;  %v3302_v50 = vld [vmem:[#allocation9 + $0xb8] sm:$0xff]  ;;  %v3511_v49 = vld [vmem:[#allocation9 + $0x740] sm:$0xff] }
 0x3f4   :  { %3651 = vmatpush.msrb.mxu3 %v3449_v29  ;;  %3668 = vmatpush.msra.mxu0 %v3487_v60  ;;  %v3409_v9 = vld [vmem:[#allocation9 + $0x410] sm:$0xff]  ;;  %v3372_v29 = vld [vmem:[#allocation9 + $0x2e8] sm:$0xff]  ;;  %v3370_v60 = vld [vmem:[#allocation9 + $0x2d8] sm:$0xff] }
 0x3f5   :  { %3632 = vmatpush.msrb.mxu2 %v3415_v4  ;;  %v3441_v14 = vld [vmem:[#allocation9 + $0x510] sm:$0xff]  ;;  %3684 = vmatpush.msra.mxu1 %v3527_v12  ;;  %v3515_v4 = vld [vmem:[#allocation9 + $0x760] sm:$0xff]  ;;  %v3362_v12 = vld [vmem:[#allocation9 + $0x298] sm:$0xff] }
 0x3f6   :  { %3652 = vmatpush.msrb.mxu3 %v3447_v63  ;;  %3669 = vmatpush.msra.mxu0 %v3485_v24  ;;  %v3525_v28 = vld [vmem:[#allocation9 + $0x7b0] sm:$0xff]  ;;  %v3298_v63 = vld [vmem:[#allocation9 + $0x98] sm:$0xff]  ;;  %v3316_v37 = vld [vmem:[#allocation9 + $0x128] sm:$0xff] }
 0x3f7   :  { %3633 = vmatpush.msrb.mxu2 %v3413_v31  ;;  %3685 = vmatpush.msra.mxu1 %v3525_v28  ;;  %v3477_v25 = vld [vmem:[#allocation9 + $0x630] sm:$0xff]  ;;  %v3330_v24 = vld [vmem:[#allocation9 + $0x198] sm:$0xff]  ;;  %v3520_v53 = vld [vmem:[#allocation9 + $0x788] sm:$0xff] }
 0x3f8   :  { %3653 = vmatpush.msrb.mxu3 %v3445_v20  ;;  %3670 = vmatpush.msra.mxu0 %v3483_v27  ;;  %v3521_v35 = vld [vmem:[#allocation9 + $0x790] sm:$0xff]  ;;  %v3366_v31 = vld [vmem:[#allocation9 + $0x2b8] sm:$0xff]  ;;  %v3328_v20 = vld [vmem:[#allocation9 + $0x188] sm:$0xff] }
 0x3f9   :  { %3634 = vmatpush.msrb.mxu2 %v3411_v11  ;;  %3686 = vmatpush.msra.mxu1 %v3523_v30  ;;  %v3473_v41 = vld [vmem:[#allocation9 + $0x610] sm:$0xff]  ;;  %v3326_v27 = vld [vmem:[#allocation9 + $0x178] sm:$0xff] }
 0x3fa   :  { %3654 = vmatpush.msrb.mxu3 %v3443_v3  ;;  %3671 = vmatpush.msra.mxu0 %v3481_v58  ;;  %v3517_v51 = vld [vmem:[#allocation9 + $0x770] sm:$0xff]  ;;  %v3292_v3 = vld [vmem:[#allocation9 + $0x68] sm:$0xff]  ;;  %v3322_v28 = vld [vmem:[#allocation9 + $0x158] sm:$0xff] }
 0x3fb   :  { %3635 = vmatpush.msrb.mxu2 %v3409_v9  ;;  %3687 = vmatpush.msra.mxu1 %v3521_v35  ;;  %v3513_v5 = vld [vmem:[#allocation9 + $0x750] sm:$0xff]  ;;  %v3324_v58 = vld [vmem:[#allocation9 + $0x168] sm:$0xff]  ;;  %v3290_v9 = vld [vmem:[#allocation9 + $0x58] sm:$0xff] }
 0x3fc   :  { %3655 = vmatpush.msrb.mxu3 %v3441_v14  ;;  %3672 = vmatpush.msra.mxu0 %v3479_v54  ;;  %v3509_v11 = vld [vmem:[#allocation9 + $0x730] sm:$0xff]  ;;  %v3360_v14 = vld [vmem:[#allocation9 + $0x288] sm:$0xff]  ;;  %v3286_v30 = vld [vmem:[#allocation9 + $0x38] sm:$0xff] }
 0x3fd   :  { %3636 = vmatpush.msrb.mxu2 %v3407_v42  ;;  %3688 = vmatpush.msra.mxu1 %v3519_v47  ;;  %v3505_v55 = vld [vmem:[#allocation9 + $0x710] sm:$0xff]  ;;  %v3288_v54 = vld [vmem:[#allocation9 + $0x48] sm:$0xff]  ;;  %v3358_v42 = vld [vmem:[#allocation9 + $0x278] sm:$0xff] }
 0x3fe   :  { %3656 = vmatpush.msrb.mxu3 %v3439_v16  ;;  %3673 = vmatpush.msra.mxu0 %v3477_v25  ;;  %v3320_v16 = vld [vmem:[#allocation9 + $0x148] sm:$0xff]  ;;  %v3282_v35 = vld [vmem:[#allocation9 + $0x18] sm:$0xff] }
 0x3ff   :  { %3637 = vmatmul.f32.vlgmr.msrb.gmra.mxu2 %v3275_v32  ;;  %3657 = vmatmul.f32.vlgmr.msrb.gmra.mxu3 %v3276_v43  ;;  %v3356_v25 = vld [vmem:[#allocation9 + $0x268] sm:$0xff] }
 0x400   :  { %3701 = vmatpush.msra.mxu2 %v3310_v33  ;;  %3721 = vmatpush.msra.mxu3 %v3342_v15  ;;  %v3406_v33 = vld [vmem:[#allocation9 + $0x3f8] sm:$0xff]  ;;  %v3284_v15 = vld [vmem:[#allocation9 + $0x28] sm:$0xff] }
 0x401   :  { %3674 = vmatpush.msra.mxu0 %v3475_v0  ;;  %3689 = vmatpush.msra.mxu1 %v3517_v51  ;;  %v3354_v0 = vld [vmem:[#allocation9 + $0x258] sm:$0xff]  ;;  %v3280_v47 = vld [vmem:[#allocation9 + $0x8] sm:$0xff] }
 0x402   :  { %3702 = vmatpush.msra.mxu2 %v3308_v36  ;;  %3722 = vmatpush.msra.mxu3 %v3340_v61  ;;  %v3404_v36 = vld [vmem:[#allocation9 + $0x3e8] sm:$0xff]  ;;  %v3346_v51 = vld [vmem:[#allocation9 + $0x218] sm:$0xff] }
 0x403   :  { %3675 = vmatpush.msra.mxu0 %v3473_v41  ;;  %3690 = vmatpush.msra.mxu1 %v3515_v4  ;;  %v3352_v61 = vld [vmem:[#allocation9 + $0x248] sm:$0xff]  ;;  %v3314_v41 = vld [vmem:[#allocation9 + $0x118] sm:$0xff] }
 0x404   :  { %3703 = vmatpush.msra.mxu2 %v3306_v7  ;;  %3723 = vmatpush.msra.mxu3 %v3338_v46  ;;  %v3402_v7 = vld [vmem:[#allocation9 + $0x3d8] sm:$0xff]  ;;  %v3344_v4 = vld [vmem:[#allocation9 + $0x208] sm:$0xff] }
 0x405   :  { %3676 = vmatpush.msra.mxu0 %v3471_v44  ;;  %3691 = vmatpush.msra.mxu1 %v3513_v5  ;;  %v3350_v46 = vld [vmem:[#allocation9 + $0x238] sm:$0xff]  ;;  %v3312_v44 = vld [vmem:[#allocation9 + $0x108] sm:$0xff] }
 0x406   :  { %3704 = vmatpush.msra.mxu2 %v3304_v45  ;;  %3724 = vmatpush.msra.mxu3 %v3336_v52  ;;  %v3438_v45 = vld [vmem:[#allocation9 + $0x4f8] sm:$0xff]  ;;  %v3348_v52 = vld [vmem:[#allocation9 + $0x228] sm:$0xff] }
 0x407   :  { %3741 = vmatpush.msrb.mxu0 %v3374_v48  ;;  %3692 = vmatpush.msra.mxu1 %v3511_v49  ;;  %v3470_v48 = vld [vmem:[#allocation9 + $0x5f8] sm:$0xff]  ;;  %v3428_v5 = vld [vmem:[#allocation9 + $0x4a8] sm:$0xff] }
 0x408   :  { %3677 = vmatmul.f32.vlgmr.msra.gmra.mxu0 %v3277_v40  ;;  %3705 = vmatpush.msra.mxu2 %v3302_v50  ;;  %v3436_v50 = vld [vmem:[#allocation9 + $0x4e8] sm:$0xff] }
 0x409   :  { %3742 = vmatpush.msrb.mxu0 %v3372_v29  ;;  %3725 = vmatpush.msra.mxu3 %v3334_v39  ;;  %v3400_v29 = vld [vmem:[#allocation9 + $0x3c8] sm:$0xff] }
 0x40a   :  { %3706 = vmatpush.msra.mxu2 %v3300_v10  ;;  %3693 = vmatpush.msra.mxu1 %v3509_v11  ;;  %v3468_v39 = vld [vmem:[#allocation9 + $0x5e8] sm:$0xff]  ;;  %v3434_v10 = vld [vmem:[#allocation9 + $0x4d8] sm:$0xff] }
 0x40b   :  { %3743 = vmatpush.msrb.mxu0 %v3370_v60  ;;  %3726 = vmatpush.msra.mxu3 %v3332_v59  ;;  %v3398_v60 = vld [vmem:[#allocation9 + $0x3b8] sm:$0xff]  ;;  %v3460_v49 = vld [vmem:[#allocation9 + $0x5a8] sm:$0xff] }
 0x40c   :  { %3707 = vmatpush.msra.mxu2 %v3298_v63  ;;  %3694 = vmatpush.msra.mxu1 %v3507_v17  ;;  %v3466_v59 = vld [vmem:[#allocation9 + $0x5d8] sm:$0xff]  ;;  %v3392_v11 = vld [vmem:[#allocation9 + $0x388] sm:$0xff] }
 0x40d   :  { %3744 = vmatpush.msrb.mxu0 %v3368_v1  ;;  %3727 = vmatpush.msra.mxu3 %v3330_v24  ;;  %v3502_v63 = vld [vmem:[#allocation9 + $0x6f8] sm:$0xff]  ;;  %v3500_v24 = vld [vmem:[#allocation9 + $0x6e8] sm:$0xff] }
 0x40e   :  { %3708 = vmatpush.msra.mxu2 %v3296_v38  ;;  %3695 = vmatpush.msra.mxu1 %v3505_v55  ;;  %v3462_v1 = vld [vmem:[#allocation9 + $0x5b8] sm:$0xff]  ;;  %v3456_v17 = vld [vmem:[#allocation9 + $0x588] sm:$0xff] }
 0x40f   :  { %3745 = vmatpush.msrb.mxu0 %v3366_v31  ;;  %3728 = vmatpush.msra.mxu3 %v3328_v20  ;;  %v3394_v38 = vld [vmem:[#allocation9 + $0x398] sm:$0xff] }
 0x410   :  { %3709 = vmatpush.msra.mxu2 %v3294_v62  ;;  %3696 = vmatpush.msra.mxu1 %v3503_v22  ;;  %v3942_v31 = vld [vmem:[#allocation7] sm:$0xff]  ;;  %v3420_v22 = vld [vmem:[#allocation9 + $0x468] sm:$0xff] }
 0x411   :  { %3746 = vmatpush.msrb.mxu0 %v3364_v56  ;;  %3729 = vmatpush.msra.mxu3 %v3326_v27  ;;  %v1662_v20 = vperm.slane %v3942_v31, 7  ;;  %v3498_v62 = vld [vmem:[#allocation9 + $0x6d8] sm:$0xff]  ;;  %v3088_v56 = vpop.f32.mrf.mxu0 }
 0x412   :  { %3710 = vmatpush.msra.mxu2 %v3292_v3  ;;  %3761 = vmatpush.msrb.mxu1 %v3406_v33  ;;  %v3426_v27 = vld [vmem:[#allocation9 + $0x498] sm:$0xff]  ;;  %v3424_v3 = vld [vmem:[#allocation9 + $0x488] sm:$0xff] }
 0x413   :  { %3747 = vmatpush.msrb.mxu0 %v3362_v12  ;;  %3730 = vmatpush.msra.mxu3 %v3324_v58  ;;  %v3390_v12 = vld [vmem:[#allocation9 + $0x378] sm:$0xff]  ;;  %v3089_v58 = vadd.f32 %v3088_v56, %v1662_v20  ;;  %v3472_v56 = vld [vmem:[#allocation9 + $0x608] sm:$0xff] }
 0x414   :  { %3711 = vmatpush.msra.mxu2 %v3290_v9  ;;  %3762 = vmatpush.msrb.mxu1 %v3404_v36  ;;  %v3494_v9 = vld [vmem:[#allocation9 + $0x6b8] sm:$0xff] }
 0x415   :  { %3748 = vmatpush.msrb.mxu0 %v3360_v14  ;;  %3731 = vmatpush.msra.mxu3 %v3322_v28  ;;  %v3422_v14 = vld [vmem:[#allocation9 + $0x478] sm:$0xff]  ;;  %v3388_v28 = vld [vmem:[#allocation9 + $0x368] sm:$0xff] }
 0x416   :  { %3712 = vmatpush.msra.mxu2 %v3288_v54  ;;  %3763 = vmatpush.msrb.mxu1 %v3402_v7  ;;  %v3454_v55 = vld [vmem:[#allocation9 + $0x578] sm:$0xff]  ;;  %v3492_v54 = vld [vmem:[#allocation9 + $0x6a8] sm:$0xff] }
 0x417   :  { %3749 = vmatpush.msrb.mxu0 %v3358_v42  ;;  %3732 = vmatpush.msra.mxu3 %v3320_v16  ;;  %v3108_v42 = vpop.f32.mrf.mxu1  ;;  %v3128_v16 = vpop.f32.mrf.mxu2  ;;  %v3490_v33 = vld [vmem:[#allocation9 + $0x698] sm:$0xff]  ;;  %v3448_v7 = vld [vmem:[#allocation9 + $0x548] sm:$0xff] }
 0x418   :  { %3713 = vmatpush.msra.mxu2 %v3286_v30  ;;  %3764 = vmatpush.msrb.mxu1 %v3400_v29  ;;  %v3386_v30 = vld [vmem:[#allocation9 + $0x358] sm:$0xff]  ;;  %v3412_v29 = vld [vmem:[#allocation9 + $0x428] sm:$0xff] }
 0x419   :  { %3750 = vmatpush.msrb.mxu0 %v3356_v25  ;;  %3733 = vmatpush.msra.mxu3 %v3318_v13  ;;  %v3109_v25 = vadd.f32 %v3108_v42, %v3089_v58  ;;  %v3452_v13 = vld [vmem:[#allocation9 + $0x568] sm:$0xff]  ;;  %v3450_v36 = vld [vmem:[#allocation9 + $0x558] sm:$0xff] }
 0x41a   :  { %3714 = vmatpush.msra.mxu2 %v3284_v15  ;;  %3765 = vmatpush.msrb.mxu1 %v3398_v60  ;;  %v3418_v15 = vld [vmem:[#allocation9 + $0x458] sm:$0xff]  ;;  %v3168_v60 = vpop.f32.mrf.mxu0  ;;  %v3508_v42 = vld [vmem:[#allocation9 + $0x728] sm:$0xff] }
 0x41b   :  { %3751 = vmatpush.msrb.mxu0 %v3354_v0  ;;  %3734 = vmatpush.msra.mxu3 %v3316_v37  ;;  %v3384_v0 = vld [vmem:[#allocation9 + $0x348] sm:$0xff]  ;;  %v3129_v37 = vadd.f32 %v3128_v16, %v3109_v25  ;;  %v3474_v20 = vld [vmem:[#allocation9 + $0x618] sm:$0xff]  ;;  %v3535_v16 = vld [vmem:[#allocation10] sm:$0x3] }
 0x41c   :  { %3715 = vmatpush.msra.mxu2 %v3282_v35  ;;  %v3488_v35 = vld [vmem:[#allocation9 + $0x688] sm:$0xff]  ;;  %v3526_v58 = vld [vmem:[#allocation9 + $0x7b8] sm:$0xff] }
 0x41d   :  { %3752 = vmatpush.msrb.mxu0 %v3352_v61  ;;  %3735 = vmatpush.msra.mxu3 %v3314_v41  ;;  %v3416_v61 = vld [vmem:[#allocation9 + $0x448] sm:$0xff]  ;;  %v3382_v41 = vld [vmem:[#allocation9 + $0x338] sm:$0xff] }
 0x41e   :  { %3716 = vmatpush.msra.mxu2 %v3280_v47  ;;  %v3486_v47 = vld [vmem:[#allocation9 + $0x678] sm:$0xff] }
 0x41f   :  { %3753 = vmatpush.msrb.mxu0 %v3350_v46  ;;  %3736 = vmatpush.msra.mxu3 %v3312_v44  ;;  %v3148_v46 = vpop.f32.mrf.mxu3  ;;  %v3414_v44 = vld [vmem:[#allocation9 + $0x438] sm:$0xff] }
 0x420   :  { %3717 = vmatmul.f32.vlgmr.msra.gmra.mxu2 %v3271_v23  ;;  %3737 = vmatmul.f32.vlgmr.msra.gmra.mxu3 %v3272_v34  ;;  %v3464_v23 = vld [vmem:[#allocation9 + $0x5c8] sm:$0xff] }
 0x421   :  { %3781 = vmatpush.msrb.mxu2 %v3438_v45  ;;  %3801 = vmatpush.msrb.mxu3 %v3470_v48  ;;  %v3396_v34 = vld [vmem:[#allocation9 + $0x3a8] sm:$0xff]  ;;  %v3149_v48 = vadd.f32 %v3148_v46, %v3129_v37 }
 0x422   :  { %3754 = vmatpush.msrb.mxu0 %v3348_v52  ;;  %3766 = vmatpush.msrb.mxu1 %v3396_v34  ;;  %v3380_v45 = vld [vmem:[#allocation9 + $0x328] sm:$0xff]  ;;  %v3446_v52 = vld [vmem:[#allocation9 + $0x538] sm:$0xff] }
 0x423   :  { %3782 = vmatpush.msrb.mxu2 %v3436_v50  ;;  %3802 = vmatpush.msrb.mxu3 %v3468_v39  ;;  %v3484_v50 = vld [vmem:[#allocation9 + $0x668] sm:$0xff]  ;;  %v3378_v39 = vld [vmem:[#allocation9 + $0x318] sm:$0xff] }
 0x424   :  { %3755 = vmatpush.msrb.mxu0 %v3346_v51  ;;  %3767 = vmatpush.msrb.mxu1 %v3394_v38  ;;  %v3444_v51 = vld [vmem:[#allocation9 + $0x528] sm:$0xff] }
 0x425   :  { %3783 = vmatpush.msrb.mxu2 %v3434_v10  ;;  %3803 = vmatpush.msrb.mxu3 %v3466_v59  ;;  %v3482_v10 = vld [vmem:[#allocation9 + $0x658] sm:$0xff]  ;;  %v3440_v34 = vld [vmem:[#allocation9 + $0x508] sm:$0xff] }
 0x426   :  { %3756 = vmatpush.msrb.mxu0 %v3344_v4  ;;  %3768 = vmatpush.msrb.mxu1 %v3392_v11  ;;  %v3410_v59 = vld [vmem:[#allocation9 + $0x418] sm:$0xff]  ;;  %v3376_v4 = vld [vmem:[#allocation9 + $0x308] sm:$0xff] }
 0x427   :  { %3757 = vmatmul.f32.vlgmr.msrb.gmra.mxu0 %v3273_v21  ;;  %3784 = vmatpush.msrb.mxu2 %v3432_v8  ;;  %v3496_v21 = vld [vmem:[#allocation9 + $0x6c8] sm:$0xff]  ;;  %v3169_v8 = vadd.f32 %v3168_v60, %v3149_v48 }
 0x428   :  { %3804 = vmatpush.msrb.mxu3 %v3464_v23  ;;  %3821 = vmatpush.msra.mxu0 %v3502_v63  ;;  %v3442_v23 = vld [vmem:[#allocation9 + $0x518] sm:$0xff]  ;;  %v3480_v63 = vld [vmem:[#allocation9 + $0x648] sm:$0xff] }
 0x429   :  { %3785 = vmatpush.msrb.mxu2 %v3430_v19  ;;  %3769 = vmatpush.msrb.mxu1 %v3390_v12  ;;  %v3408_v19 = vld [vmem:[#allocation9 + $0x408] sm:$0xff] }
 0x42a   :  { %3805 = vmatpush.msrb.mxu3 %v3462_v1  ;;  %3822 = vmatpush.msra.mxu0 %v3500_v24  ;;  %v3478_v1 = vld [vmem:[#allocation9 + $0x638] sm:$0xff]  ;;  %v3188_v24 = vpop.f32.mrf.mxu1  ;;  %v3476_v38 = vld [vmem:[#allocation9 + $0x628] sm:$0xff] }
 0x42b   :  { %3786 = vmatpush.msrb.mxu2 %v3428_v5  ;;  %3770 = vmatpush.msrb.mxu1 %v3388_v28  ;;  %v3189_v5 = vadd.f32 %v3188_v24, %v3169_v8  ;;  %v3528_v12 = vld [vmem:[#allocation9 + $0x7c8] sm:$0xff]  ;;  %v3514_v28 = vld [vmem:[#allocation9 + $0x758] sm:$0xff] }
 0x42c   :  { %3806 = vmatpush.msrb.mxu3 %v3460_v49  ;;  %3823 = vmatpush.msra.mxu0 %v3498_v62 }
 0x42d   :  { %3787 = vmatpush.msrb.mxu2 %v3426_v27  ;;  %3771 = vmatpush.msrb.mxu1 %v3386_v30 }
 0x42e   :  { %3807 = vmatpush.msrb.mxu3 %v3458_v57  ;;  %3824 = vmatpush.msra.mxu0 %v3496_v21 }
 0x42f   :  { %3788 = vmatpush.msrb.mxu2 %v3424_v3  ;;  %3772 = vmatpush.msrb.mxu1 %v3384_v0 }
 0x430   :  { %3808 = vmatpush.msrb.mxu3 %v3456_v17  ;;  %3825 = vmatpush.msra.mxu0 %v3494_v9  ;;  %v3524_v17 = vld [vmem:[#allocation9 + $0x7a8] sm:$0xff]  ;;  %v3522_v9 = vld [vmem:[#allocation9 + $0x798] sm:$0xff] }
 0x431   :  { %3789 = vmatpush.msrb.mxu2 %v3422_v14  ;;  %3773 = vmatpush.msrb.mxu1 %v3382_v41  ;;  %v3516_v14 = vld [vmem:[#allocation9 + $0x768] sm:$0xff] }
 0x432   :  { %3809 = vmatpush.msrb.mxu3 %v3454_v55  ;;  %3826 = vmatpush.msra.mxu0 %v3492_v54  ;;  %v3512_v55 = vld [vmem:[#allocation9 + $0x748] sm:$0xff]  ;;  %v3510_v54 = vld [vmem:[#allocation9 + $0x738] sm:$0xff] }
 0x433   :  { %3790 = vmatpush.msrb.mxu2 %v3420_v22  ;;  %3774 = vmatpush.msrb.mxu1 %v3380_v45  ;;  %v3537_v22 = vperm.slane %v3535_v16, 0 }
 0x434   :  { %3810 = vmatpush.msrb.mxu3 %v3452_v13  ;;  %3827 = vmatpush.msra.mxu0 %v3490_v33 }
 0x435   :  { %3791 = vmatpush.msrb.mxu2 %v3418_v15  ;;  %3775 = vmatpush.msrb.mxu1 %v3378_v39 }
 0x436   :  { %3811 = vmatpush.msrb.mxu3 %v3450_v36  ;;  %3828 = vmatpush.msra.mxu0 %v3488_v35 }
 0x437   :  { %3792 = vmatpush.msrb.mxu2 %v3416_v61  ;;  %3776 = vmatpush.msrb.mxu1 %v3376_v4 }
 0x438   :  { %3812 = vmatpush.msrb.mxu3 %v3448_v7  ;;  %3829 = vmatpush.msra.mxu0 %v3486_v47 }
 0x439   :  { %3793 = vmatpush.msrb.mxu2 %v3414_v44  ;;  %v3208_v31 = vpop.f32.mrf.mxu2 }
 0x43a   :  { %3813 = vmatpush.msrb.mxu3 %v3446_v52  ;;  %3830 = vmatpush.msra.mxu0 %v3484_v50  ;;  %v3209_v49 = vadd.f32 %v3208_v31, %v3189_v5  ;;  %v3228_v62 = vpop.f32.mrf.mxu3  ;;  %v3538_v52 = vperm.slane %v3535_v16, 1 }
 0x43b   :  { %3794 = vmatpush.msrb.mxu2 %v3412_v29 }
 0x43c   :  { %3814 = vmatpush.msrb.mxu3 %v3444_v51  ;;  %3831 = vmatpush.msra.mxu0 %v3482_v10  ;;  %v3229_v27 = vadd.f32 %v3228_v62, %v3209_v49 }
 0x43d   :  { %3795 = vmatpush.msrb.mxu2 %v3410_v59 }
 0x43e   :  { %3815 = vmatpush.msrb.mxu3 %v3442_v23  ;;  %3832 = vmatpush.msra.mxu0 %v3480_v63 }
 0x43f   :  { %3796 = vmatpush.msrb.mxu2 %v3408_v19  ;;  %v3248_v11 = vpop.f32.mrf.mxu0 }
 0x440   :  { %3816 = vmatpush.msrb.mxu3 %v3440_v34  ;;  %3833 = vmatpush.msra.mxu0 %v3478_v1  ;;  %v3249_v57 = vadd.f32 %v3248_v11, %v3229_v27  ;;  %v3268_v21 = vpop.f32.mrf.mxu1 }
 0x441   :  { %3797 = vmatmul.f32.vlgmr.msrb.gmra.mxu2 %v3275_v32  ;;  %3817 = vmatmul.f32.vlgmr.msrb.gmra.mxu3 %v3276_v43  ;;  %v3534_v32 = vld [vmem:[#allocation9 + $0x7f8] sm:$0xff] }
 0x442   :  { %3834 = vmatpush.msra.mxu0 %v3476_v38  ;;  %v3269_v3 = vadd.f32 %v3268_v21, %v3249_v57  ;;  %v3530_v43 = vld [vmem:[#allocation9 + $0x7d8] sm:$0xff] }
 0x444   :  { %3835 = vmatpush.msra.mxu0 %v3474_v20  ;;  %v3278_v26 = vmax.f32 %v3269_v3, 0.0 }
 0x446   :  { %3836 = vmatpush.msra.mxu0 %v3472_v56  ;;  %3697 = vmatmul.f32.vlgmr.msra.gmra.mxu1 %v3278_v26 }
 0x447   :  { %3837 = vmatmul.f32.vlgmr.msra.gmra.mxu0 %v3277_v40  ;;  %3841 = vmatpush.msra.mxu1 %v3534_v32  ;;  %v3518_v40 = vld [vmem:[#allocation9 + $0x778] sm:$0xff] }
 0x449   :  { %3842 = vmatpush.msra.mxu1 %v3532_v18 }
 0x44b   :  { %3843 = vmatpush.msra.mxu1 %v3530_v43 }
 0x44d   :  { %3844 = vmatpush.msra.mxu1 %v3528_v12 }
 0x44e   :  { %3777 = vmatmul.f32.vlgmr.msrb.gmra.mxu1 %v3274_v2  ;;  %v3504_v2 = vld [vmem:[#allocation9 + $0x708] sm:$0xff] }
 0x44f   :  { %3845 = vmatpush.msra.mxu1 %v3526_v58 }
 0x451   :  { %3846 = vmatpush.msra.mxu1 %v3524_v17 }
 0x453   :  { %3847 = vmatpush.msra.mxu1 %v3522_v9 }
 0x455   :  { %3848 = vmatpush.msra.mxu1 %v3520_v53 }
 0x457   :  { %3849 = vmatpush.msra.mxu1 %v3518_v40 }
 0x459   :  { %3850 = vmatpush.msra.mxu1 %v3516_v14 }
 0x45b   :  { %3851 = vmatpush.msra.mxu1 %v3514_v28 }
 0x45d   :  { %3852 = vmatpush.msra.mxu1 %v3512_v55 }
 0x45f   :  { %3853 = vmatpush.msra.mxu1 %v3510_v54 }
 0x460   :  { %v3558_v30 = vpop.f32.mrf.mxu2 }
 0x461   :  { %3854 = vmatpush.msra.mxu1 %v3508_v42  ;;  %v3559_v25 = vadd.f32 %v3558_v30, %v3537_v22  ;;  %v3578_v13 = vpop.f32.mrf.mxu3  ;;  %v3598_v15 = vpop.f32.mrf.mxu0 }
 0x462   :  { %v3618_v37 = vpop.f32.mrf.mxu1 }
 0x463   :  { %3855 = vmatpush.msra.mxu1 %v3506_v6  ;;  %v3579_v33 = vadd.f32 %v3578_v13, %v3559_v25 }
 0x465   :  { %3856 = vmatpush.msra.mxu1 %v3504_v2  ;;  %v3599_v0 = vadd.f32 %v3598_v15, %v3579_v33 }
 0x466   :  { %3857 = vmatmul.f32.vlgmr.msra.gmra.mxu1 %v3278_v26 }
 0x467   :  { %v3619_v35 = vadd.f32 %v3618_v37, %v3599_v0 }
 0x482   :  { %v3638_v36 = vpop.f32.mrf.mxu2  ;;  %v3658_v41 = vpop.f32.mrf.mxu3 }
 0x483   :  { %v3639_v61 = vadd.f32 %v3638_v36, %v3619_v35 }
 0x485   :  { %v3678_v7 = vpop.f32.mrf.mxu0  ;;  %v3659_v47 = vadd.f32 %v3658_v41, %v3639_v61 }
 0x487   :  { %v3679_v46 = vadd.f32 %v3678_v7, %v3659_v47 }
 0x4a3   :  { %v3718_v50 = vpop.f32.mrf.mxu2  ;;  %v3738_v51 = vpop.f32.mrf.mxu3 }
 0x4a4   :  { %v3719_v29 = vadd.f32 %v3718_v50, %v3538_v52  ;;  %v3758_v59 = vpop.f32.mrf.mxu0 }
 0x4a6   :  { %v3739_v60 = vadd.f32 %v3738_v51, %v3719_v29 }
 0x4a8   :  { %v3759_v8 = vadd.f32 %v3758_v59, %v3739_v60 }
 0x4c3   :  { %v3698_v44 = vpop.f32.mrf.mxu1 }
 0x4c4   :  { %v3699_v45 = vadd.f32 %v3698_v44, %v3679_v46  ;;  %v3798_v34 = vpop.f32.mrf.mxu2  ;;  %v3818_v20 = vpop.f32.mrf.mxu3 }
 0x4c5   :  { %v3838_v11 = vpop.f32.mrf.mxu0 }
 0x4c6   :  { %v3919_v48 = vmul.f32 -1.442695, %v3699_v45 }
 0x4c8   :  { %3933 = vpow2.f32 %v3919_v48 }
 0x4cb   :  { %v3778_v4 = vpop.f32.mrf.mxu1 }
 0x4cc   :  { %v3779_v23 = vadd.f32 %v3778_v4, %v3759_v8 }
 0x4ce   :  { %v3934_v39 = vpop.eup %3933  ;;  %v3799_v24 = vadd.f32 %v3798_v34, %v3779_v23 }
 0x4cf   :  { %v3867_v10 = vadd.f32 1.0, %v3934_v39 }
 0x4d0   :  { %v3819_v62 = vadd.f32 %v3818_v20, %v3799_v24 }
 0x4d1   :  { %3935 = vrcp.f32 %v3867_v10  ;;  %v3880_v5 = vand.u32 2147483648, %v3867_v10  ;;  %v3878_v31 = vand.u32 2147483647, %v3867_v10  ;;  %vm3874_vm2 = vweird.f32 %v3867_v10 }
 0x4d2   :  { %v3839_v21 = vadd.f32 %v3838_v11, %v3819_v62 }
 0x4d3   :  { %v3881_v56 = vor.u32 1.1754944e-38, %v3880_v5  ;;  %vm3879_vm4 = vcmp.eq.f32.partialorder %v3878_v31, 8.507059e+37 }
 0x4d7   :  { %v3936_v63 = vpop.eup %3935 }
 0x4d8   :  { %v3870_v19 = vmul.f32 %v3936_v63, %v3867_v10  ;;  %vm3875_vm1 = vweird.f32 %v3936_v63 }
 0x4d9   :  { %vm3876_vm3 = vmor %vm3874_vm2, %vm3875_vm1 }
 0x4da   :  { %v3871_v1 = vsub.f32 1.0, %v3870_v19 }
 0x4dc   :  { %v3872_v38 = vmul.f32 %v3936_v63, %v3871_v1 }
 0x4de   :  { %v3873_v49 = vadd.f32 %v3936_v63, %v3872_v38 }
 0x4e0   :  { %v3877_v27 = vsel %vm3876_vm3, %v3936_v63, %v3873_v49 }
 0x4e1   :  { %v3882_v57 = vsel %vm3879_vm4, %v3881_v56, %v3877_v27 }
 0x4e2   :  { %3899 = vst [vmem:[%s4520_s7] sm:$0xff] %v3882_v57 }
 0x4e3   :  { %v3858_v3 = vpop.f32.mrf.mxu1 }
 0x4e4   :  { %v3859_v26 = vadd.f32 %v3858_v3, %v3839_v21 }
 0x4e6   :  { %v3920_v32 = vmul.f32 -1.442695, %v3859_v26 }
 0x4e8   :  { %3937 = vpow2.f32 %v3920_v32 }
 0x4ee   :  { %v3938_v18 = vpop.eup %3937 }
 0x4ef   :  { %v3868_v43 = vadd.f32 1.0, %v3938_v18 }
 0x4f1   :  { %3939 = vrcp.f32 %v3868_v43  ;;  %v3895_v9 = vand.u32 2147483648, %v3868_v43  ;;  %v3893_v40 = vand.u32 2147483647, %v3868_v43  ;;  %vm3889_vm6 = vweird.f32 %v3868_v43 }
 0x4f3   :  { %v3896_v28 = vor.u32 1.1754944e-38, %v3895_v9  ;;  %vm3894_vm8 = vcmp.eq.f32.partialorder %v3893_v40, 8.507059e+37 }
 0x4f7   :  { %v3940_v12 = vpop.eup %3939 }
 0x4f8   :  { %v3885_v58 = vmul.f32 %v3940_v12, %v3868_v43  ;;  %vm3890_vm5 = vweird.f32 %v3940_v12 }
 0x4f9   :  { %vm3891_vm7 = vmor %vm3889_vm6, %vm3890_vm5 }
 0x4fa   :  { %v3886_v17 = vsub.f32 1.0, %v3885_v58 }
 0x4fc   :  { %v3887_v53 = vmul.f32 %v3940_v12, %v3886_v17 }
 0x4fe   :  { %v3888_v14 = vadd.f32 %v3940_v12, %v3887_v53 }
 0x500   :  { %v3892_v55 = vsel %vm3891_vm7, %v3940_v12, %v3888_v14 }
 0x501   :  { %v3897_v54 = vsel %vm3894_vm8, %v3896_v28, %v3892_v55 }
 0x502   :  { %3900 = vst [vmem:[%s4520_s7 + $0x8] sm:$0xff] %v3897_v54 }
 0x503   :  { %3905 = vsyncpa [#allocation3], 1 }
 0x504   :  { %3906 = vsyncpa [#allocation5], 1 }
 0x505   :  { %3907 = vsyncpa [#allocation8], 1 }
 0x506   :  { %3908 = vsyncpa [#allocation11], 1 }

</bundles_post_ra>
